<compile_context>
chip_gen: v6e
topology: v6e:2x2x1
jax: 0.10.0
libtpu: 0.0.40
codegen_flags: <defaults>
</compile_context>

<pallas_src>
import math

import jax
import jax.numpy as jnp
from jax.experimental import pallas as pl
from jax.experimental.pallas import tpu as pltpu

_BN_EPS = 1e-5
_BN_SCALE = 1.0 / math.sqrt(1.0 + _BN_EPS)   # eval-mode BN multiplier (gamma=1, var=1)
_CP = 128                                    # output-channel lanes carried between layers
_SUB = 16                                    # bf16-friendly sublane multiple for row tiles


def _round_up(x, m):
    return ((x + m - 1) // m) * m


def _tpu_config():
    """Per-generation tiling: (max rows per grid step, scoped-VMEM limit bytes)."""
    tm_max, vmem_limit = 512, 48 * 1024 * 1024            # safe default (v7x: 64 MiB VMEM/TC)
    try:
        cap = int(pltpu.get_tpu_info().vmem_capacity_bytes)
        vmem_limit = min(100 * 1024 * 1024, (cap * 3) // 4)
        tm_max = 1024 if vmem_limit >= 80 * 1024 * 1024 else 512   # v5e/v6e: 128 MiB VMEM
    except Exception:
        pass
    return tm_max, vmem_limit


_TM_MAX, _VMEM_LIMIT = _tpu_config()


def _pick_tiles(m):
    """Row tile + padded row count; aim for >=2 grid steps (2nd TensorCore on v7x)."""
    m16 = _round_up(m, _SUB)
    tm = min(_TM_MAX, m16)
    if tm >= m16 and m16 > _SUB:
        tm = _round_up((m16 + 1) // 2, _SUB)
    return tm, _round_up(m16, tm)


# ------------------------------ Pallas kernels ------------------------------

def _make_conv_kernel(act, has_res):
    """o = act( patches @ w  (+ residual) );  BN already folded into w."""
    def kernel(*refs):
        if has_res:
            x_ref, w_ref, r_ref, o_ref = refs
        else:
            x_ref, w_ref, o_ref = refs
        y = jnp.dot(x_ref[...], w_ref[...], preferred_element_type=jnp.float32)
        if has_res:
            y = y + r_ref[...].astype(jnp.float32)
        if act == "relu":
            y = jnp.maximum(y, 0.0)
        elif act == "relu_tanh":            # block ReLU then torch.tanh (layer4 tail)
            y = jnp.tanh(jnp.maximum(y, 0.0))
        elif act == "tanh":
            y = jnp.tanh(y)
        # act == "none": identity
        o_ref[...] = y.astype(o_ref.dtype)
    return kernel


def _make_maxpool_kernel(taps):
    def kernel(x_ref, o_ref):
        y = x_ref[0]
        for t in range(1, taps):
            y = jnp.maximum(y, x_ref[t])
        o_ref[...] = y.astype(o_ref.dtype)
    return kernel


def _pool_fc_sigmoid_kernel(x_ref, w_ref, b_ref, o_ref):
    # AdaptiveAvgPool2d((1,1)) + flatten + Linear + sigmoid, fused in one kernel.
    inv_s = 1.0 / x_ref.shape[1]
    feat = jnp.sum(x_ref[...].astype(jnp.float32), axis=1) * inv_s     # (N, 128)
    y = jnp.dot(feat.astype(jnp.bfloat16), w_ref[...],
                preferred_element_type=jnp.float32) + b_ref[...]
    o_ref[...] = 0.5 * (jnp.tanh(0.5 * y) + 1.0)                       # stable sigmoid (EUP)


# ------------------------------ host-side glue ------------------------------

def _im2col(x, cin, kh, kw, stride, pad):
    """x: (N,H,W,C>=cin) bf16 -> ((N*Ho*Wo, kh*kw*cin) patches, Ho, Wo).

    Only the `cin` real channels are gathered, so the contraction dim carries no
    channel padding (the pad to a 128 multiple is done once by the caller)."""
    n, h, w, _ = x.shape
    ho = (h + 2 * pad - kh) // stride + 1
    wo = (w + 2 * pad - kw) // stride + 1
    xr = x[..., :cin]
    if pad:
        xr = jnp.pad(xr, ((0, 0), (pad, pad), (pad, pad), (0, 0)))
    cols = [xr[:, i:i + stride * ho:stride, j:j + stride * wo:stride, :]
            for i in range(kh) for j in range(kw)]
    patches = jnp.concatenate(cols, axis=-1)            # (N, Ho, Wo, kh*kw*cin)
    # TODO(synk): form the halo/tap windows in-kernel from a VMEM-resident activation
    # (stride-2 / overlapping windows are not expressible via BlockSpec index_maps),
    # which would remove the remaining overlap-factor HBM expansion of the patches.
    return patches.reshape(n * ho * wo, kh * kw * cin), ho, wo


def _conv_call(cols, w, residual, act):
    m, kp = cols.shape
    tm, m_pad = _pick_tiles(m)
    if m_pad != m:
        cols = jnp.pad(cols, ((0, m_pad - m), (0, 0)))
        if residual is not None:
            residual = jnp.pad(residual, ((0, m_pad - m), (0, 0)))
    in_specs = [pl.BlockSpec((tm, kp), lambda i: (i, 0)),
                pl.BlockSpec((kp, _CP), lambda i: (0, 0))]       # weights stay VMEM-resident
    args = [cols, w]
    if residual is not None:
        in_specs.append(pl.BlockSpec((tm, _CP), lambda i: (i, 0)))
        args.append(residual)
    out = pl.pallas_call(
        _make_conv_kernel(act, residual is not None),
        out_shape=jax.ShapeDtypeStruct((m_pad, _CP), jnp.bfloat16),
        grid=(m_pad // tm,),
        in_specs=in_specs,
        out_specs=pl.BlockSpec((tm, _CP), lambda i: (i, 0)),
        compiler_params=pltpu.CompilerParams(
            dimension_semantics=("parallel",),
            vmem_limit_bytes=_VMEM_LIMIT),
    )(*args)
    return out[:m] if m_pad != m else out


def conv_block(x, cw, stride, pad, act, residual=None):
    """Conv2d (BN folded) + optional residual add + activation; 128-lane NHWC bf16 out."""
    n = x.shape[0]
    cols, ho, wo = _im2col(x, cw["cin"], cw["kh"], cw["kw"], stride, pad)
    k_pad = cw["w"].shape[0]
    if cols.shape[1] != k_pad:
        cols = jnp.pad(cols, ((0, 0), (0, k_pad - cols.shape[1])))
    r = None if residual is None else residual.reshape(n * ho * wo, residual.shape[-1])
    y = _conv_call(cols, cw["w"], r, act)
    return y.reshape(n, ho, wo, _CP)


def maxpool_3x3_s2_p1(x):
    n, h, w, c = x.shape
    ho = (h - 1) // 2 + 1
    wo = (w - 1) // 2 + 1
    xp = jnp.pad(x, ((0, 0), (1, 1), (1, 1), (0, 0)), constant_values=-jnp.inf)
    taps = jnp.stack([xp[:, i:i + 2 * ho:2, j:j + 2 * wo:2, :].reshape(n * ho * wo, c)
                      for i in range(3) for j in range(3)], axis=0)
    m = n * ho * wo
    tm, m_pad = _pick_tiles(m)
    if m_pad != m:
        taps = jnp.pad(taps, ((0, 0), (0, m_pad - m), (0, 0)))
    out = pl.pallas_call(
        _make_maxpool_kernel(9),
        out_shape=jax.ShapeDtypeStruct((m_pad, c), jnp.bfloat16),
        grid=(m_pad // tm,),
        in_specs=[pl.BlockSpec((9, tm, c), lambda i: (0, i, 0))],
        out_specs=pl.BlockSpec((tm, c), lambda i: (i, 0)),
        compiler_params=pltpu.CompilerParams(
            dimension_semantics=("parallel",),
            vmem_limit_bytes=_VMEM_LIMIT),
    )(taps)
    out = out[:m] if m_pad != m else out
    return out.reshape(n, ho, wo, c)


def _pool_fc_sigmoid(x, w_pad, b_pad, n_out):
    """Fused AdaptiveAvgPool2d((1,1)) + flatten + Linear + sigmoid."""
    n, hf, wf, c = x.shape
    s = hf * wf
    n_pad = _round_up(max(n, 8), 8)
    xr = x.reshape(n, s, c)
    if n_pad != n:
        xr = jnp.pad(xr, ((0, n_pad - n), (0, 0), (0, 0)))
    out = pl.pallas_call(
        _pool_fc_sigmoid_kernel,
        out_shape=jax.ShapeDtypeStruct((n_pad, _CP), jnp.float32),
        grid=(1,),
        in_specs=[pl.BlockSpec((n_pad, s, c), lambda i: (0, 0, 0)),
                  pl.BlockSpec((c, _CP), lambda i: (0, 0)),
                  pl.BlockSpec((1, _CP), lambda i: (0, 0))],
        out_specs=pl.BlockSpec((n_pad, _CP), lambda i: (0, 0)),
        compiler_params=pltpu.CompilerParams(
            dimension_semantics=("arbitrary",),
            vmem_limit_bytes=_VMEM_LIMIT),
    )(xr, w_pad, b_pad)
    return out[:n, :n_out]


# --------------------------- parameters / model ---------------------------

def _kaiming_conv(key, cout, cin, kh, kw):
    fan_out = cout * kh * kw                    # kaiming_normal_, mode='fan_out', relu
    std = math.sqrt(2.0 / fan_out)
    return jax.random.normal(key, (cout, cin, kh, kw), jnp.float32) * std


def _make_layer_params(key, inplanes, planes, blocks, stride):
    layer = []
    for b in range(blocks):
        s = stride if b == 0 else 1
        key, k1, k2, k3 = jax.random.split(key, 4)
        need_ds = (b == 0) and (s != 1 or inplanes != planes)    # expansion == 1
        layer.append({
            "conv1": _kaiming_conv(k1, planes, inplanes, 3, 3),
            "conv2": _kaiming_conv(k2, planes, planes, 3, 3),
            "ds": _kaiming_conv(k3, planes, inplanes, 1, 1) if need_ds else None,
            "stride": s,
        })
        inplanes = planes
    return layer, inplanes, key


def init_params(key, layers=(1, 1, 1, 1), num_point=12):
    params = {}
    key, k = jax.random.split(key)
    params["conv1"] = _kaiming_conv(k, 3, 3, 7, 7)              # Conv2d(3, 3, 7, s2, p3)
    inplanes = 3
    params["layer1"], inplanes, key = _make_layer_params(key, inplanes, 64, layers[0], 1)
    params["layer2"], inplanes, key = _make_layer_params(key, inplanes, 128, layers[1], 2)
    params["layer3"], inplanes, key = _make_layer_params(key, inplanes, 64, layers[2], 2)
    params["layer4"], inplanes, key = _make_layer_params(key, inplanes, 1, layers[3], 2)
    params["layer5"], inplanes, key = _make_layer_params(key, inplanes, 32, 3, 2)
    key, kw_, kb_ = jax.random.split(key, 3)
    bound = 1.0 / math.sqrt(32.0)
    params["fc_w"] = jax.random.uniform(kw_, (num_point * 2, 32), jnp.float32, -bound, bound)
    params["fc_b"] = jax.random.uniform(kb_, (num_point * 2,), jnp.float32, -bound, bound)
    return params


def _prep_conv(w_oihw):
    """Fold eval-mode BN, pack (taps x Cin) into the contraction dim, pad to 128 lanes."""
    # TODO(synk): for trained checkpoints fold the real per-channel gamma/beta/mean/var
    # (and carry the resulting bias); at init-state BN reduces to a constant scale.
    cout, cin, kh, kw = w_oihw.shape
    k_real = kh * kw * cin
    k_pad = _round_up(k_real, 128)
    w = w_oihw.astype(jnp.float32) * _BN_SCALE
    w = jnp.transpose(w, (2, 3, 1, 0)).reshape(k_real, cout)    # tap-major, cin-minor rows
    w = jnp.pad(w, ((0, k_pad - k_real), (0, _CP - cout)))
    return {"w": w.astype(jnp.bfloat16), "cin": cin, "kh": kh, "kw": kw}


def prepare_params(params):
    prep = {"conv1": _prep_conv(params["conv1"])}
    for name in ("layer1", "layer2", "layer3", "layer4", "layer5"):
        prep[name] = [{
            "conv1": _prep_conv(blk["conv1"]),
            "conv2": _prep_conv(blk["conv2"]),
            "ds": None if blk["ds"] is None else _prep_conv(blk["ds"]),
            "stride": blk["stride"],
        } for blk in params[name]]
    n_out, c_in = params["fc_w"].shape
    prep["fc_w"] = jnp.pad(params["fc_w"].T,
                           ((0, _CP - c_in), (0, _CP - n_out))).astype(jnp.bfloat16)
    prep["fc_b"] = jnp.pad(params["fc_b"],
                           (0, _CP - n_out)).reshape(1, _CP).astype(jnp.float32)
    return prep


def basic_block(x, blk, final_act="relu"):
    # TODO(synk): fuse conv1 -> conv2 (+1x1 downsample, residual, activation) into a
    # single pallas_call keeping the intermediate in VMEM; requires in-kernel halo im2col.
    if blk["ds"] is not None:
        identity = conv_block(x, blk["ds"], blk["stride"], 0, "none")
    else:
        identity = x
    out = conv_block(x, blk["conv1"], blk["stride"], 1, "relu")
    # conv2 + BN(folded) + identity add + relu (+ trailing torch.tanh) fused in one kernel
    out = conv_block(out, blk["conv2"], 1, 1, final_act, residual=identity)
    return out


def run_layer(x, blocks, tanh_after=False):
    for bi, blk in enumerate(blocks):
        last = bi == len(blocks) - 1
        fa = "relu_tanh" if (tanh_after and last) else "relu"
        x = basic_block(x, blk, final_act=fa)
    return x


def forward(prep, x_nchw, n_out):
    """mode == 0 path of ResPoseWNet.forward (full _forward_impl)."""
    x = jnp.transpose(x_nchw, (0, 2, 3, 1)).astype(jnp.bfloat16)   # NCHW -> NHWC (3 ch)
    x = conv_block(x, prep["conv1"], 2, 3, "relu")                 # conv1 + bn1 + relu
    x = maxpool_3x3_s2_p1(x)
    x = run_layer(x, prep["layer1"])
    x = run_layer(x, prep["layer2"])
    x = run_layer(x, prep["layer3"])
    x = run_layer(x, prep["layer4"], tanh_after=True)              # torch.tanh(layer4(x))
    x = run_layer(x, prep["layer5"])
    return _pool_fc_sigmoid(x, prep["fc_w"], prep["fc_b"], n_out)  # avgpool+flatten+fc+sigmoid


if __name__ == "__main__":
    key = jax.random.PRNGKey(0)
    pkey, xkey = jax.random.split(key)
    params = init_params(pkey, layers=(1, 1, 1, 1), num_point=12)
    prep = prepare_params(params)
    n_out = params["fc_w"].shape[0]
    x = jax.random.normal(xkey, (2, 3, 32, 32), jnp.float32)       # NCHW like PyTorch
    fwd = jax.jit(lambda inp: forward(prep, inp, n_out))
    y = jax.block_until_ready(fwd(x))
    assert y.shape == (2, 24), y.shape
    assert bool(jnp.all(jnp.isfinite(y)))
    assert bool(jnp.all((y >= 0.0) & (y <= 1.0)))
    print("KERNEL_OK")
</pallas_src>

<mosaic_0001>
module attributes {stable_mosaic.version = 11 : i64} {
  func.func @kernel(%arg0: i32, %arg1: memref<256x256xbf16, #tpu.memory_space<vmem>>, %arg2: memref<256x128xbf16, #tpu.memory_space<vmem>>, %arg3: memref<256x128xbf16, #tpu.memory_space<vmem>>) attributes {dimension_semantics = [#tpu.dimension_semantics<parallel>], iteration_bounds = array<i64: 2>, scalar_prefetch = 0 : i64, scratch_operands = 0 : i64, tpu.core_type = #tpu.core_type<tc>, window_params = [{transform_indices = @transform_0, window_bounds = array<i64: 256, 256>}, {pipeline_mode = #tpu.pipeline_mode<synchronous>, transform_indices = @transform_1, window_bounds = array<i64: 256, 128>}, {transform_indices = @transform_2, window_bounds = array<i64: 256, 128>}]} {
    %c0 = arith.constant 0 : index
    %c0_0 = arith.constant 0 : index
    %0 = vector.load %arg1[%c0, %c0_0] : memref<256x256xbf16, #tpu.memory_space<vmem>>, vector<256x256xbf16>
    %c0_1 = arith.constant 0 : index
    %c0_2 = arith.constant 0 : index
    %1 = vector.load %arg2[%c0_1, %c0_2] : memref<256x128xbf16, #tpu.memory_space<vmem>>, vector<256x128xbf16>
    %cst = arith.constant dense<0.000000e+00> : vector<256x128xf32>
    %2 = tpu.matmul %0, %1, %cst {dimension_numbers = #tpu.dot_dimension_numbers<[1], [0], [0], [1], [0, 0, 1, 1], [], []>} : vector<256x256xbf16>, vector<256x128xbf16>, vector<256x128xf32> -> vector<256x128xf32>
    %cst_3 = arith.constant 0.000000e+00 : f32
    %3 = vector.broadcast %cst_3 : f32 to vector<256x128xf32>
    %4 = arith.maximumf %2, %3 : vector<256x128xf32>
    %5 = arith.truncf %4 : vector<256x128xf32> to vector<256x128xbf16>
    %c0_4 = arith.constant 0 : index
    %c0_5 = arith.constant 0 : index
    %6 = vector.load %arg3[%c0_4, %c0_5] : memref<256x128xbf16, #tpu.memory_space<vmem>>, vector<256x128xbf16>
    tpu.vector_store %arg3[%c0_4, %c0_5], %5 {strides = array<i32>} : memref<256x128xbf16, #tpu.memory_space<vmem>>, vector<256x128xbf16>,
    return
  }
  func.func @transform_0(%arg0: i32) -> (i32, i32) {
    %c0_i32 = arith.constant 0 : i32
    %c0_i32_0 = arith.constant 0 : i32
    return %arg0, %c0_i32 : i32, i32
  }
  func.func @transform_1(%arg0: i32) -> (i32, i32) {
    %c0_i32 = arith.constant 0 : i32
    %c0_i32_0 = arith.constant 0 : i32
    %c0_i32_1 = arith.constant 0 : i32
    return %c0_i32, %c0_i32_0 : i32, i32
  }
  func.func @transform_2(%arg0: i32) -> (i32, i32) {
    %c0_i32 = arith.constant 0 : i32
    %c0_i32_0 = arith.constant 0 : i32
    return %arg0, %c0_i32 : i32, i32
  }
}

module attributes {stable_mosaic.version = 11 : i64} {
  func.func @kernel(%arg0: i32, %arg1: memref<9x64x128xbf16, #tpu.memory_space<vmem>>, %arg2: memref<64x128xbf16, #tpu.memory_space<vmem>>) attributes {dimension_semantics = [#tpu.dimension_semantics<parallel>], iteration_bounds = array<i64: 2>, scalar_prefetch = 0 : i64, scratch_operands = 0 : i64, tpu.core_type = #tpu.core_type<tc>, window_params = [{transform_indices = @transform_0, window_bounds = array<i64: 9, 64, 128>}, {transform_indices = @transform_1, window_bounds = array<i64: 64, 128>}]} {
    %c0 = arith.constant 0 : index
    %c0_0 = arith.constant 0 : index
    %c0_1 = arith.constant 0 : index
    %0 = vector.load %arg1[%c0, %c0_0, %c0_1] : memref<9x64x128xbf16, #tpu.memory_space<vmem>>, vector<1x64x128xbf16>
    %1 = vector.shape_cast %0 : vector<1x64x128xbf16> to vector<64x128xbf16>
    %c1 = arith.constant 1 : index
    %c0_2 = arith.constant 0 : index
    %c0_3 = arith.constant 0 : index
    %2 = vector.load %arg1[%c1, %c0_2, %c0_3] : memref<9x64x128xbf16, #tpu.memory_space<vmem>>, vector<1x64x128xbf16>
    %3 = vector.shape_cast %2 : vector<1x64x128xbf16> to vector<64x128xbf16>
    %4 = arith.maximumf %1, %3 : vector<64x128xbf16>
    %c2 = arith.constant 2 : index
    %c0_4 = arith.constant 0 : index
    %c0_5 = arith.constant 0 : index
    %5 = vector.load %arg1[%c2, %c0_4, %c0_5] : memref<9x64x128xbf16, #tpu.memory_space<vmem>>, vector<1x64x128xbf16>
    %6 = vector.shape_cast %5 : vector<1x64x128xbf16> to vector<64x128xbf16>
    %7 = arith.maximumf %4, %6 : vector<64x128xbf16>
    %c3 = arith.constant 3 : index
    %c0_6 = arith.constant 0 : index
    %c0_7 = arith.constant 0 : index
    %8 = vector.load %arg1[%c3, %c0_6, %c0_7] : memref<9x64x128xbf16, #tpu.memory_space<vmem>>, vector<1x64x128xbf16>
    %9 = vector.shape_cast %8 : vector<1x64x128xbf16> to vector<64x128xbf16>
    %10 = arith.maximumf %7, %9 : vector<64x128xbf16>
    %c4 = arith.constant 4 : index
    %c0_8 = arith.constant 0 : index
    %c0_9 = arith.constant 0 : index
    %11 = vector.load %arg1[%c4, %c0_8, %c0_9] : memref<9x64x128xbf16, #tpu.memory_space<vmem>>, vector<1x64x128xbf16>
    %12 = vector.shape_cast %11 : vector<1x64x128xbf16> to vector<64x128xbf16>
    %13 = arith.maximumf %10, %12 : vector<64x128xbf16>
    %c5 = arith.constant 5 : index
    %c0_10 = arith.constant 0 : index
    %c0_11 = arith.constant 0 : index
    %14 = vector.load %arg1[%c5, %c0_10, %c0_11] : memref<9x64x128xbf16, #tpu.memory_space<vmem>>, vector<1x64x128xbf16>
    %15 = vector.shape_cast %14 : vector<1x64x128xbf16> to vector<64x128xbf16>
    %16 = arith.maximumf %13, %15 : vector<64x128xbf16>
    %c6 = arith.constant 6 : index
    %c0_12 = arith.constant 0 : index
    %c0_13 = arith.constant 0 : index
    %17 = vector.load %arg1[%c6, %c0_12, %c0_13] : memref<9x64x128xbf16, #tpu.memory_space<vmem>>, vector<1x64x128xbf16>
    %18 = vector.shape_cast %17 : vector<1x64x128xbf16> to vector<64x128xbf16>
    %19 = arith.maximumf %16, %18 : vector<64x128xbf16>
    %c7 = arith.constant 7 : index
    %c0_14 = arith.constant 0 : index
    %c0_15 = arith.constant 0 : index
    %20 = vector.load %arg1[%c7, %c0_14, %c0_15] : memref<9x64x128xbf16, #tpu.memory_space<vmem>>, vector<1x64x128xbf16>
    %21 = vector.shape_cast %20 : vector<1x64x128xbf16> to vector<64x128xbf16>
    %22 = arith.maximumf %19, %21 : vector<64x128xbf16>
    %c8 = arith.constant 8 : index
    %c0_16 = arith.constant 0 : index
    %c0_17 = arith.constant 0 : index
    %23 = vector.load %arg1[%c8, %c0_16, %c0_17] : memref<9x64x128xbf16, #tpu.memory_space<vmem>>, vector<1x64x128xbf16>
    %24 = vector.shape_cast %23 : vector<1x64x128xbf16> to vector<64x128xbf16>
    %25 = arith.maximumf %22, %24 : vector<64x128xbf16>
    %c0_18 = arith.constant 0 : index
    %c0_19 = arith.constant 0 : index
    %26 = vector.load %arg2[%c0_18, %c0_19] : memref<64x128xbf16, #tpu.memory_space<vmem>>, vector<64x128xbf16>
    tpu.vector_store %arg2[%c0_18, %c0_19], %25 {strides = array<i32>} : memref<64x128xbf16, #tpu.memory_space<vmem>>, vector<64x128xbf16>,
    return
  }
  func.func @transform_0(%arg0: i32) -> (i32, i32, i32) {
    %c0_i32 = arith.constant 0 : i32
    %c0_i32_0 = arith.constant 0 : i32
    %c0_i32_1 = arith.constant 0 : i32
    return %c0_i32, %arg0, %c0_i32_0 : i32, i32, i32
  }
  func.func @transform_1(%arg0: i32) -> (i32, i32) {
    %c0_i32 = arith.constant 0 : i32
    %c0_i32_0 = arith.constant 0 : i32
    return %arg0, %c0_i32 : i32, i32
  }
}

module attributes {stable_mosaic.version = 11 : i64} {
  func.func @kernel(%arg0: i32, %arg1: memref<64x128xbf16, #tpu.memory_space<vmem>>, %arg2: memref<128x128xbf16, #tpu.memory_space<vmem>>, %arg3: memref<64x128xbf16, #tpu.memory_space<vmem>>) attributes {dimension_semantics = [#tpu.dimension_semantics<parallel>], iteration_bounds = array<i64: 2>, scalar_prefetch = 0 : i64, scratch_operands = 0 : i64, tpu.core_type = #tpu.core_type<tc>, window_params = [{transform_indices = @transform_0, window_bounds = array<i64: 64, 128>}, {pipeline_mode = #tpu.pipeline_mode<synchronous>, transform_indices = @transform_1, window_bounds = array<i64: 128, 128>}, {transform_indices = @transform_2, window_bounds = array<i64: 64, 128>}]} {
    %c0 = arith.constant 0 : index
    %c0_0 = arith.constant 0 : index
    %0 = vector.load %arg1[%c0, %c0_0] : memref<64x128xbf16, #tpu.memory_space<vmem>>, vector<64x128xbf16>
    %c0_1 = arith.constant 0 : index
    %c0_2 = arith.constant 0 : index
    %1 = vector.load %arg2[%c0_1, %c0_2] : memref<128x128xbf16, #tpu.memory_space<vmem>>, vector<128x128xbf16>
    %cst = arith.constant dense<0.000000e+00> : vector<64x128xf32>
    %2 = tpu.matmul %0, %1, %cst {dimension_numbers = #tpu.dot_dimension_numbers<[1], [0], [0], [1], [0, 0, 1, 1], [], []>} : vector<64x128xbf16>, vector<128x128xbf16>, vector<64x128xf32> -> vector<64x128xf32>
    %cst_3 = arith.constant 0.000000e+00 : f32
    %3 = vector.broadcast %cst_3 : f32 to vector<64x128xf32>
    %4 = arith.maximumf %2, %3 : vector<64x128xf32>
    %5 = arith.truncf %4 : vector<64x128xf32> to vector<64x128xbf16>
    %c0_4 = arith.constant 0 : index
    %c0_5 = arith.constant 0 : index
    %6 = vector.load %arg3[%c0_4, %c0_5] : memref<64x128xbf16, #tpu.memory_space<vmem>>, vector<64x128xbf16>
    tpu.vector_store %arg3[%c0_4, %c0_5], %5 {strides = array<i32>} : memref<64x128xbf16, #tpu.memory_space<vmem>>, vector<64x128xbf16>,
    return
  }
  func.func @transform_0(%arg0: i32) -> (i32, i32) {
    %c0_i32 = arith.constant 0 : i32
    %c0_i32_0 = arith.constant 0 : i32
    return %arg0, %c0_i32 : i32, i32
  }
  func.func @transform_1(%arg0: i32) -> (i32, i32) {
    %c0_i32 = arith.constant 0 : i32
    %c0_i32_0 = arith.constant 0 : i32
    %c0_i32_1 = arith.constant 0 : i32
    return %c0_i32, %c0_i32_0 : i32, i32
  }
  func.func @transform_2(%arg0: i32) -> (i32, i32) {
    %c0_i32 = arith.constant 0 : i32
    %c0_i32_0 = arith.constant 0 : i32
    return %arg0, %c0_i32 : i32, i32
  }
}

module attributes {stable_mosaic.version = 11 : i64} {
  func.func @kernel(%arg0: i32, %arg1: memref<64x128xbf16, #tpu.memory_space<vmem>>, %arg2: memref<128x128xbf16, #tpu.memory_space<vmem>>, %arg3: memref<64x128xbf16, #tpu.memory_space<vmem>>) attributes {dimension_semantics = [#tpu.dimension_semantics<parallel>], iteration_bounds = array<i64: 2>, scalar_prefetch = 0 : i64, scratch_operands = 0 : i64, tpu.core_type = #tpu.core_type<tc>, window_params = [{transform_indices = @transform_0, window_bounds = array<i64: 64, 128>}, {pipeline_mode = #tpu.pipeline_mode<synchronous>, transform_indices = @transform_1, window_bounds = array<i64: 128, 128>}, {transform_indices = @transform_2, window_bounds = array<i64: 64, 128>}]} {
    %c0 = arith.constant 0 : index
    %c0_0 = arith.constant 0 : index
    %0 = vector.load %arg1[%c0, %c0_0] : memref<64x128xbf16, #tpu.memory_space<vmem>>, vector<64x128xbf16>
    %c0_1 = arith.constant 0 : index
    %c0_2 = arith.constant 0 : index
    %1 = vector.load %arg2[%c0_1, %c0_2] : memref<128x128xbf16, #tpu.memory_space<vmem>>, vector<128x128xbf16>
    %cst = arith.constant dense<0.000000e+00> : vector<64x128xf32>
    %2 = tpu.matmul %0, %1, %cst {dimension_numbers = #tpu.dot_dimension_numbers<[1], [0], [0], [1], [0, 0, 1, 1], [], []>} : vector<64x128xbf16>, vector<128x128xbf16>, vector<64x128xf32> -> vector<64x128xf32>
    %3 = arith.truncf %2 : vector<64x128xf32> to vector<64x128xbf16>
    %c0_3 = arith.constant 0 : index
    %c0_4 = arith.constant 0 : index
    %4 = vector.load %arg3[%c0_3, %c0_4] : memref<64x128xbf16, #tpu.memory_space<vmem>>, vector<64x128xbf16>
    tpu.vector_store %arg3[%c0_3, %c0_4], %3 {strides = array<i32>} : memref<64x128xbf16, #tpu.memory_space<vmem>>, vector<64x128xbf16>,
    return
  }
  func.func @transform_0(%arg0: i32) -> (i32, i32) {
    %c0_i32 = arith.constant 0 : i32
    %c0_i32_0 = arith.constant 0 : i32
    return %arg0, %c0_i32 : i32, i32
  }
  func.func @transform_1(%arg0: i32) -> (i32, i32) {
    %c0_i32 = arith.constant 0 : i32
    %c0_i32_0 = arith.constant 0 : i32
    %c0_i32_1 = arith.constant 0 : i32
    return %c0_i32, %c0_i32_0 : i32, i32
  }
  func.func @transform_2(%arg0: i32) -> (i32, i32) {
    %c0_i32 = arith.constant 0 : i32
    %c0_i32_0 = arith.constant 0 : i32
    return %arg0, %c0_i32 : i32, i32
  }
}

module attributes {stable_mosaic.version = 11 : i64} {
  func.func @kernel(%arg0: i32, %arg1: memref<64x640xbf16, #tpu.memory_space<vmem>>, %arg2: memref<640x128xbf16, #tpu.memory_space<vmem>>, %arg3: memref<64x128xbf16, #tpu.memory_space<vmem>>, %arg4: memref<64x128xbf16, #tpu.memory_space<vmem>>) attributes {dimension_semantics = [#tpu.dimension_semantics<parallel>], iteration_bounds = array<i64: 2>, scalar_prefetch = 0 : i64, scratch_operands = 0 : i64, tpu.core_type = #tpu.core_type<tc>, window_params = [{transform_indices = @transform_0, window_bounds = array<i64: 64, 640>}, {pipeline_mode = #tpu.pipeline_mode<synchronous>, transform_indices = @transform_1, window_bounds = array<i64: 640, 128>}, {transform_indices = @transform_2, window_bounds = array<i64: 64, 128>}, {transform_indices = @transform_3, window_bounds = array<i64: 64, 128>}]} {
    %c0 = arith.constant 0 : index
    %c0_0 = arith.constant 0 : index
    %0 = vector.load %arg1[%c0, %c0_0] : memref<64x640xbf16, #tpu.memory_space<vmem>>, vector<64x640xbf16>
    %c0_1 = arith.constant 0 : index
    %c0_2 = arith.constant 0 : index
    %1 = vector.load %arg2[%c0_1, %c0_2] : memref<640x128xbf16, #tpu.memory_space<vmem>>, vector<640x128xbf16>
    %cst = arith.constant dense<0.000000e+00> : vector<64x128xf32>
    %2 = tpu.matmul %0, %1, %cst {dimension_numbers = #tpu.dot_dimension_numbers<[1], [0], [0], [1], [0, 0, 1, 1], [], []>} : vector<64x640xbf16>, vector<640x128xbf16>, vector<64x128xf32> -> vector<64x128xf32>
    %c0_3 = arith.constant 0 : index
    %c0_4 = arith.constant 0 : index
    %3 = vector.load %arg3[%c0_3, %c0_4] : memref<64x128xbf16, #tpu.memory_space<vmem>>, vector<64x128xbf16>
    %4 = arith.extf %3 : vector<64x128xbf16> to vector<64x128xf32>
    %5 = arith.addf %2, %4 : vector<64x128xf32>
    %cst_5 = arith.constant 0.000000e+00 : f32
    %6 = vector.broadcast %cst_5 : f32 to vector<64x128xf32>
    %7 = arith.maximumf %5, %6 : vector<64x128xf32>
    %8 = arith.truncf %7 : vector<64x128xf32> to vector<64x128xbf16>
    %c0_6 = arith.constant 0 : index
    %c0_7 = arith.constant 0 : index
    %9 = vector.load %arg4[%c0_6, %c0_7] : memref<64x128xbf16, #tpu.memory_space<vmem>>, vector<64x128xbf16>
    tpu.vector_store %arg4[%c0_6, %c0_7], %8 {strides = array<i32>} : memref<64x128xbf16, #tpu.memory_space<vmem>>, vector<64x128xbf16>,
    return
  }
  func.func @transform_0(%arg0: i32) -> (i32, i32) {
    %c0_i32 = arith.constant 0 : i32
    %c0_i32_0 = arith.constant 0 : i32
    return %arg0, %c0_i32 : i32, i32
  }
  func.func @transform_1(%arg0: i32) -> (i32, i32) {
    %c0_i32 = arith.constant 0 : i32
    %c0_i32_0 = arith.constant 0 : i32
    %c0_i32_1 = arith.constant 0 : i32
    return %c0_i32, %c0_i32_0 : i32, i32
  }
  func.func @transform_2(%arg0: i32) -> (i32, i32) {
    %c0_i32 = arith.constant 0 : i32
    %c0_i32_0 = arith.constant 0 : i32
    return %arg0, %c0_i32 : i32, i32
  }
  func.func @transform_3(%arg0: i32) -> (i32, i32) {
    %c0_i32 = arith.constant 0 : i32
    %c0_i32_0 = arith.constant 0 : i32
    return %arg0, %c0_i32 : i32, i32
  }
}

module attributes {stable_mosaic.version = 11 : i64} {
  func.func @kernel(%arg0: i32, %arg1: memref<16x640xbf16, #tpu.memory_space<vmem>>, %arg2: memref<640x128xbf16, #tpu.memory_space<vmem>>, %arg3: memref<16x128xbf16, #tpu.memory_space<vmem>>) attributes {dimension_semantics = [#tpu.dimension_semantics<parallel>], iteration_bounds = array<i64: 2>, scalar_prefetch = 0 : i64, scratch_operands = 0 : i64, tpu.core_type = #tpu.core_type<tc>, window_params = [{transform_indices = @transform_0, window_bounds = array<i64: 16, 640>}, {pipeline_mode = #tpu.pipeline_mode<synchronous>, transform_indices = @transform_1, window_bounds = array<i64: 640, 128>}, {transform_indices = @transform_2, window_bounds = array<i64: 16, 128>}]} {
    %c0 = arith.constant 0 : index
    %c0_0 = arith.constant 0 : index
    %0 = vector.load %arg1[%c0, %c0_0] : memref<16x640xbf16, #tpu.memory_space<vmem>>, vector<16x640xbf16>
    %c0_1 = arith.constant 0 : index
    %c0_2 = arith.constant 0 : index
    %1 = vector.load %arg2[%c0_1, %c0_2] : memref<640x128xbf16, #tpu.memory_space<vmem>>, vector<640x128xbf16>
    %cst = arith.constant dense<0.000000e+00> : vector<16x128xf32>
    %2 = tpu.matmul %0, %1, %cst {dimension_numbers = #tpu.dot_dimension_numbers<[1], [0], [0], [1], [0, 0, 1, 1], [], []>} : vector<16x640xbf16>, vector<640x128xbf16>, vector<16x128xf32> -> vector<16x128xf32>
    %cst_3 = arith.constant 0.000000e+00 : f32
    %3 = vector.broadcast %cst_3 : f32 to vector<16x128xf32>
    %4 = arith.maximumf %2, %3 : vector<16x128xf32>
    %5 = arith.truncf %4 : vector<16x128xf32> to vector<16x128xbf16>
    %c0_4 = arith.constant 0 : index
    %c0_5 = arith.constant 0 : index
    %6 = vector.load %arg3[%c0_4, %c0_5] : memref<16x128xbf16, #tpu.memory_space<vmem>>, vector<16x128xbf16>
    tpu.vector_store %arg3[%c0_4, %c0_5], %5 {strides = array<i32>} : memref<16x128xbf16, #tpu.memory_space<vmem>>, vector<16x128xbf16>,
    return
  }
  func.func @transform_0(%arg0: i32) -> (i32, i32) {
    %c0_i32 = arith.constant 0 : i32
    %c0_i32_0 = arith.constant 0 : i32
    return %arg0, %c0_i32 : i32, i32
  }
  func.func @transform_1(%arg0: i32) -> (i32, i32) {
    %c0_i32 = arith.constant 0 : i32
    %c0_i32_0 = arith.constant 0 : i32
    %c0_i32_1 = arith.constant 0 : i32
    return %c0_i32, %c0_i32_0 : i32, i32
  }
  func.func @transform_2(%arg0: i32) -> (i32, i32) {
    %c0_i32 = arith.constant 0 : i32
    %c0_i32_0 = arith.constant 0 : i32
    return %arg0, %c0_i32 : i32, i32
  }
}

module attributes {stable_mosaic.version = 11 : i64} {
  func.func @kernel(%arg0: i32, %arg1: memref<16x1152xbf16, #tpu.memory_space<vmem>>, %arg2: memref<1152x128xbf16, #tpu.memory_space<vmem>>, %arg3: memref<16x128xbf16, #tpu.memory_space<vmem>>, %arg4: memref<16x128xbf16, #tpu.memory_space<vmem>>) attributes {dimension_semantics = [#tpu.dimension_semantics<parallel>], iteration_bounds = array<i64: 2>, scalar_prefetch = 0 : i64, scratch_operands = 0 : i64, tpu.core_type = #tpu.core_type<tc>, window_params = [{transform_indices = @transform_0, window_bounds = array<i64: 16, 1152>}, {pipeline_mode = #tpu.pipeline_mode<synchronous>, transform_indices = @transform_1, window_bounds = array<i64: 1152, 128>}, {transform_indices = @transform_2, window_bounds = array<i64: 16, 128>}, {transform_indices = @transform_3, window_bounds = array<i64: 16, 128>}]} {
    %c0 = arith.constant 0 : index
    %c0_0 = arith.constant 0 : index
    %0 = vector.load %arg1[%c0, %c0_0] : memref<16x1152xbf16, #tpu.memory_space<vmem>>, vector<16x1152xbf16>
    %c0_1 = arith.constant 0 : index
    %c0_2 = arith.constant 0 : index
    %1 = vector.load %arg2[%c0_1, %c0_2] : memref<1152x128xbf16, #tpu.memory_space<vmem>>, vector<1152x128xbf16>
    %cst = arith.constant dense<0.000000e+00> : vector<16x128xf32>
    %2 = tpu.matmul %0, %1, %cst {dimension_numbers = #tpu.dot_dimension_numbers<[1], [0], [0], [1], [0, 0, 1, 1], [], []>} : vector<16x1152xbf16>, vector<1152x128xbf16>, vector<16x128xf32> -> vector<16x128xf32>
    %c0_3 = arith.constant 0 : index
    %c0_4 = arith.constant 0 : index
    %3 = vector.load %arg3[%c0_3, %c0_4] : memref<16x128xbf16, #tpu.memory_space<vmem>>, vector<16x128xbf16>
    %4 = arith.extf %3 : vector<16x128xbf16> to vector<16x128xf32>
    %5 = arith.addf %2, %4 : vector<16x128xf32>
    %cst_5 = arith.constant 0.000000e+00 : f32
    %6 = vector.broadcast %cst_5 : f32 to vector<16x128xf32>
    %7 = arith.maximumf %5, %6 : vector<16x128xf32>
    %8 = arith.truncf %7 : vector<16x128xf32> to vector<16x128xbf16>
    %c0_6 = arith.constant 0 : index
    %c0_7 = arith.constant 0 : index
    %9 = vector.load %arg4[%c0_6, %c0_7] : memref<16x128xbf16, #tpu.memory_space<vmem>>, vector<16x128xbf16>
    tpu.vector_store %arg4[%c0_6, %c0_7], %8 {strides = array<i32>} : memref<16x128xbf16, #tpu.memory_space<vmem>>, vector<16x128xbf16>,
    return
  }
  func.func @transform_0(%arg0: i32) -> (i32, i32) {
    %c0_i32 = arith.constant 0 : i32
    %c0_i32_0 = arith.constant 0 : i32
    return %arg0, %c0_i32 : i32, i32
  }
  func.func @transform_1(%arg0: i32) -> (i32, i32) {
    %c0_i32 = arith.constant 0 : i32
    %c0_i32_0 = arith.constant 0 : i32
    %c0_i32_1 = arith.constant 0 : i32
    return %c0_i32, %c0_i32_0 : i32, i32
  }
  func.func @transform_2(%arg0: i32) -> (i32, i32) {
    %c0_i32 = arith.constant 0 : i32
    %c0_i32_0 = arith.constant 0 : i32
    return %arg0, %c0_i32 : i32, i32
  }
  func.func @transform_3(%arg0: i32) -> (i32, i32) {
    %c0_i32 = arith.constant 0 : i32
    %c0_i32_0 = arith.constant 0 : i32
    return %arg0, %c0_i32 : i32, i32
  }
}

module attributes {stable_mosaic.version = 11 : i64} {
  func.func @kernel(%arg0: i32, %arg1: memref<16x128xbf16, #tpu.memory_space<vmem>>, %arg2: memref<128x128xbf16, #tpu.memory_space<vmem>>, %arg3: memref<16x128xbf16, #tpu.memory_space<vmem>>) attributes {dimension_semantics = [#tpu.dimension_semantics<parallel>], iteration_bounds = array<i64: 2>, scalar_prefetch = 0 : i64, scratch_operands = 0 : i64, tpu.core_type = #tpu.core_type<tc>, window_params = [{transform_indices = @transform_0, window_bounds = array<i64: 16, 128>}, {pipeline_mode = #tpu.pipeline_mode<synchronous>, transform_indices = @transform_1, window_bounds = array<i64: 128, 128>}, {transform_indices = @transform_2, window_bounds = array<i64: 16, 128>}]} {
    %c0 = arith.constant 0 : index
    %c0_0 = arith.constant 0 : index
    %0 = vector.load %arg1[%c0, %c0_0] : memref<16x128xbf16, #tpu.memory_space<vmem>>, vector<16x128xbf16>
    %c0_1 = arith.constant 0 : index
    %c0_2 = arith.constant 0 : index
    %1 = vector.load %arg2[%c0_1, %c0_2] : memref<128x128xbf16, #tpu.memory_space<vmem>>, vector<128x128xbf16>
    %cst = arith.constant dense<0.000000e+00> : vector<16x128xf32>
    %2 = tpu.matmul %0, %1, %cst {dimension_numbers = #tpu.dot_dimension_numbers<[1], [0], [0], [1], [0, 0, 1, 1], [], []>} : vector<16x128xbf16>, vector<128x128xbf16>, vector<16x128xf32> -> vector<16x128xf32>
    %3 = arith.truncf %2 : vector<16x128xf32> to vector<16x128xbf16>
    %c0_3 = arith.constant 0 : index
    %c0_4 = arith.constant 0 : index
    %4 = vector.load %arg3[%c0_3, %c0_4] : memref<16x128xbf16, #tpu.memory_space<vmem>>, vector<16x128xbf16>
    tpu.vector_store %arg3[%c0_3, %c0_4], %3 {strides = array<i32>} : memref<16x128xbf16, #tpu.memory_space<vmem>>, vector<16x128xbf16>,
    return
  }
  func.func @transform_0(%arg0: i32) -> (i32, i32) {
    %c0_i32 = arith.constant 0 : i32
    %c0_i32_0 = arith.constant 0 : i32
    return %arg0, %c0_i32 : i32, i32
  }
  func.func @transform_1(%arg0: i32) -> (i32, i32) {
    %c0_i32 = arith.constant 0 : i32
    %c0_i32_0 = arith.constant 0 : i32
    %c0_i32_1 = arith.constant 0 : i32
    return %c0_i32, %c0_i32_0 : i32, i32
  }
  func.func @transform_2(%arg0: i32) -> (i32, i32) {
    %c0_i32 = arith.constant 0 : i32
    %c0_i32_0 = arith.constant 0 : i32
    return %arg0, %c0_i32 : i32, i32
  }
}

module attributes {stable_mosaic.version = 11 : i64} {
  func.func @kernel(%arg0: i32, %arg1: memref<16x1152xbf16, #tpu.memory_space<vmem>>, %arg2: memref<1152x128xbf16, #tpu.memory_space<vmem>>, %arg3: memref<16x128xbf16, #tpu.memory_space<vmem>>) attributes {dimension_semantics = [#tpu.dimension_semantics<parallel>], iteration_bounds = array<i64: 1>, scalar_prefetch = 0 : i64, scratch_operands = 0 : i64, tpu.core_type = #tpu.core_type<tc>, window_params = [{transform_indices = @transform_0, window_bounds = array<i64: 16, 1152>}, {pipeline_mode = #tpu.pipeline_mode<synchronous>, transform_indices = @transform_1, window_bounds = array<i64: 1152, 128>}, {transform_indices = @transform_2, window_bounds = array<i64: 16, 128>}]} {
    %c0 = arith.constant 0 : index
    %c0_0 = arith.constant 0 : index
    %0 = vector.load %arg1[%c0, %c0_0] : memref<16x1152xbf16, #tpu.memory_space<vmem>>, vector<16x1152xbf16>
    %c0_1 = arith.constant 0 : index
    %c0_2 = arith.constant 0 : index
    %1 = vector.load %arg2[%c0_1, %c0_2] : memref<1152x128xbf16, #tpu.memory_space<vmem>>, vector<1152x128xbf16>
    %cst = arith.constant dense<0.000000e+00> : vector<16x128xf32>
    %2 = tpu.matmul %0, %1, %cst {dimension_numbers = #tpu.dot_dimension_numbers<[1], [0], [0], [1], [0, 0, 1, 1], [], []>} : vector<16x1152xbf16>, vector<1152x128xbf16>, vector<16x128xf32> -> vector<16x128xf32>
    %cst_3 = arith.constant 0.000000e+00 : f32
    %3 = vector.broadcast %cst_3 : f32 to vector<16x128xf32>
    %4 = arith.maximumf %2, %3 : vector<16x128xf32>
    %5 = arith.truncf %4 : vector<16x128xf32> to vector<16x128xbf16>
    %c0_4 = arith.constant 0 : index
    %c0_5 = arith.constant 0 : index
    %6 = vector.load %arg3[%c0_4, %c0_5] : memref<16x128xbf16, #tpu.memory_space<vmem>>, vector<16x128xbf16>
    tpu.vector_store %arg3[%c0_4, %c0_5], %5 {strides = array<i32>} : memref<16x128xbf16, #tpu.memory_space<vmem>>, vector<16x128xbf16>,
    return
  }
  func.func @transform_0(%arg0: i32) -> (i32, i32) {
    %c0_i32 = arith.constant 0 : i32
    %c0_i32_0 = arith.constant 0 : i32
    return %arg0, %c0_i32 : i32, i32
  }
  func.func @transform_1(%arg0: i32) -> (i32, i32) {
    %c0_i32 = arith.constant 0 : i32
    %c0_i32_0 = arith.constant 0 : i32
    %c0_i32_1 = arith.constant 0 : i32
    return %c0_i32, %c0_i32_0 : i32, i32
  }
  func.func @transform_2(%arg0: i32) -> (i32, i32) {
    %c0_i32 = arith.constant 0 : i32
    %c0_i32_0 = arith.constant 0 : i32
    return %arg0, %c0_i32 : i32, i32
  }
}

module attributes {stable_mosaic.version = 11 : i64} {
  func.func @kernel(%arg0: i32, %arg1: memref<16x640xbf16, #tpu.memory_space<vmem>>, %arg2: memref<640x128xbf16, #tpu.memory_space<vmem>>, %arg3: memref<16x128xbf16, #tpu.memory_space<vmem>>, %arg4: memref<16x128xbf16, #tpu.memory_space<vmem>>) attributes {dimension_semantics = [#tpu.dimension_semantics<parallel>], iteration_bounds = array<i64: 1>, scalar_prefetch = 0 : i64, scratch_operands = 0 : i64, tpu.core_type = #tpu.core_type<tc>, window_params = [{transform_indices = @transform_0, window_bounds = array<i64: 16, 640>}, {pipeline_mode = #tpu.pipeline_mode<synchronous>, transform_indices = @transform_1, window_bounds = array<i64: 640, 128>}, {transform_indices = @transform_2, window_bounds = array<i64: 16, 128>}, {transform_indices = @transform_3, window_bounds = array<i64: 16, 128>}]} {
    %c0 = arith.constant 0 : index
    %c0_0 = arith.constant 0 : index
    %0 = vector.load %arg1[%c0, %c0_0] : memref<16x640xbf16, #tpu.memory_space<vmem>>, vector<16x640xbf16>
    %c0_1 = arith.constant 0 : index
    %c0_2 = arith.constant 0 : index
    %1 = vector.load %arg2[%c0_1, %c0_2] : memref<640x128xbf16, #tpu.memory_space<vmem>>, vector<640x128xbf16>
    %cst = arith.constant dense<0.000000e+00> : vector<16x128xf32>
    %2 = tpu.matmul %0, %1, %cst {dimension_numbers = #tpu.dot_dimension_numbers<[1], [0], [0], [1], [0, 0, 1, 1], [], []>} : vector<16x640xbf16>, vector<640x128xbf16>, vector<16x128xf32> -> vector<16x128xf32>
    %c0_3 = arith.constant 0 : index
    %c0_4 = arith.constant 0 : index
    %3 = vector.load %arg3[%c0_3, %c0_4] : memref<16x128xbf16, #tpu.memory_space<vmem>>, vector<16x128xbf16>
    %4 = arith.extf %3 : vector<16x128xbf16> to vector<16x128xf32>
    %5 = arith.addf %2, %4 : vector<16x128xf32>
    %cst_5 = arith.constant 0.000000e+00 : f32
    %6 = vector.broadcast %cst_5 : f32 to vector<16x128xf32>
    %7 = arith.maximumf %5, %6 : vector<16x128xf32>
    %8 = arith.truncf %7 : vector<16x128xf32> to vector<16x128xbf16>
    %c0_6 = arith.constant 0 : index
    %c0_7 = arith.constant 0 : index
    %9 = vector.load %arg4[%c0_6, %c0_7] : memref<16x128xbf16, #tpu.memory_space<vmem>>, vector<16x128xbf16>
    tpu.vector_store %arg4[%c0_6, %c0_7], %8 {strides = array<i32>} : memref<16x128xbf16, #tpu.memory_space<vmem>>, vector<16x128xbf16>,
    return
  }
  func.func @transform_0(%arg0: i32) -> (i32, i32) {
    %c0_i32 = arith.constant 0 : i32
    %c0_i32_0 = arith.constant 0 : i32
    return %arg0, %c0_i32 : i32, i32
  }
  func.func @transform_1(%arg0: i32) -> (i32, i32) {
    %c0_i32 = arith.constant 0 : i32
    %c0_i32_0 = arith.constant 0 : i32
    %c0_i32_1 = arith.constant 0 : i32
    return %c0_i32, %c0_i32_0 : i32, i32
  }
  func.func @transform_2(%arg0: i32) -> (i32, i32) {
    %c0_i32 = arith.constant 0 : i32
    %c0_i32_0 = arith.constant 0 : i32
    return %arg0, %c0_i32 : i32, i32
  }
  func.func @transform_3(%arg0: i32) -> (i32, i32) {
    %c0_i32 = arith.constant 0 : i32
    %c0_i32_0 = arith.constant 0 : i32
    return %arg0, %c0_i32 : i32, i32
  }
}

module attributes {stable_mosaic.version = 11 : i64} {
  func.func @kernel(%arg0: i32, %arg1: memref<16x128xbf16, #tpu.memory_space<vmem>>, %arg2: memref<128x128xbf16, #tpu.memory_space<vmem>>, %arg3: memref<16x128xbf16, #tpu.memory_space<vmem>>) attributes {dimension_semantics = [#tpu.dimension_semantics<parallel>], iteration_bounds = array<i64: 1>, scalar_prefetch = 0 : i64, scratch_operands = 0 : i64, tpu.core_type = #tpu.core_type<tc>, window_params = [{transform_indices = @transform_0, window_bounds = array<i64: 16, 128>}, {pipeline_mode = #tpu.pipeline_mode<synchronous>, transform_indices = @transform_1, window_bounds = array<i64: 128, 128>}, {transform_indices = @transform_2, window_bounds = array<i64: 16, 128>}]} {
    %c0 = arith.constant 0 : index
    %c0_0 = arith.constant 0 : index
    %0 = vector.load %arg1[%c0, %c0_0] : memref<16x128xbf16, #tpu.memory_space<vmem>>, vector<16x128xbf16>
    %c0_1 = arith.constant 0 : index
    %c0_2 = arith.constant 0 : index
    %1 = vector.load %arg2[%c0_1, %c0_2] : memref<128x128xbf16, #tpu.memory_space<vmem>>, vector<128x128xbf16>
    %cst = arith.constant dense<0.000000e+00> : vector<16x128xf32>
    %2 = tpu.matmul %0, %1, %cst {dimension_numbers = #tpu.dot_dimension_numbers<[1], [0], [0], [1], [0, 0, 1, 1], [], []>} : vector<16x128xbf16>, vector<128x128xbf16>, vector<16x128xf32> -> vector<16x128xf32>
    %3 = arith.truncf %2 : vector<16x128xf32> to vector<16x128xbf16>
    %c0_3 = arith.constant 0 : index
    %c0_4 = arith.constant 0 : index
    %4 = vector.load %arg3[%c0_3, %c0_4] : memref<16x128xbf16, #tpu.memory_space<vmem>>, vector<16x128xbf16>
    tpu.vector_store %arg3[%c0_3, %c0_4], %3 {strides = array<i32>} : memref<16x128xbf16, #tpu.memory_space<vmem>>, vector<16x128xbf16>,
    return
  }
  func.func @transform_0(%arg0: i32) -> (i32, i32) {
    %c0_i32 = arith.constant 0 : i32
    %c0_i32_0 = arith.constant 0 : i32
    return %arg0, %c0_i32 : i32, i32
  }
  func.func @transform_1(%arg0: i32) -> (i32, i32) {
    %c0_i32 = arith.constant 0 : i32
    %c0_i32_0 = arith.constant 0 : i32
    %c0_i32_1 = arith.constant 0 : i32
    return %c0_i32, %c0_i32_0 : i32, i32
  }
  func.func @transform_2(%arg0: i32) -> (i32, i32) {
    %c0_i32 = arith.constant 0 : i32
    %c0_i32_0 = arith.constant 0 : i32
    return %arg0, %c0_i32 : i32, i32
  }
}

module attributes {stable_mosaic.version = 11 : i64} {
  func.func @kernel(%arg0: i32, %arg1: memref<16x640xbf16, #tpu.memory_space<vmem>>, %arg2: memref<640x128xbf16, #tpu.memory_space<vmem>>, %arg3: memref<16x128xbf16, #tpu.memory_space<vmem>>) attributes {dimension_semantics = [#tpu.dimension_semantics<parallel>], iteration_bounds = array<i64: 1>, scalar_prefetch = 0 : i64, scratch_operands = 0 : i64, tpu.core_type = #tpu.core_type<tc>, window_params = [{transform_indices = @transform_0, window_bounds = array<i64: 16, 640>}, {pipeline_mode = #tpu.pipeline_mode<synchronous>, transform_indices = @transform_1, window_bounds = array<i64: 640, 128>}, {transform_indices = @transform_2, window_bounds = array<i64: 16, 128>}]} {
    %c0 = arith.constant 0 : index
    %c0_0 = arith.constant 0 : index
    %0 = vector.load %arg1[%c0, %c0_0] : memref<16x640xbf16, #tpu.memory_space<vmem>>, vector<16x640xbf16>
    %c0_1 = arith.constant 0 : index
    %c0_2 = arith.constant 0 : index
    %1 = vector.load %arg2[%c0_1, %c0_2] : memref<640x128xbf16, #tpu.memory_space<vmem>>, vector<640x128xbf16>
    %cst = arith.constant dense<0.000000e+00> : vector<16x128xf32>
    %2 = tpu.matmul %0, %1, %cst {dimension_numbers = #tpu.dot_dimension_numbers<[1], [0], [0], [1], [0, 0, 1, 1], [], []>} : vector<16x640xbf16>, vector<640x128xbf16>, vector<16x128xf32> -> vector<16x128xf32>
    %cst_3 = arith.constant 0.000000e+00 : f32
    %3 = vector.broadcast %cst_3 : f32 to vector<16x128xf32>
    %4 = arith.maximumf %2, %3 : vector<16x128xf32>
    %5 = arith.truncf %4 : vector<16x128xf32> to vector<16x128xbf16>
    %c0_4 = arith.constant 0 : index
    %c0_5 = arith.constant 0 : index
    %6 = vector.load %arg3[%c0_4, %c0_5] : memref<16x128xbf16, #tpu.memory_space<vmem>>, vector<16x128xbf16>
    tpu.vector_store %arg3[%c0_4, %c0_5], %5 {strides = array<i32>} : memref<16x128xbf16, #tpu.memory_space<vmem>>, vector<16x128xbf16>,
    return
  }
  func.func @transform_0(%arg0: i32) -> (i32, i32) {
    %c0_i32 = arith.constant 0 : i32
    %c0_i32_0 = arith.constant 0 : i32
    return %arg0, %c0_i32 : i32, i32
  }
  func.func @transform_1(%arg0: i32) -> (i32, i32) {
    %c0_i32 = arith.constant 0 : i32
    %c0_i32_0 = arith.constant 0 : i32
    %c0_i32_1 = arith.constant 0 : i32
    return %c0_i32, %c0_i32_0 : i32, i32
  }
  func.func @transform_2(%arg0: i32) -> (i32, i32) {
    %c0_i32 = arith.constant 0 : i32
    %c0_i32_0 = arith.constant 0 : i32
    return %arg0, %c0_i32 : i32, i32
  }
}

module attributes {stable_mosaic.version = 11 : i64} {
  func.func @kernel(%arg0: i32, %arg1: memref<16x128xbf16, #tpu.memory_space<vmem>>, %arg2: memref<128x128xbf16, #tpu.memory_space<vmem>>, %arg3: memref<16x128xbf16, #tpu.memory_space<vmem>>, %arg4: memref<16x128xbf16, #tpu.memory_space<vmem>>) attributes {dimension_semantics = [#tpu.dimension_semantics<parallel>], iteration_bounds = array<i64: 1>, scalar_prefetch = 0 : i64, scratch_operands = 0 : i64, tpu.core_type = #tpu.core_type<tc>, window_params = [{transform_indices = @transform_0, window_bounds = array<i64: 16, 128>}, {pipeline_mode = #tpu.pipeline_mode<synchronous>, transform_indices = @transform_1, window_bounds = array<i64: 128, 128>}, {transform_indices = @transform_2, window_bounds = array<i64: 16, 128>}, {transform_indices = @transform_3, window_bounds = array<i64: 16, 128>}]} {
    %c0 = arith.constant 0 : index
    %c0_0 = arith.constant 0 : index
    %0 = vector.load %arg1[%c0, %c0_0] : memref<16x128xbf16, #tpu.memory_space<vmem>>, vector<16x128xbf16>
    %c0_1 = arith.constant 0 : index
    %c0_2 = arith.constant 0 : index
    %1 = vector.load %arg2[%c0_1, %c0_2] : memref<128x128xbf16, #tpu.memory_space<vmem>>, vector<128x128xbf16>
    %cst = arith.constant dense<0.000000e+00> : vector<16x128xf32>
    %2 = tpu.matmul %0, %1, %cst {dimension_numbers = #tpu.dot_dimension_numbers<[1], [0], [0], [1], [0, 0, 1, 1], [], []>} : vector<16x128xbf16>, vector<128x128xbf16>, vector<16x128xf32> -> vector<16x128xf32>
    %c0_3 = arith.constant 0 : index
    %c0_4 = arith.constant 0 : index
    %3 = vector.load %arg3[%c0_3, %c0_4] : memref<16x128xbf16, #tpu.memory_space<vmem>>, vector<16x128xbf16>
    %4 = arith.extf %3 : vector<16x128xbf16> to vector<16x128xf32>
    %5 = arith.addf %2, %4 : vector<16x128xf32>
    %cst_5 = arith.constant 0.000000e+00 : f32
    %6 = vector.broadcast %cst_5 : f32 to vector<16x128xf32>
    %7 = arith.maximumf %5, %6 : vector<16x128xf32>
    %8 = math.tanh %7 : vector<16x128xf32>
    %9 = arith.truncf %8 : vector<16x128xf32> to vector<16x128xbf16>
    %c0_6 = arith.constant 0 : index
    %c0_7 = arith.constant 0 : index
    %10 = vector.load %arg4[%c0_6, %c0_7] : memref<16x128xbf16, #tpu.memory_space<vmem>>, vector<16x128xbf16>
    tpu.vector_store %arg4[%c0_6, %c0_7], %9 {strides = array<i32>} : memref<16x128xbf16, #tpu.memory_space<vmem>>, vector<16x128xbf16>,
    return
  }
  func.func @transform_0(%arg0: i32) -> (i32, i32) {
    %c0_i32 = arith.constant 0 : i32
    %c0_i32_0 = arith.constant 0 : i32
    return %arg0, %c0_i32 : i32, i32
  }
  func.func @transform_1(%arg0: i32) -> (i32, i32) {
    %c0_i32 = arith.constant 0 : i32
    %c0_i32_0 = arith.constant 0 : i32
    %c0_i32_1 = arith.constant 0 : i32
    return %c0_i32, %c0_i32_0 : i32, i32
  }
  func.func @transform_2(%arg0: i32) -> (i32, i32) {
    %c0_i32 = arith.constant 0 : i32
    %c0_i32_0 = arith.constant 0 : i32
    return %arg0, %c0_i32 : i32, i32
  }
  func.func @transform_3(%arg0: i32) -> (i32, i32) {
    %c0_i32 = arith.constant 0 : i32
    %c0_i32_0 = arith.constant 0 : i32
    return %arg0, %c0_i32 : i32, i32
  }
}

module attributes {stable_mosaic.version = 11 : i64} {
  func.func @kernel(%arg0: i32, %arg1: memref<16x128xbf16, #tpu.memory_space<vmem>>, %arg2: memref<128x128xbf16, #tpu.memory_space<vmem>>, %arg3: memref<16x128xbf16, #tpu.memory_space<vmem>>) attributes {dimension_semantics = [#tpu.dimension_semantics<parallel>], iteration_bounds = array<i64: 1>, scalar_prefetch = 0 : i64, scratch_operands = 0 : i64, tpu.core_type = #tpu.core_type<tc>, window_params = [{transform_indices = @transform_0, window_bounds = array<i64: 16, 128>}, {pipeline_mode = #tpu.pipeline_mode<synchronous>, transform_indices = @transform_1, window_bounds = array<i64: 128, 128>}, {transform_indices = @transform_2, window_bounds = array<i64: 16, 128>}]} {
    %c0 = arith.constant 0 : index
    %c0_0 = arith.constant 0 : index
    %0 = vector.load %arg1[%c0, %c0_0] : memref<16x128xbf16, #tpu.memory_space<vmem>>, vector<16x128xbf16>
    %c0_1 = arith.constant 0 : index
    %c0_2 = arith.constant 0 : index
    %1 = vector.load %arg2[%c0_1, %c0_2] : memref<128x128xbf16, #tpu.memory_space<vmem>>, vector<128x128xbf16>
    %cst = arith.constant dense<0.000000e+00> : vector<16x128xf32>
    %2 = tpu.matmul %0, %1, %cst {dimension_numbers = #tpu.dot_dimension_numbers<[1], [0], [0], [1], [0, 0, 1, 1], [], []>} : vector<16x128xbf16>, vector<128x128xbf16>, vector<16x128xf32> -> vector<16x128xf32>
    %cst_3 = arith.constant 0.000000e+00 : f32
    %3 = vector.broadcast %cst_3 : f32 to vector<16x128xf32>
    %4 = arith.maximumf %2, %3 : vector<16x128xf32>
    %5 = arith.truncf %4 : vector<16x128xf32> to vector<16x128xbf16>
    %c0_4 = arith.constant 0 : index
    %c0_5 = arith.constant 0 : index
    %6 = vector.load %arg3[%c0_4, %c0_5] : memref<16x128xbf16, #tpu.memory_space<vmem>>, vector<16x128xbf16>
    tpu.vector_store %arg3[%c0_4, %c0_5], %5 {strides = array<i32>} : memref<16x128xbf16, #tpu.memory_space<vmem>>, vector<16x128xbf16>,
    return
  }
  func.func @transform_0(%arg0: i32) -> (i32, i32) {
    %c0_i32 = arith.constant 0 : i32
    %c0_i32_0 = arith.constant 0 : i32
    return %arg0, %c0_i32 : i32, i32
  }
  func.func @transform_1(%arg0: i32) -> (i32, i32) {
    %c0_i32 = arith.constant 0 : i32
    %c0_i32_0 = arith.constant 0 : i32
    %c0_i32_1 = arith.constant 0 : i32
    return %c0_i32, %c0_i32_0 : i32, i32
  }
  func.func @transform_2(%arg0: i32) -> (i32, i32) {
    %c0_i32 = arith.constant 0 : i32
    %c0_i32_0 = arith.constant 0 : i32
    return %arg0, %c0_i32 : i32, i32
  }
}

module attributes {stable_mosaic.version = 11 : i64} {
  func.func @kernel(%arg0: i32, %arg1: memref<16x384xbf16, #tpu.memory_space<vmem>>, %arg2: memref<384x128xbf16, #tpu.memory_space<vmem>>, %arg3: memref<16x128xbf16, #tpu.memory_space<vmem>>, %arg4: memref<16x128xbf16, #tpu.memory_space<vmem>>) attributes {dimension_semantics = [#tpu.dimension_semantics<parallel>], iteration_bounds = array<i64: 1>, scalar_prefetch = 0 : i64, scratch_operands = 0 : i64, tpu.core_type = #tpu.core_type<tc>, window_params = [{transform_indices = @transform_0, window_bounds = array<i64: 16, 384>}, {pipeline_mode = #tpu.pipeline_mode<synchronous>, transform_indices = @transform_1, window_bounds = array<i64: 384, 128>}, {transform_indices = @transform_2, window_bounds = array<i64: 16, 128>}, {transform_indices = @transform_3, window_bounds = array<i64: 16, 128>}]} {
    %c0 = arith.constant 0 : index
    %c0_0 = arith.constant 0 : index
    %0 = vector.load %arg1[%c0, %c0_0] : memref<16x384xbf16, #tpu.memory_space<vmem>>, vector<16x384xbf16>
    %c0_1 = arith.constant 0 : index
    %c0_2 = arith.constant 0 : index
    %1 = vector.load %arg2[%c0_1, %c0_2] : memref<384x128xbf16, #tpu.memory_space<vmem>>, vector<384x128xbf16>
    %cst = arith.constant dense<0.000000e+00> : vector<16x128xf32>
    %2 = tpu.matmul %0, %1, %cst {dimension_numbers = #tpu.dot_dimension_numbers<[1], [0], [0], [1], [0, 0, 1, 1], [], []>} : vector<16x384xbf16>, vector<384x128xbf16>, vector<16x128xf32> -> vector<16x128xf32>
    %c0_3 = arith.constant 0 : index
    %c0_4 = arith.constant 0 : index
    %3 = vector.load %arg3[%c0_3, %c0_4] : memref<16x128xbf16, #tpu.memory_space<vmem>>, vector<16x128xbf16>
    %4 = arith.extf %3 : vector<16x128xbf16> to vector<16x128xf32>
    %5 = arith.addf %2, %4 : vector<16x128xf32>
    %cst_5 = arith.constant 0.000000e+00 : f32
    %6 = vector.broadcast %cst_5 : f32 to vector<16x128xf32>
    %7 = arith.maximumf %5, %6 : vector<16x128xf32>
    %8 = arith.truncf %7 : vector<16x128xf32> to vector<16x128xbf16>
    %c0_6 = arith.constant 0 : index
    %c0_7 = arith.constant 0 : index
    %9 = vector.load %arg4[%c0_6, %c0_7] : memref<16x128xbf16, #tpu.memory_space<vmem>>, vector<16x128xbf16>
    tpu.vector_store %arg4[%c0_6, %c0_7], %8 {strides = array<i32>} : memref<16x128xbf16, #tpu.memory_space<vmem>>, vector<16x128xbf16>,
    return
  }
  func.func @transform_0(%arg0: i32) -> (i32, i32) {
    %c0_i32 = arith.constant 0 : i32
    %c0_i32_0 = arith.constant 0 : i32
    return %arg0, %c0_i32 : i32, i32
  }
  func.func @transform_1(%arg0: i32) -> (i32, i32) {
    %c0_i32 = arith.constant 0 : i32
    %c0_i32_0 = arith.constant 0 : i32
    %c0_i32_1 = arith.constant 0 : i32
    return %c0_i32, %c0_i32_0 : i32, i32
  }
  func.func @transform_2(%arg0: i32) -> (i32, i32) {
    %c0_i32 = arith.constant 0 : i32
    %c0_i32_0 = arith.constant 0 : i32
    return %arg0, %c0_i32 : i32, i32
  }
  func.func @transform_3(%arg0: i32) -> (i32, i32) {
    %c0_i32 = arith.constant 0 : i32
    %c0_i32_0 = arith.constant 0 : i32
    return %arg0, %c0_i32 : i32, i32
  }
}

module attributes {stable_mosaic.version = 11 : i64} {
  func.func @kernel(%arg0: i32, %arg1: memref<16x384xbf16, #tpu.memory_space<vmem>>, %arg2: memref<384x128xbf16, #tpu.memory_space<vmem>>, %arg3: memref<16x128xbf16, #tpu.memory_space<vmem>>) attributes {dimension_semantics = [#tpu.dimension_semantics<parallel>], iteration_bounds = array<i64: 1>, scalar_prefetch = 0 : i64, scratch_operands = 0 : i64, tpu.core_type = #tpu.core_type<tc>, window_params = [{transform_indices = @transform_0, window_bounds = array<i64: 16, 384>}, {pipeline_mode = #tpu.pipeline_mode<synchronous>, transform_indices = @transform_1, window_bounds = array<i64: 384, 128>}, {transform_indices = @transform_2, window_bounds = array<i64: 16, 128>}]} {
    %c0 = arith.constant 0 : index
    %c0_0 = arith.constant 0 : index
    %0 = vector.load %arg1[%c0, %c0_0] : memref<16x384xbf16, #tpu.memory_space<vmem>>, vector<16x384xbf16>
    %c0_1 = arith.constant 0 : index
    %c0_2 = arith.constant 0 : index
    %1 = vector.load %arg2[%c0_1, %c0_2] : memref<384x128xbf16, #tpu.memory_space<vmem>>, vector<384x128xbf16>
    %cst = arith.constant dense<0.000000e+00> : vector<16x128xf32>
    %2 = tpu.matmul %0, %1, %cst {dimension_numbers = #tpu.dot_dimension_numbers<[1], [0], [0], [1], [0, 0, 1, 1], [], []>} : vector<16x384xbf16>, vector<384x128xbf16>, vector<16x128xf32> -> vector<16x128xf32>
    %cst_3 = arith.constant 0.000000e+00 : f32
    %3 = vector.broadcast %cst_3 : f32 to vector<16x128xf32>
    %4 = arith.maximumf %2, %3 : vector<16x128xf32>
    %5 = arith.truncf %4 : vector<16x128xf32> to vector<16x128xbf16>
    %c0_4 = arith.constant 0 : index
    %c0_5 = arith.constant 0 : index
    %6 = vector.load %arg3[%c0_4, %c0_5] : memref<16x128xbf16, #tpu.memory_space<vmem>>, vector<16x128xbf16>
    tpu.vector_store %arg3[%c0_4, %c0_5], %5 {strides = array<i32>} : memref<16x128xbf16, #tpu.memory_space<vmem>>, vector<16x128xbf16>,
    return
  }
  func.func @transform_0(%arg0: i32) -> (i32, i32) {
    %c0_i32 = arith.constant 0 : i32
    %c0_i32_0 = arith.constant 0 : i32
    return %arg0, %c0_i32 : i32, i32
  }
  func.func @transform_1(%arg0: i32) -> (i32, i32) {
    %c0_i32 = arith.constant 0 : i32
    %c0_i32_0 = arith.constant 0 : i32
    %c0_i32_1 = arith.constant 0 : i32
    return %c0_i32, %c0_i32_0 : i32, i32
  }
  func.func @transform_2(%arg0: i32) -> (i32, i32) {
    %c0_i32 = arith.constant 0 : i32
    %c0_i32_0 = arith.constant 0 : i32
    return %arg0, %c0_i32 : i32, i32
  }
}

module attributes {stable_mosaic.version = 11 : i64} {
  func.func @_pool_fc_sigmoid_kernel(%arg0: i32, %arg1: memref<8x1x128xbf16, #tpu.memory_space<vmem>>, %arg2: memref<128x128xbf16, #tpu.memory_space<vmem>>, %arg3: memref<1x128xf32, #tpu.memory_space<vmem>>, %arg4: memref<8x128xf32, #tpu.memory_space<vmem>>) attributes {dimension_semantics = [#tpu.dimension_semantics<arbitrary>], iteration_bounds = array<i64: 1>, scalar_prefetch = 0 : i64, scratch_operands = 0 : i64, tpu.core_type = #tpu.core_type<tc>, window_params = [{pipeline_mode = #tpu.pipeline_mode<synchronous>, transform_indices = @transform_0, window_bounds = array<i64: 8, 1, 128>}, {pipeline_mode = #tpu.pipeline_mode<synchronous>, transform_indices = @transform_1, window_bounds = array<i64: 128, 128>}, {pipeline_mode = #tpu.pipeline_mode<synchronous>, transform_indices = @transform_2, window_bounds = array<i64: 1, 128>}, {pipeline_mode = #tpu.pipeline_mode<synchronous>, transform_indices = @transform_3, window_bounds = array<i64: 8, 128>}]} {
    %c0 = arith.constant 0 : index
    %c0_0 = arith.constant 0 : index
    %c0_1 = arith.constant 0 : index
    %0 = vector.load %arg1[%c0, %c0_0, %c0_1] : memref<8x1x128xbf16, #tpu.memory_space<vmem>>, vector<8x1x128xbf16>
    %1 = arith.extf %0 : vector<8x1x128xbf16> to vector<8x1x128xf32>
    %cst = arith.constant dense<0.000000e+00> : vector<8x128xf32>
    %2 = vector.multi_reduction <add>, %1, %cst [1] : vector<8x1x128xf32> to vector<8x128xf32>
    %cst_2 = arith.constant 1.000000e+00 : f32
    %3 = vector.broadcast %cst_2 : f32 to vector<8x128xf32>
    %4 = arith.mulf %2, %3 : vector<8x128xf32>
    %5 = arith.truncf %4 : vector<8x128xf32> to vector<8x128xbf16>
    %c0_3 = arith.constant 0 : index
    %c0_4 = arith.constant 0 : index
    %6 = vector.load %arg2[%c0_3, %c0_4] : memref<128x128xbf16, #tpu.memory_space<vmem>>, vector<128x128xbf16>
    %cst_5 = arith.constant dense<0.000000e+00> : vector<8x128xf32>
    %7 = tpu.matmul %5, %6, %cst_5 {dimension_numbers = #tpu.dot_dimension_numbers<[1], [0], [0], [1], [0, 0, 1, 1], [], []>} : vector<8x128xbf16>, vector<128x128xbf16>, vector<8x128xf32> -> vector<8x128xf32>
    %c0_6 = arith.constant 0 : index
    %c0_7 = arith.constant 0 : index
    %8 = vector.load %arg3[%c0_6, %c0_7] : memref<1x128xf32, #tpu.memory_space<vmem>>, vector<1x128xf32>
    %9 = vector.broadcast %8 : vector<1x128xf32> to vector<8x128xf32>
    %10 = arith.addf %7, %9 : vector<8x128xf32>
    %cst_8 = arith.constant 5.000000e-01 : f32
    %11 = vector.broadcast %cst_8 : f32 to vector<8x128xf32>
    %12 = arith.mulf %11, %10 : vector<8x128xf32>
    %13 = math.tanh %12 : vector<8x128xf32>
    %cst_9 = arith.constant 1.000000e+00 : f32
    %14 = vector.broadcast %cst_9 : f32 to vector<8x128xf32>
    %15 = arith.addf %13, %14 : vector<8x128xf32>
    %cst_10 = arith.constant 5.000000e-01 : f32
    %16 = vector.broadcast %cst_10 : f32 to vector<8x128xf32>
    %17 = arith.mulf %16, %15 : vector<8x128xf32>
    %c0_11 = arith.constant 0 : index
    %c0_12 = arith.constant 0 : index
    %18 = vector.load %arg4[%c0_11, %c0_12] : memref<8x128xf32, #tpu.memory_space<vmem>>, vector<8x128xf32>
    tpu.vector_store %arg4[%c0_11, %c0_12], %17 {strides = array<i32>} : memref<8x128xf32, #tpu.memory_space<vmem>>, vector<8x128xf32>,
    return
  }
  func.func @transform_0(%arg0: i32) -> (i32, i32, i32) {
    %c0_i32 = arith.constant 0 : i32
    %c0_i32_0 = arith.constant 0 : i32
    %c0_i32_1 = arith.constant 0 : i32
    %c0_i32_2 = arith.constant 0 : i32
    return %c0_i32, %c0_i32_0, %c0_i32_1 : i32, i32, i32
  }
  func.func @transform_1(%arg0: i32) -> (i32, i32) {
    %c0_i32 = arith.constant 0 : i32
    %c0_i32_0 = arith.constant 0 : i32
    %c0_i32_1 = arith.constant 0 : i32
    return %c0_i32, %c0_i32_0 : i32, i32
  }
  func.func @transform_2(%arg0: i32) -> (i32, i32) {
    %c0_i32 = arith.constant 0 : i32
    %c0_i32_0 = arith.constant 0 : i32
    %c0_i32_1 = arith.constant 0 : i32
    return %c0_i32, %c0_i32_0 : i32, i32
  }
  func.func @transform_3(%arg0: i32) -> (i32, i32) {
    %c0_i32 = arith.constant 0 : i32
    %c0_i32_0 = arith.constant 0 : i32
    %c0_i32_1 = arith.constant 0 : i32
    return %c0_i32, %c0_i32_0 : i32, i32
  }
}

</mosaic_0001>

<bundles_post_ra>
// kernel: _lambda_.22
= control target key start
LH: loop header
LB: loop body
LE: loop exit
PB: predicated region body
PF: predicated region fallthrough
CT: control target
= control target key end

     0   :  { %s1323_s9 = smov 0   ;;  %s1444_s0 = inlined_call_operand.vmem [shape: bf16[512,256], index: 0, kind: input, shape index: {}]   ;;  %s1445_s1 = inlined_call_operand.vmem [shape: bf16[256,128], index: 1, kind: input, shape index: {}]   ;;  %s1446_s2 = inlined_call_operand.vmem [shape: bf16[512,128], index: 2, kind: output, shape index: {}]  }
   0x1 LB: > { %s880_s10 = sadd.s32 4294967295, %s1306_s9   ;;  %p884_p0 = scmp.ge.s32.totalorder %s1306_s9, 1  ;;  %s1306_s9 = sphi %s1323_s9, %s12_s9  }
   0x2   : > { %p114_p1 = scmp.lt.s32.totalorder %s1306_s9, 3 }
   0x4   : > { %p115_p2 = pnand %p884_p0, %p114_p1 }
   0x5   : > { %s885_s13 = sshll.u32 (!%p115_p2), %s880_s10, 5 }
   0x6   : > { %118 = sbr.rel (%p115_p2) target bundleno = 306 (0x132), region = 28  ;;  %p138_p3 = scmp.lt.s32.totalorder (!%p115_p2), %s885_s13, 63 }
   0xb   : > { %v1236_v0 = vld [vmem:[%s1445_s1 + $0x78] sm:$0xff]   ;;  %v1238_v2 = vld [vmem:[%s1445_s1 + $0x70] sm:$0xff]   ;;  %v1240_v4 = vld [vmem:[%s1445_s1 + $0x68] sm:$0xff]   ;;  %s1448_s13 = smov (!%p138_p3, %s885_s13), 63 }
   0xc   : > { %v1237_v1 = vld [vmem:[%s1445_s1 + $0x38] sm:$0xff]   ;;  %1100 = vmatprep.subr.bf16.mxu0 %v1236_v0  ;;  %1212 = vmatprep.subr.bf16.mxu1 %v1236_v0  ;;  %v1239_v3 = vld [vmem:[%s1445_s1 + $0x30] sm:$0xff]   ;;  %v1241_v5 = vld [vmem:[%s1445_s1 + $0x28] sm:$0xff]   ;;  %s972_s28 = sshll.u32 %s1448_s13, 3  ;;  %s889_s22 = sshll.u32 %s1448_s13, 2 }
   0xd   : > { %1101 = vmatpush3.bf16.msra.mxu0 %v1237_v1  ;;  %1220 = vmatpush3.bf16.msra.mxu1 %v1237_v1  ;;  %v1242_v6 = vld [vmem:[%s1445_s1 + $0x60] sm:$0xff]   ;;  %v1244_v8 = vld [vmem:[%s1445_s1 + $0x58] sm:$0xff]   ;;  %s1364_s5 = scalar_lea.vmem %s1444_s0, %s972_s28  ;;  %v1246_v10 = vld [vmem:[%s1445_s1 + $0x50] sm:$0xff]   ;;  %s1423_s25 = scalar_lea.vmem %s1446_s2, %s889_s22 }
   0xe   : > { %1102 = vmatprep.subr.bf16.mxu0 %v1238_v2  ;;  %1213 = vmatprep.subr.bf16.mxu1 %v1238_v2  ;;  %v1243_v7 = vld [vmem:[%s1445_s1 + $0x20] sm:$0xff]   ;;  %v1245_v9 = vld [vmem:[%s1445_s1 + $0x18] sm:$0xff]   ;;  %v1247_v13 = vld [vmem:[%s1445_s1 + $0x10] sm:$0xff]  }
   0xf   : > { %v1254_v11 = vld [vmem:[%s1364_s5 + $0x4] ss:$8 sps:$4 sm:$0xff]   ;;  %v1252_v18 = vld [vmem:[%s1364_s5] ss:$8 sps:$4 sm:$0xff]   ;;  %v1258_v20 = vld [vmem:[%s1364_s5 + $0x14] ss:$8 sps:$4 sm:$0xff]  }
  0x10   : > { %v1257_v12 = vld [vmem:[%s1364_s5 + $0x84] ss:$8 sps:$4 sm:$0xff]   ;;  %503 = vmatprep.mubr.bf16.mxu0 %v1254_v11  ;;  %v1255_v19 = vld [vmem:[%s1364_s5 + $0x80] ss:$8 sps:$4 sm:$0xff]   ;;  %v1260_v21 = vld [vmem:[%s1364_s5 + $0x94] ss:$8 sps:$4 sm:$0xff]  }
  0x11   : > { %1103 = vmatpush3.bf16.msra.mxu0 %v1239_v3  ;;  %1221 = vmatpush3.bf16.msra.mxu1 %v1239_v3  ;;  %v1248_v14 = vld [vmem:[%s1445_s1 + $0x48] sm:$0xff]   ;;  %v1250_v16 = vld [vmem:[%s1445_s1 + $0x40] sm:$0xff]   ;;  %v1262_v22 = vld [vmem:[%s1364_s5 + $0x10] ss:$8 sps:$4 sm:$0xff]  }
  0x12   : > { %1104 = vmatprep.subr.bf16.mxu0 %v1240_v4  ;;  %1214 = vmatprep.subr.bf16.mxu1 %v1240_v4  ;;  %v1249_v15 = vld [vmem:[%s1445_s1 + $0x8] sm:$0xff]   ;;  %v1251_v17 = vld [vmem:[%s1445_s1] sm:$0xff]   ;;  %v1263_v23 = vld [vmem:[%s1364_s5 + $0x90] ss:$8 sps:$4 sm:$0xff]  }
  0x13   : > { %567 = vmatprep.mubr.bf16.mxu1 %v1257_v12  ;;  %v1264_v24 = vld [vmem:[%s1364_s5 + $0x24] ss:$8 sps:$4 sm:$0xff]   ;;  %v1268_v26 = vld [vmem:[%s1364_s5 + $0x20] ss:$8 sps:$4 sm:$0xff]   ;;  %v1270_v28 = vld [vmem:[%s1364_s5 + $0x34] ss:$8 sps:$4 sm:$0xff]  }
  0x14   : > { %v1266_v25 = vld [vmem:[%s1364_s5 + $0xa4] ss:$8 sps:$4 sm:$0xff]   ;;  %v1269_v27 = vld [vmem:[%s1364_s5 + $0xa0] ss:$8 sps:$4 sm:$0xff]   ;;  %v1272_v29 = vld [vmem:[%s1364_s5 + $0xb4] ss:$8 sps:$4 sm:$0xff]  }
  0x15   : > { %1105 = vmatpush3.bf16.msra.mxu0 %v1241_v5  ;;  %1222 = vmatpush3.bf16.msra.mxu1 %v1241_v5  ;;  %v1274_v30 = vld [vmem:[%s1364_s5 + $0x30] ss:$8 sps:$4 sm:$0xff]   ;;  %v1276_v32 = vld [vmem:[%s1364_s5 + $0x44] ss:$8 sps:$4 sm:$0xff]   ;;  %v1280_v34 = vld [vmem:[%s1364_s5 + $0x40] ss:$8 sps:$4 sm:$0xff]  }
  0x16   : > { %1106 = vmatprep.subr.bf16.mxu0 %v1242_v6  ;;  %1215 = vmatprep.subr.bf16.mxu1 %v1242_v6  ;;  %v1275_v31 = vld [vmem:[%s1364_s5 + $0xb0] ss:$8 sps:$4 sm:$0xff]   ;;  %v1278_v33 = vld [vmem:[%s1364_s5 + $0xc4] ss:$8 sps:$4 sm:$0xff]   ;;  %v1281_v35 = vld [vmem:[%s1364_s5 + $0xc0] ss:$8 sps:$4 sm:$0xff]  }
  0x17   : > { %v1282_v36 = vld [vmem:[%s1364_s5 + $0x54] ss:$8 sps:$4 sm:$0xff]   ;;  %v1286_v38 = vld [vmem:[%s1364_s5 + $0x50] ss:$8 sps:$4 sm:$0xff]   ;;  %v1288_v40 = vld [vmem:[%s1364_s5 + $0x64] ss:$8 sps:$4 sm:$0xff]  }
  0x18   : > { %v1284_v37 = vld [vmem:[%s1364_s5 + $0xd4] ss:$8 sps:$4 sm:$0xff]   ;;  %v1287_v39 = vld [vmem:[%s1364_s5 + $0xd0] ss:$8 sps:$4 sm:$0xff]   ;;  %v1290_v41 = vld [vmem:[%s1364_s5 + $0xe4] ss:$8 sps:$4 sm:$0xff]  }
  0x19   : > { %1107 = vmatpush3.bf16.msra.mxu0 %v1243_v7  ;;  %1223 = vmatpush3.bf16.msra.mxu1 %v1243_v7  ;;  %v1292_v42 = vld [vmem:[%s1364_s5 + $0x60] ss:$8 sps:$4 sm:$0xff]   ;;  %v1294_v44 = vld [vmem:[%s1364_s5 + $0x74] ss:$8 sps:$4 sm:$0xff]   ;;  %v1298_v46 = vld [vmem:[%s1364_s5 + $0x70] ss:$8 sps:$4 sm:$0xff]  }
  0x1a   : > { %1108 = vmatprep.subr.bf16.mxu0 %v1244_v8  ;;  %1216 = vmatprep.subr.bf16.mxu1 %v1244_v8  ;;  %v1293_v43 = vld [vmem:[%s1364_s5 + $0xe0] ss:$8 sps:$4 sm:$0xff]   ;;  %v1296_v45 = vld [vmem:[%s1364_s5 + $0xf4] ss:$8 sps:$4 sm:$0xff]   ;;  %v1299_v47 = vld [vmem:[%s1364_s5 + $0xf0] ss:$8 sps:$4 sm:$0xff]  }
  0x1d   : > { %1109 = vmatpush3.bf16.msra.mxu0 %v1245_v9  ;;  %1224 = vmatpush3.bf16.msra.mxu1 %v1245_v9 }
  0x1e   : > { %1110 = vmatprep.subr.bf16.mxu0 %v1246_v10  ;;  %1217 = vmatprep.subr.bf16.mxu1 %v1246_v10 }
  0x21   : > { %1111 = vmatpush3.bf16.msra.mxu0 %v1247_v13  ;;  %1225 = vmatpush3.bf16.msra.mxu1 %v1247_v13 }
  0x22   : > { %1112 = vmatprep.subr.bf16.mxu0 %v1248_v14  ;;  %1218 = vmatprep.subr.bf16.mxu1 %v1248_v14 }
  0x25   : > { %1113 = vmatpush3.bf16.msra.mxu0 %v1249_v15  ;;  %1226 = vmatpush3.bf16.msra.mxu1 %v1249_v15 }
  0x26   : > { %1114 = vmatprep.subr.bf16.mxu0 %v1250_v16  ;;  %1219 = vmatprep.subr.bf16.mxu1 %v1250_v16 }
  0x29   : > { %1115 = vmatpush3.bf16.msra.mxu0 %v1251_v17  ;;  %1227 = vmatpush3.bf16.msra.mxu1 %v1251_v17 }
  0x2c   : > { %504 = vmatmul.mubr.bf16.vlgmr.msra.gmra.mxu0 %v1252_v18  ;;  %568 = vmatmul.mubr.bf16.vlgmr.msra.gmra.mxu1 %v1255_v19 }
  0x2d   : > { %511 = vmatprep.mubr.bf16.mxu0 %v1258_v20  ;;  %575 = vmatprep.mubr.bf16.mxu1 %v1260_v21 }
  0x34   : > { %512 = vmatmul.mubr.bf16.gmra.mxu0 %v1262_v22  ;;  %576 = vmatmul.mubr.bf16.gmra.mxu1 %v1263_v23 }
  0x35   : > { %519 = vmatprep.mubr.bf16.mxu0 %v1264_v24  ;;  %583 = vmatprep.mubr.bf16.mxu1 %v1266_v25 }
  0x3c   : > { %520 = vmatmul.mubr.bf16.gmra.mxu0 %v1268_v26  ;;  %584 = vmatmul.mubr.bf16.gmra.mxu1 %v1269_v27 }
  0x3d   : > { %527 = vmatprep.mubr.bf16.mxu0 %v1270_v28  ;;  %591 = vmatprep.mubr.bf16.mxu1 %v1272_v29 }
  0x44   : > { %528 = vmatmul.mubr.bf16.gmra.mxu0 %v1274_v30  ;;  %592 = vmatmul.mubr.bf16.gmra.mxu1 %v1275_v31 }
  0x45   : > { %535 = vmatprep.mubr.bf16.mxu0 %v1276_v32  ;;  %599 = vmatprep.mubr.bf16.mxu1 %v1278_v33 }
  0x4c   : > { %536 = vmatmul.mubr.bf16.gmra.mxu0 %v1280_v34  ;;  %600 = vmatmul.mubr.bf16.gmra.mxu1 %v1281_v35 }
  0x4d   : > { %543 = vmatprep.mubr.bf16.mxu0 %v1282_v36  ;;  %607 = vmatprep.mubr.bf16.mxu1 %v1284_v37 }
  0x54   : > { %544 = vmatmul.mubr.bf16.gmra.mxu0 %v1286_v38  ;;  %608 = vmatmul.mubr.bf16.gmra.mxu1 %v1287_v39 }
  0x55   : > { %551 = vmatprep.mubr.bf16.mxu0 %v1288_v40  ;;  %615 = vmatprep.mubr.bf16.mxu1 %v1290_v41 }
  0x5c   : > { %552 = vmatmul.mubr.bf16.gmra.mxu0 %v1292_v42  ;;  %616 = vmatmul.mubr.bf16.gmra.mxu1 %v1293_v43 }
  0x5d   : > { %559 = vmatprep.mubr.bf16.mxu0 %v1294_v44  ;;  %623 = vmatprep.mubr.bf16.mxu1 %v1296_v45 }
  0x64   : > { %560 = vmatmul.mubr.bf16.gmra.mxu0 %v1298_v46  ;;  %624 = vmatmul.mubr.bf16.gmra.mxu1 %v1299_v47 }
  0xec   : > { %v1116_v48 = vpop.f32.mrf.mxu0  ;;  %v1164_v49 = vpop.f32.mrf.mxu1 }
  0xee   : > { %v1117_v50 = vpop.f32.mrf.mxu0  ;;  %v1165_v51 = vpop.f32.mrf.mxu1 }
  0xef   : > { %v1118_v54 = vadd.f32 %v1117_v50, %v1116_v48  ;;  %v1166_v55 = vadd.f32 %v1165_v51, %v1164_v49 }
  0xf0   : > { %v1119_v52 = vpop.f32.mrf.mxu0  ;;  %v1167_v53 = vpop.f32.mrf.mxu1 }
  0xf1   : > { %v632_v62 = vmax.f32 %v1118_v54, 0.0  ;;  %v648_v63 = vmax.f32 %v1166_v55, 0.0 }
  0xf2   : > { %v1120_v56 = vpop.f32.mrf.mxu0  ;;  %v1168_v57 = vpop.f32.mrf.mxu1 }
  0xf3   : > { %v1121_v58 = vadd.f32 %v1120_v56, %v1119_v52  ;;  %v1169_v59 = vadd.f32 %v1168_v57, %v1167_v53 }
  0xf4   : > { %v1122_v60 = vpop.f32.mrf.mxu0  ;;  %v1170_v61 = vpop.f32.mrf.mxu1 }
  0xf5   : > { %v633_v0 = vmax.f32 %v1121_v58, 0.0  ;;  %v649_v1 = vmax.f32 %v1169_v59, 0.0 }
  0xf6   : > { %v1123_v2 = vpop.f32.mrf.mxu0  ;;  %v1171_v3 = vpop.f32.mrf.mxu1 }
  0xf7   : > { %v1008_v4 = vpack.c.bf16 %v633_v0, %v632_v62  ;;  %v1048_v5 = vpack.c.bf16 %v649_v1, %v648_v63  ;;  %v1124_v8 = vadd.f32 %v1123_v2, %v1122_v60  ;;  %v1172_v9 = vadd.f32 %v1171_v3, %v1170_v61 }
  0xf8   : > { %v1125_v6 = vpop.f32.mrf.mxu0  ;;  %v1173_v7 = vpop.f32.mrf.mxu1 }
  0xf9   : > { %1009 = vst [vmem:[%s1423_s25] sm:$0xff] %v1008_v4   ;;  %1092 = vst [vmem:[%s1423_s25 + $0x40] sm:$0xff] %v1048_v5   ;;  %v634_v16 = vmax.f32 %v1124_v8, 0.0  ;;  %v650_v17 = vmax.f32 %v1172_v9, 0.0 }
  0xfa   : > { %v1126_v10 = vpop.f32.mrf.mxu0  ;;  %v1174_v11 = vpop.f32.mrf.mxu1 }
  0xfb   : > { %v1127_v12 = vadd.f32 %v1126_v10, %v1125_v6  ;;  %v1175_v13 = vadd.f32 %v1174_v11, %v1173_v7 }
  0xfc   : > { %v1128_v14 = vpop.f32.mrf.mxu0  ;;  %v1176_v15 = vpop.f32.mrf.mxu1 }
  0xfd   : > { %v635_v18 = vmax.f32 %v1127_v12, 0.0  ;;  %v651_v19 = vmax.f32 %v1175_v13, 0.0 }
  0xfe   : > { %v1129_v20 = vpop.f32.mrf.mxu0  ;;  %v1177_v21 = vpop.f32.mrf.mxu1 }
  0xff   : > { %v1013_v22 = vpack.c.bf16 %v635_v18, %v634_v16  ;;  %v1053_v23 = vpack.c.bf16 %v651_v19, %v650_v17  ;;  %v1130_v26 = vadd.f32 %v1129_v20, %v1128_v14  ;;  %v1178_v27 = vadd.f32 %v1177_v21, %v1176_v15 }
 0x100   : > { %v1131_v24 = vpop.f32.mrf.mxu0  ;;  %v1179_v25 = vpop.f32.mrf.mxu1 }
 0x101   : > { %1085 = vst [vmem:[%s1423_s25 + $0x8] sm:$0xff] %v1013_v22   ;;  %1093 = vst [vmem:[%s1423_s25 + $0x48] sm:$0xff] %v1053_v23   ;;  %v636_v34 = vmax.f32 %v1130_v26, 0.0  ;;  %v652_v35 = vmax.f32 %v1178_v27, 0.0 }
 0x102   : > { %v1132_v28 = vpop.f32.mrf.mxu0  ;;  %v1180_v29 = vpop.f32.mrf.mxu1 }
 0x103   : > { %v1133_v30 = vadd.f32 %v1132_v28, %v1131_v24  ;;  %v1181_v31 = vadd.f32 %v1180_v29, %v1179_v25 }
 0x104   : > { %v1134_v32 = vpop.f32.mrf.mxu0  ;;  %v1182_v33 = vpop.f32.mrf.mxu1 }
 0x105   : > { %v637_v36 = vmax.f32 %v1133_v30, 0.0  ;;  %v653_v37 = vmax.f32 %v1181_v31, 0.0 }
 0x106   : > { %v1135_v38 = vpop.f32.mrf.mxu0  ;;  %v1183_v39 = vpop.f32.mrf.mxu1 }
 0x107   : > { %v1018_v40 = vpack.c.bf16 %v637_v36, %v636_v34  ;;  %v1058_v41 = vpack.c.bf16 %v653_v37, %v652_v35  ;;  %v1136_v44 = vadd.f32 %v1135_v38, %v1134_v32  ;;  %v1184_v45 = vadd.f32 %v1183_v39, %v1182_v33 }
 0x108   : > { %v1137_v42 = vpop.f32.mrf.mxu0  ;;  %v1185_v43 = vpop.f32.mrf.mxu1 }
 0x109   : > { %1086 = vst [vmem:[%s1423_s25 + $0x10] sm:$0xff] %v1018_v40   ;;  %1094 = vst [vmem:[%s1423_s25 + $0x50] sm:$0xff] %v1058_v41   ;;  %v638_v52 = vmax.f32 %v1136_v44, 0.0  ;;  %v654_v53 = vmax.f32 %v1184_v45, 0.0 }
 0x10a   : > { %v1138_v46 = vpop.f32.mrf.mxu0  ;;  %v1186_v47 = vpop.f32.mrf.mxu1 }
 0x10b   : > { %v1139_v48 = vadd.f32 %v1138_v46, %v1137_v42  ;;  %v1187_v49 = vadd.f32 %v1186_v47, %v1185_v43 }
 0x10c   : > { %v1140_v50 = vpop.f32.mrf.mxu0  ;;  %v1188_v51 = vpop.f32.mrf.mxu1 }
 0x10d   : > { %v639_v54 = vmax.f32 %v1139_v48, 0.0  ;;  %v655_v55 = vmax.f32 %v1187_v49, 0.0 }
 0x10e   : > { %v1141_v56 = vpop.f32.mrf.mxu0  ;;  %v1189_v57 = vpop.f32.mrf.mxu1 }
 0x10f   : > { %v1023_v58 = vpack.c.bf16 %v639_v54, %v638_v52  ;;  %v1063_v59 = vpack.c.bf16 %v655_v55, %v654_v53  ;;  %v1142_v62 = vadd.f32 %v1141_v56, %v1140_v50  ;;  %v1190_v63 = vadd.f32 %v1189_v57, %v1188_v51 }
 0x110   : > { %v1143_v60 = vpop.f32.mrf.mxu0  ;;  %v1191_v61 = vpop.f32.mrf.mxu1 }
 0x111   : > { %1087 = vst [vmem:[%s1423_s25 + $0x18] sm:$0xff] %v1023_v58   ;;  %1095 = vst [vmem:[%s1423_s25 + $0x58] sm:$0xff] %v1063_v59   ;;  %v640_v6 = vmax.f32 %v1142_v62, 0.0  ;;  %v656_v7 = vmax.f32 %v1190_v63, 0.0 }
 0x112   : > { %v1144_v0 = vpop.f32.mrf.mxu0  ;;  %v1192_v1 = vpop.f32.mrf.mxu1 }
 0x113   : > { %v1145_v2 = vadd.f32 %v1144_v0, %v1143_v60  ;;  %v1193_v3 = vadd.f32 %v1192_v1, %v1191_v61 }
 0x114   : > { %v1146_v4 = vpop.f32.mrf.mxu0  ;;  %v1194_v5 = vpop.f32.mrf.mxu1 }
 0x115   : > { %v641_v8 = vmax.f32 %v1145_v2, 0.0  ;;  %v657_v9 = vmax.f32 %v1193_v3, 0.0 }
 0x116   : > { %v1147_v10 = vpop.f32.mrf.mxu0  ;;  %v1195_v11 = vpop.f32.mrf.mxu1 }
 0x117   : > { %v1028_v12 = vpack.c.bf16 %v641_v8, %v640_v6  ;;  %v1068_v13 = vpack.c.bf16 %v657_v9, %v656_v7  ;;  %v1148_v16 = vadd.f32 %v1147_v10, %v1146_v4  ;;  %v1196_v17 = vadd.f32 %v1195_v11, %v1194_v5 }
 0x118   : > { %v1149_v14 = vpop.f32.mrf.mxu0  ;;  %v1197_v15 = vpop.f32.mrf.mxu1 }
 0x119   : > { %1088 = vst [vmem:[%s1423_s25 + $0x20] sm:$0xff] %v1028_v12   ;;  %1096 = vst [vmem:[%s1423_s25 + $0x60] sm:$0xff] %v1068_v13   ;;  %v642_v24 = vmax.f32 %v1148_v16, 0.0  ;;  %v658_v25 = vmax.f32 %v1196_v17, 0.0 }
 0x11a   : > { %v1150_v18 = vpop.f32.mrf.mxu0  ;;  %v1198_v19 = vpop.f32.mrf.mxu1 }
 0x11b   : > { %v1151_v20 = vadd.f32 %v1150_v18, %v1149_v14  ;;  %v1199_v21 = vadd.f32 %v1198_v19, %v1197_v15 }
 0x11c   : > { %v1152_v22 = vpop.f32.mrf.mxu0  ;;  %v1200_v23 = vpop.f32.mrf.mxu1 }
 0x11d   : > { %v643_v26 = vmax.f32 %v1151_v20, 0.0  ;;  %v659_v27 = vmax.f32 %v1199_v21, 0.0 }
 0x11e   : > { %v1153_v28 = vpop.f32.mrf.mxu0  ;;  %v1201_v29 = vpop.f32.mrf.mxu1 }
 0x11f   : > { %v1033_v30 = vpack.c.bf16 %v643_v26, %v642_v24  ;;  %v1073_v31 = vpack.c.bf16 %v659_v27, %v658_v25  ;;  %v1154_v34 = vadd.f32 %v1153_v28, %v1152_v22  ;;  %v1202_v35 = vadd.f32 %v1201_v29, %v1200_v23 }
 0x120   : > { %v1155_v32 = vpop.f32.mrf.mxu0  ;;  %v1203_v33 = vpop.f32.mrf.mxu1 }
 0x121   : > { %1089 = vst [vmem:[%s1423_s25 + $0x28] sm:$0xff] %v1033_v30   ;;  %1097 = vst [vmem:[%s1423_s25 + $0x68] sm:$0xff] %v1073_v31   ;;  %v644_v42 = vmax.f32 %v1154_v34, 0.0  ;;  %v660_v43 = vmax.f32 %v1202_v35, 0.0 }
 0x122   : > { %v1156_v36 = vpop.f32.mrf.mxu0  ;;  %v1204_v37 = vpop.f32.mrf.mxu1 }
 0x123   : > { %v1157_v38 = vadd.f32 %v1156_v36, %v1155_v32  ;;  %v1205_v39 = vadd.f32 %v1204_v37, %v1203_v33 }
 0x124   : > { %v1158_v40 = vpop.f32.mrf.mxu0  ;;  %v1206_v41 = vpop.f32.mrf.mxu1 }
 0x125   : > { %v645_v44 = vmax.f32 %v1157_v38, 0.0  ;;  %v661_v45 = vmax.f32 %v1205_v39, 0.0 }
 0x126   : > { %v1159_v46 = vpop.f32.mrf.mxu0  ;;  %v1207_v47 = vpop.f32.mrf.mxu1 }
 0x127   : > { %v1038_v48 = vpack.c.bf16 %v645_v44, %v644_v42  ;;  %v1078_v49 = vpack.c.bf16 %v661_v45, %v660_v43  ;;  %v1160_v52 = vadd.f32 %v1159_v46, %v1158_v40  ;;  %v1208_v53 = vadd.f32 %v1207_v47, %v1206_v41 }
 0x128   : > { %v1161_v50 = vpop.f32.mrf.mxu0  ;;  %v1209_v51 = vpop.f32.mrf.mxu1 }
 0x129   : > { %1090 = vst [vmem:[%s1423_s25 + $0x30] sm:$0xff] %v1038_v48   ;;  %1098 = vst [vmem:[%s1423_s25 + $0x70] sm:$0xff] %v1078_v49   ;;  %v646_v58 = vmax.f32 %v1160_v52, 0.0  ;;  %v662_v59 = vmax.f32 %v1208_v53, 0.0 }
 0x12a   : > { %v1162_v54 = vpop.f32.mrf.mxu0  ;;  %v1210_v55 = vpop.f32.mrf.mxu1 }
 0x12b   : > { %v1163_v56 = vadd.f32 %v1162_v54, %v1161_v50  ;;  %v1211_v57 = vadd.f32 %v1210_v55, %v1209_v51 }
 0x12d   : > { %v647_v60 = vmax.f32 %v1163_v56, 0.0  ;;  %v663_v61 = vmax.f32 %v1211_v57, 0.0 }
 0x12f   : > { %v1043_v62 = vpack.c.bf16 %v647_v60, %v646_v58  ;;  %v1083_v63 = vpack.c.bf16 %v663_v61, %v662_v59 }
 0x131   : > { %1091 = vst [vmem:[%s1423_s25 + $0x38] sm:$0xff] %v1043_v62   ;;  %1099 = vst [vmem:[%s1423_s25 + $0x78] sm:$0xff] %v1083_v63  }
 0x132 PF: > { %s12_s9 = sadd.s32 1, %s1306_s9  }
 0x133   : > { %p9_p4 = scmp.ge.s32.totalorder %s12_s9, 4  }
 0x135   :  { %11 = sbr.rel (!%p9_p4) target bundleno = 1 (0x1), region = 58 }

// kernel: _lambda_.23
= control target key start
LH: loop header
LB: loop body
LE: loop exit
PB: predicated region body
PF: predicated region fallthrough
CT: control target
= control target key end

     0   :  { %s824_s6 = smov 0   ;;  %s826_s7 = smov 0   ;;  %s1036_s0 = inlined_call_operand.vmem [shape: bf16[9,128,128], index: 0, kind: input, shape index: {}]   ;;  %s1037_s1 = inlined_call_operand.vmem [shape: bf16[128,128], index: 1, kind: output, shape index: {}]  }
   0x1   :  { %s828_s8 = smov 0  }
   0x2 LB: > { %s661_s9 = sadd.s32 4294967295, %s812_s8   ;;  %s841_s10 = sadd.s32 1, %s812_s8   ;;  %s812_s8 = sphi %s828_s8, %s1040_s8   ;;  %s808_s7 = sphi %s826_s7, %s1039_s7   ;;  %s804_s6 = sphi %s824_s6, %s1038_s6  }
   0x3   : > { %s15_s11 = ssub.s32 %s812_s8, %s841_s10  ;;  %s18_s12 = sadd.s32 1, %s808_s7 }
   0x4   : > { %p16_p0 = scmp.eq.s32.totalorder %s15_s11, 0  ;;  %p25_p1 = scmp.ne.s32.totalorder %s808_s7, %s804_s6 }
   0x5   : > { %p26_p2 = scmp.eq.s32.totalorder %s812_s8, 0  ;;  %p664_p4 = scmp.ge.s32.totalorder %s812_s8, 2 }
   0x6   : > { %s850_s13 = scalar_select %p16_p0, %s808_s7, %s18_s12  }
   0x7   : > { %p27_p3 = por %p26_p2, %p25_p1  ;;  %77 = sbr.rel (%p664_p4) target bundleno = 35 (0x23), region = 16 }
   0xc   : > { %80 = sbr.rel (!%p27_p3) target bundleno = 35 (0x23), region = 20  ;;  %s82_s14 = sand.u32 (%p27_p3), 1, %s808_s7  }
   0xd   : > { %s736_s15 = sshll.u32 (%p27_p3), %s812_s8, 5  ;;  %s764_s16 = smul.u32 (%p27_p3), 288, %s82_s14 }
   0xe   : > { %s858_s19 = scalar_lea.vmem (%p27_p3), %s1036_s0, %s736_s15 }
   0xf   : > { %v104_v0 = vld [vmem:[%s858_s19] sm:$0xff] (%p27_p3)   ;;  %v108_v1 = vld [vmem:[%s858_s19 + $0x8] sm:$0xff] (%p27_p3)   ;;  %v112_v2 = vld [vmem:[%s858_s19 + $0x10] sm:$0xff] (%p27_p3)   ;;  %s866_s20 = scalar_lea.vmem (%p27_p3), [#allocation2], %s764_s16 }
  0x10   : > { %v116_v3 = vld [vmem:[%s858_s19 + $0x18] sm:$0xff] (%p27_p3)   ;;  %v120_v4 = vld [vmem:[%s858_s19 + $0x40] sm:$0xff] (%p27_p3)   ;;  %v124_v5 = vld [vmem:[%s858_s19 + $0x48] sm:$0xff] (%p27_p3)   ;;  %105 = vst [vmem:[%s866_s20] sm:$0xff] (%p27_p3), %v104_v0  }
  0x11   : > { %109 = vst [vmem:[%s866_s20 + $0x8] sm:$0xff] %v108_v1   ;;  %113 = vst [vmem:[%s866_s20 + $0x10] sm:$0xff] %v112_v2   ;;  %v128_v6 = vld [vmem:[%s858_s19 + $0x50] sm:$0xff]   ;;  %v132_v7 = vld [vmem:[%s858_s19 + $0x58] sm:$0xff]  }
  0x12   : > { %117 = vst [vmem:[%s866_s20 + $0x18] sm:$0xff] %v116_v3   ;;  %121 = vst [vmem:[%s866_s20 + $0x20] sm:$0xff] %v120_v4   ;;  %v136_v8 = vld [vmem:[%s858_s19 + $0x80] sm:$0xff]   ;;  %v140_v9 = vld [vmem:[%s858_s19 + $0x88] sm:$0xff]  }
  0x13   : > { %125 = vst [vmem:[%s866_s20 + $0x28] sm:$0xff] %v124_v5   ;;  %129 = vst [vmem:[%s866_s20 + $0x30] sm:$0xff] %v128_v6   ;;  %v144_v10 = vld [vmem:[%s858_s19 + $0x90] sm:$0xff]   ;;  %v148_v11 = vld [vmem:[%s858_s19 + $0x98] sm:$0xff]  }
  0x14   : > { %133 = vst [vmem:[%s866_s20 + $0x38] sm:$0xff] %v132_v7   ;;  %137 = vst [vmem:[%s866_s20 + $0x40] sm:$0xff] %v136_v8   ;;  %v152_v12 = vld [vmem:[%s858_s19 + $0xc0] sm:$0xff]   ;;  %v156_v13 = vld [vmem:[%s858_s19 + $0xc8] sm:$0xff]  }
  0x15   : > { %141 = vst [vmem:[%s866_s20 + $0x48] sm:$0xff] %v140_v9   ;;  %145 = vst [vmem:[%s866_s20 + $0x50] sm:$0xff] %v144_v10   ;;  %v160_v14 = vld [vmem:[%s858_s19 + $0xd0] sm:$0xff]   ;;  %v164_v15 = vld [vmem:[%s858_s19 + $0xd8] sm:$0xff]  }
  0x16   : > { %149 = vst [vmem:[%s866_s20 + $0x58] sm:$0xff] %v148_v11   ;;  %153 = vst [vmem:[%s866_s20 + $0x60] sm:$0xff] %v152_v12   ;;  %v168_v16 = vld [vmem:[%s858_s19 + $0x100] sm:$0xff]   ;;  %v172_v17 = vld [vmem:[%s858_s19 + $0x108] sm:$0xff]  }
  0x17   : > { %157 = vst [vmem:[%s866_s20 + $0x68] sm:$0xff] %v156_v13   ;;  %161 = vst [vmem:[%s866_s20 + $0x70] sm:$0xff] %v160_v14   ;;  %v176_v18 = vld [vmem:[%s858_s19 + $0x110] sm:$0xff]   ;;  %v180_v19 = vld [vmem:[%s858_s19 + $0x118] sm:$0xff]  }
  0x18   : > { %165 = vst [vmem:[%s866_s20 + $0x78] sm:$0xff] %v164_v15   ;;  %169 = vst [vmem:[%s866_s20 + $0x80] sm:$0xff] %v168_v16   ;;  %v184_v20 = vld [vmem:[%s858_s19 + $0x140] sm:$0xff]   ;;  %v188_v21 = vld [vmem:[%s858_s19 + $0x148] sm:$0xff]  }
  0x19   : > { %173 = vst [vmem:[%s866_s20 + $0x88] sm:$0xff] %v172_v17   ;;  %177 = vst [vmem:[%s866_s20 + $0x90] sm:$0xff] %v176_v18   ;;  %v192_v22 = vld [vmem:[%s858_s19 + $0x150] sm:$0xff]   ;;  %v196_v23 = vld [vmem:[%s858_s19 + $0x158] sm:$0xff]  }
  0x1a   : > { %181 = vst [vmem:[%s866_s20 + $0x98] sm:$0xff] %v180_v19   ;;  %185 = vst [vmem:[%s866_s20 + $0xa0] sm:$0xff] %v184_v20   ;;  %v200_v24 = vld [vmem:[%s858_s19 + $0x180] sm:$0xff]   ;;  %v204_v25 = vld [vmem:[%s858_s19 + $0x188] sm:$0xff]  }
  0x1b   : > { %189 = vst [vmem:[%s866_s20 + $0xa8] sm:$0xff] %v188_v21   ;;  %193 = vst [vmem:[%s866_s20 + $0xb0] sm:$0xff] %v192_v22   ;;  %v208_v26 = vld [vmem:[%s858_s19 + $0x190] sm:$0xff]   ;;  %v212_v27 = vld [vmem:[%s858_s19 + $0x198] sm:$0xff]  }
  0x1c   : > { %197 = vst [vmem:[%s866_s20 + $0xb8] sm:$0xff] %v196_v23   ;;  %201 = vst [vmem:[%s866_s20 + $0xc0] sm:$0xff] %v200_v24   ;;  %v216_v28 = vld [vmem:[%s858_s19 + $0x1c0] sm:$0xff]   ;;  %v220_v29 = vld [vmem:[%s858_s19 + $0x1c8] sm:$0xff]  }
  0x1d   : > { %205 = vst [vmem:[%s866_s20 + $0xc8] sm:$0xff] %v204_v25   ;;  %209 = vst [vmem:[%s866_s20 + $0xd0] sm:$0xff] %v208_v26   ;;  %v224_v30 = vld [vmem:[%s858_s19 + $0x1d0] sm:$0xff]   ;;  %v228_v31 = vld [vmem:[%s858_s19 + $0x1d8] sm:$0xff]  }
  0x1e   : > { %213 = vst [vmem:[%s866_s20 + $0xd8] sm:$0xff] %v212_v27   ;;  %217 = vst [vmem:[%s866_s20 + $0xe0] sm:$0xff] %v216_v28   ;;  %v232_v32 = vld [vmem:[%s858_s19 + $0x200] sm:$0xff]   ;;  %v236_v33 = vld [vmem:[%s858_s19 + $0x208] sm:$0xff]  }
  0x1f   : > { %221 = vst [vmem:[%s866_s20 + $0xe8] sm:$0xff] %v220_v29   ;;  %225 = vst [vmem:[%s866_s20 + $0xf0] sm:$0xff] %v224_v30   ;;  %v240_v34 = vld [vmem:[%s858_s19 + $0x210] sm:$0xff]   ;;  %v244_v35 = vld [vmem:[%s858_s19 + $0x218] sm:$0xff]  }
  0x20   : > { %229 = vst [vmem:[%s866_s20 + $0xf8] sm:$0xff] %v228_v31   ;;  %233 = vst [vmem:[%s866_s20 + $0x100] sm:$0xff] %v232_v32  }
  0x21   : > { %237 = vst [vmem:[%s866_s20 + $0x108] sm:$0xff] %v236_v33   ;;  %241 = vst [vmem:[%s866_s20 + $0x110] sm:$0xff] %v240_v34  }
  0x22   : > { %245 = vst [vmem:[%s866_s20 + $0x118] sm:$0xff] %v244_v35  }
  0x23 PF: > { %p667_p5 = scmp.ge.s32.totalorder %s812_s8, 1  ;;  %p414_p6 = scmp.lt.s32.totalorder %s812_s8, 3 }
  0x25   : > { %p415_p7 = pnand %p667_p5, %p414_p6 }
  0x26   : > { %s421_s21 = sand.u32 (!%p415_p7), 1, %s804_s6   ;;  %s668_s24 = sshll.u32 (!%p415_p7), %s661_s9, 3 }
  0x27   : > { %418 = sbr.rel (%p415_p7) target bundleno = 81 (0x51), region = 61  ;;  %p442_p8 = scmp.lt.s32.totalorder (!%p415_p7), %s668_s24, 15 }
  0x28   : > { %s765_s22 = smul.u32 (!%p415_p7), 288, %s421_s21 }
  0x2a   : > { %s937_s23 = scalar_lea.vmem (!%p415_p7), [#allocation2], %s765_s22 }
  0x2c   : > { %v447_v36 = vld [vmem:[%s937_s23] sm:$0xf]  ;;  %v448_v37 = vld [vmem:[%s937_s23 + $0x4] sm:$0xf]  ;;  %v449_v54 = vld [vmem:[%s937_s23 + $0x8] sm:$0xf] }
  0x2d   : > { %v670_v38 = vld [vmem:[%s937_s23 + $0x20] sm:$0xf]  ;;  %v671_v39 = vld [vmem:[%s937_s23 + $0x24] sm:$0xf]  ;;  %v450_v55 = vld [vmem:[%s937_s23 + $0xc] sm:$0xf] }
  0x2e   : > { %v678_v40 = vld [vmem:[%s937_s23 + $0x40] sm:$0xf]  ;;  %v464_v41 = vmax.bf16 %v670_v38, %v447_v36  ;;  %v465_v42 = vmax.bf16 %v671_v39, %v448_v37  ;;  %v679_v43 = vld [vmem:[%s937_s23 + $0x44] sm:$0xf]  ;;  %v672_v56 = vld [vmem:[%s937_s23 + $0x28] sm:$0xf] }
  0x2f   : > { %v686_v44 = vld [vmem:[%s937_s23 + $0x60] sm:$0xf]  ;;  %v687_v45 = vld [vmem:[%s937_s23 + $0x64] sm:$0xf]  ;;  %v673_v57 = vld [vmem:[%s937_s23 + $0x2c] sm:$0xf]  ;;  %v466_v61 = vmax.bf16 %v672_v56, %v449_v54 }
  0x30   : > { %v481_v46 = vmax.bf16 %v678_v40, %v464_v41  ;;  %v482_v47 = vmax.bf16 %v679_v43, %v465_v42  ;;  %v694_v48 = vld [vmem:[%s937_s23 + $0x80] sm:$0xf]  ;;  %v695_v49 = vld [vmem:[%s937_s23 + $0x84] sm:$0xf]  ;;  %v467_v62 = vmax.bf16 %v673_v57, %v450_v55  ;;  %v680_v63 = vld [vmem:[%s937_s23 + $0x48] sm:$0xf] }
  0x31   : > { %v702_v52 = vld [vmem:[%s937_s23 + $0xa0] sm:$0xf]  ;;  %v703_v53 = vld [vmem:[%s937_s23 + $0xa4] sm:$0xf]  ;;  %v681_v0 = vld [vmem:[%s937_s23 + $0x4c] sm:$0xf]  ;;  %v483_v8 = vmax.bf16 %v680_v63, %v466_v61 }
  0x32   : > { %v498_v50 = vmax.bf16 %v686_v44, %v481_v46  ;;  %v499_v51 = vmax.bf16 %v687_v45, %v482_v47  ;;  %v710_v60 = vld [vmem:[%s937_s23 + $0xc0] sm:$0xf]  ;;  %v711_v1 = vld [vmem:[%s937_s23 + $0xc4] sm:$0xf]  ;;  %v688_v2 = vld [vmem:[%s937_s23 + $0x68] sm:$0xf]  ;;  %v484_v9 = vmax.bf16 %v681_v0, %v467_v62 }
  0x33   : > { %v689_v3 = vld [vmem:[%s937_s23 + $0x6c] sm:$0xf]  ;;  %s1042_s24 = smov (!%p442_p8, %s668_s24), 15  ;;  %v718_v6 = vld [vmem:[%s937_s23 + $0xe0] sm:$0xf]  ;;  %v500_v16 = vmax.bf16 %v688_v2, %v483_v8 }
  0x34   : > { %v515_v58 = vmax.bf16 %v694_v48, %v498_v50  ;;  %v516_v59 = vmax.bf16 %v695_v49, %v499_v51  ;;  %v719_v7 = vld [vmem:[%s937_s23 + $0xe4] sm:$0xf]  ;;  %v726_v10 = vld [vmem:[%s937_s23 + $0x100] sm:$0xf]  ;;  %v696_v12 = vld [vmem:[%s937_s23 + $0x88] sm:$0xf]  ;;  %v501_v17 = vmax.bf16 %v689_v3, %v484_v9 }
  0x35   : > { %v727_v11 = vld [vmem:[%s937_s23 + $0x104] sm:$0xf]  ;;  %v697_v13 = vld [vmem:[%s937_s23 + $0x8c] sm:$0xf]  ;;  %v704_v18 = vld [vmem:[%s937_s23 + $0xa8] sm:$0xf]  ;;  %v517_v26 = vmax.bf16 %v696_v12, %v500_v16 }
  0x36   : > { %v532_v4 = vmax.bf16 %v702_v52, %v515_v58  ;;  %v533_v5 = vmax.bf16 %v703_v53, %v516_v59  ;;  %v705_v19 = vld [vmem:[%s937_s23 + $0xac] sm:$0xf]  ;;  %v451_v20 = vld [vmem:[%s937_s23 + $0x10] sm:$0xf]  ;;  %v452_v21 = vld [vmem:[%s937_s23 + $0x14] sm:$0xf]  ;;  %v518_v27 = vmax.bf16 %v697_v13, %v501_v17 }
  0x37   : > { %v674_v22 = vld [vmem:[%s937_s23 + $0x30] sm:$0xf]  ;;  %v675_v23 = vld [vmem:[%s937_s23 + $0x34] sm:$0xf]  ;;  %s669_s25 = sshll.u32 %s1042_s24, 2  ;;  %v534_v37 = vmax.bf16 %v704_v18, %v517_v26 }
  0x38   : > { %v549_v14 = vmax.bf16 %v710_v60, %v532_v4  ;;  %v550_v15 = vmax.bf16 %v711_v1, %v533_v5  ;;  %v682_v28 = vld [vmem:[%s937_s23 + $0x50] sm:$0xf]  ;;  %v683_v29 = vld [vmem:[%s937_s23 + $0x54] sm:$0xf]  ;;  %v712_v30 = vld [vmem:[%s937_s23 + $0xc8] sm:$0xf]  ;;  %v468_v33 = vmax.bf16 %v674_v22, %v451_v20  ;;  %v469_v34 = vmax.bf16 %v675_v23, %v452_v21  ;;  %s990_s28 = scalar_lea.vmem %s1037_s1, %s669_s25 }
  0x39   : > { %v713_v31 = vld [vmem:[%s937_s23 + $0xcc] sm:$0xf]  ;;  %v720_v32 = vld [vmem:[%s937_s23 + $0xe8] sm:$0xf]  ;;  %v535_v38 = vmax.bf16 %v705_v19, %v518_v27  ;;  %v690_v40 = vld [vmem:[%s937_s23 + $0x70] sm:$0xf]  ;;  %v551_v48 = vmax.bf16 %v712_v30, %v534_v37 }
  0x3a   : > { %v566_v24 = vmax.bf16 %v718_v6, %v549_v14  ;;  %v567_v25 = vmax.bf16 %v719_v7, %v550_v15  ;;  %v721_v39 = vld [vmem:[%s937_s23 + $0xec] sm:$0xf]  ;;  %v691_v41 = vld [vmem:[%s937_s23 + $0x74] sm:$0xf]  ;;  %v728_v42 = vld [vmem:[%s937_s23 + $0x108] sm:$0xf]  ;;  %v485_v44 = vmax.bf16 %v682_v28, %v468_v33  ;;  %v486_v45 = vmax.bf16 %v683_v29, %v469_v34 }
  0x3b   : > { %v729_v43 = vld [vmem:[%s937_s23 + $0x10c] sm:$0xf]  ;;  %v698_v46 = vld [vmem:[%s937_s23 + $0x90] sm:$0xf]  ;;  %v552_v49 = vmax.bf16 %v713_v31, %v535_v38  ;;  %v699_v50 = vld [vmem:[%s937_s23 + $0x94] sm:$0xf]  ;;  %v568_v58 = vmax.bf16 %v720_v32, %v551_v48 }
  0x3c   : > { %v583_v35 = vmax.bf16 %v726_v10, %v566_v24  ;;  %v584_v36 = vmax.bf16 %v727_v11, %v567_v25  ;;  %v706_v51 = vld [vmem:[%s937_s23 + $0xb0] sm:$0xf]  ;;  %v453_v52 = vld [vmem:[%s937_s23 + $0x18] sm:$0xf]  ;;  %v502_v53 = vmax.bf16 %v690_v40, %v485_v44  ;;  %v503_v54 = vmax.bf16 %v691_v41, %v486_v45  ;;  %v454_v55 = vld [vmem:[%s937_s23 + $0x1c] sm:$0xf] }
  0x3d   : > { %v676_v56 = vld [vmem:[%s937_s23 + $0x38] sm:$0xf]  ;;  %v677_v57 = vld [vmem:[%s937_s23 + $0x3c] sm:$0xf]  ;;  %v569_v59 = vmax.bf16 %v721_v39, %v552_v49  ;;  %v707_v60 = vld [vmem:[%s937_s23 + $0xb4] sm:$0xf]  ;;  %v585_v5 = vmax.bf16 %v728_v42, %v568_v58 }
  0x3e   : > { %v757_v47 = vcombine.low %v583_v35, %v584_v36  ;;  %v470_v61 = vmax.bf16 %v676_v56, %v453_v52  ;;  %v471_v62 = vmax.bf16 %v677_v57, %v454_v55  ;;  %v684_v63 = vld [vmem:[%s937_s23 + $0x58] sm:$0xf]  ;;  %v685_v0 = vld [vmem:[%s937_s23 + $0x5c] sm:$0xf]  ;;  %v519_v1 = vmax.bf16 %v698_v46, %v502_v53  ;;  %v714_v7 = vld [vmem:[%s937_s23 + $0xd0] sm:$0xf] }
  0x3f   : > { %v520_v2 = vmax.bf16 %v699_v50, %v503_v54  ;;  %v692_v3 = vld [vmem:[%s937_s23 + $0x78] sm:$0xf]  ;;  %v693_v4 = vld [vmem:[%s937_s23 + $0x7c] sm:$0xf]  ;;  %v586_v6 = vmax.bf16 %v729_v43, %v569_v59  ;;  %v715_v8 = vld [vmem:[%s937_s23 + $0xd4] sm:$0xf] }
  0x40   : > { %741 = vst [vmem:[%s990_s28] sm:$0xff] %v757_v47   ;;  %v487_v9 = vmax.bf16 %v684_v63, %v470_v61  ;;  %v488_v10 = vmax.bf16 %v685_v0, %v471_v62  ;;  %v536_v11 = vmax.bf16 %v706_v51, %v519_v1  ;;  %v700_v13 = vld [vmem:[%s937_s23 + $0x98] sm:$0xf]  ;;  %v701_v14 = vld [vmem:[%s937_s23 + $0x9c] sm:$0xf]  ;;  %v722_v16 = vld [vmem:[%s937_s23 + $0xf0] sm:$0xf] }
  0x41   : > { %v537_v12 = vmax.bf16 %v707_v60, %v520_v2  ;;  %v758_v15 = vcombine.low %v585_v5, %v586_v6  ;;  %v723_v17 = vld [vmem:[%s937_s23 + $0xf4] sm:$0xf]  ;;  %v708_v22 = vld [vmem:[%s937_s23 + $0xb8] sm:$0xf]  ;;  %v709_v23 = vld [vmem:[%s937_s23 + $0xbc] sm:$0xf] }
  0x42   : > { %v504_v18 = vmax.bf16 %v692_v3, %v487_v9  ;;  %v505_v19 = vmax.bf16 %v693_v4, %v488_v10  ;;  %v553_v20 = vmax.bf16 %v714_v7, %v536_v11  ;;  %v730_v24 = vld [vmem:[%s937_s23 + $0x110] sm:$0xf]  ;;  %v731_v25 = vld [vmem:[%s937_s23 + $0x114] sm:$0xf]  ;;  %v716_v30 = vld [vmem:[%s937_s23 + $0xd8] sm:$0xf] }
  0x43   : > { %v554_v21 = vmax.bf16 %v715_v8, %v537_v12  ;;  %759 = vst [vmem:[%s990_s28 + $0x8] sm:$0xff] %v758_v15   ;;  %v717_v31 = vld [vmem:[%s937_s23 + $0xdc] sm:$0xf]  ;;  %v724_v36 = vld [vmem:[%s937_s23 + $0xf8] sm:$0xf] }
  0x44   : > { %v521_v26 = vmax.bf16 %v700_v13, %v504_v18  ;;  %v522_v27 = vmax.bf16 %v701_v14, %v505_v19  ;;  %v570_v28 = vmax.bf16 %v722_v16, %v553_v20  ;;  %v725_v37 = vld [vmem:[%s937_s23 + $0xfc] sm:$0xf]  ;;  %v732_v41 = vld [vmem:[%s937_s23 + $0x118] sm:$0xf] }
  0x45   : > { %v571_v29 = vmax.bf16 %v723_v17, %v554_v21  ;;  %v733_v42 = vld [vmem:[%s937_s23 + $0x11c] sm:$0xf] }
  0x46   : > { %v538_v32 = vmax.bf16 %v708_v22, %v521_v26  ;;  %v539_v33 = vmax.bf16 %v709_v23, %v522_v27  ;;  %v587_v34 = vmax.bf16 %v730_v24, %v570_v28 }
  0x47   : > { %v588_v35 = vmax.bf16 %v731_v25, %v571_v29 }
  0x48   : > { %v555_v38 = vmax.bf16 %v716_v30, %v538_v32  ;;  %v556_v39 = vmax.bf16 %v717_v31, %v539_v33 }
  0x49   : > { %v760_v40 = vcombine.low %v587_v34, %v588_v35 }
  0x4a   : > { %v572_v43 = vmax.bf16 %v724_v36, %v555_v38  ;;  %v573_v44 = vmax.bf16 %v725_v37, %v556_v39 }
  0x4b   : > { %761 = vst [vmem:[%s990_s28 + $0x10] sm:$0xff] %v760_v40  }
  0x4c   : > { %v589_v45 = vmax.bf16 %v732_v41, %v572_v43  ;;  %v590_v46 = vmax.bf16 %v733_v42, %v573_v44 }
  0x4e   : > { %v762_v47 = vcombine.low %v589_v45, %v590_v46 }
  0x50   : > { %763 = vst [vmem:[%s990_s28 + $0x18] sm:$0xff] %v762_v47  }
  0x51 PF: > { %p8_p9 = scmp.ge.s32.totalorder %s841_s10, 4   ;;  %s1038_s6 = smov %s808_s7 }
  0x52   : > { %s1039_s7 = smov %s850_s13  ;;  %s1040_s8 = smov %s841_s10 }
  0x53   :  { %10 = sbr.rel (!%p8_p9) target bundleno = 2 (0x2), region = 108 }

// kernel: _lambda_.25
= control target key start
LH: loop header
LB: loop body
LE: loop exit
PB: predicated region body
PF: predicated region fallthrough
CT: control target
= control target key end

     0   :  { %s570_s9 = smov 0   ;;  %s624_s0 = inlined_call_operand.vmem [shape: bf16[128,128], index: 0, kind: input, shape index: {}]   ;;  %s625_s1 = inlined_call_operand.vmem [shape: bf16[128,128], index: 1, kind: input, shape index: {}]   ;;  %s626_s2 = inlined_call_operand.vmem [shape: bf16[128,128], index: 2, kind: output, shape index: {}]  }
   0x1 LB: > { %s413_s10 = sadd.s32 4294967295, %s553_s9   ;;  %p417_p0 = scmp.ge.s32.totalorder %s553_s9, 1  ;;  %s553_s9 = sphi %s570_s9, %s12_s9  }
   0x2   : > { %p113_p1 = scmp.lt.s32.totalorder %s553_s9, 3 }
   0x4   : > { %p114_p2 = pnand %p417_p0, %p113_p1 }
   0x5   : > { %s418_s13 = sshll.u32 (!%p114_p2), %s413_s10, 3 }
   0x6   : > { %117 = sbr.rel (%p114_p2) target bundleno = 248 (0xf8), region = 28  ;;  %p136_p3 = scmp.lt.s32.totalorder (!%p114_p2), %s418_s13, 15 }
   0xb   : > { %v535_v0 = vld [vmem:[%s625_s1 + $0x38] sm:$0xff]   ;;  %v536_v1 = vld [vmem:[%s625_s1 + $0x30] sm:$0xff]   ;;  %s628_s13 = smov (!%p136_p3, %s418_s13), 15  ;;  %v537_v2 = vld [vmem:[%s625_s1 + $0x28] sm:$0xff]  }
   0xc   : > { %487 = vmatprep.subr.bf16.mxu0 %v535_v0  ;;  %511 = vmatprep.subr.bf16.mxu1 %v535_v0  ;;  %s419_s18 = sshll.u32 %s628_s13, 2  ;;  %v538_v3 = vld [vmem:[%s625_s1 + $0x20] sm:$0xff]   ;;  %v539_v6 = vld [vmem:[%s625_s1 + $0x18] sm:$0xff]   ;;  %v540_v7 = vld [vmem:[%s625_s1 + $0x10] sm:$0xff]  }
   0xd   : > { %488 = vmatpush3.bf16.msra.mxu0 %v535_v0  ;;  %519 = vmatpush3.bf16.msra.mxu1 %v535_v0  ;;  %s595_s21 = scalar_lea.vmem %s624_s0, %s419_s18  ;;  %v541_v8 = vld [vmem:[%s625_s1 + $0x8] sm:$0xff]   ;;  %v542_v9 = vld [vmem:[%s625_s1] sm:$0xff]   ;;  %s145_s6 = scalar_lea.vmem %s626_s2, %s419_s18 }
   0xe   : > { %489 = vmatprep.subr.bf16.mxu0 %v536_v1  ;;  %512 = vmatprep.subr.bf16.mxu1 %v536_v1  ;;  %v543_v4 = vld [vmem:[%s595_s21] sm:$0xff]   ;;  %v544_v5 = vld [vmem:[%s595_s21 + $0x10] sm:$0xff]   ;;  %v545_v10 = vld [vmem:[%s595_s21 + $0x8] sm:$0xff]  }
   0xf   : > { %503 = vmatprep.mubr.bf16.mxu0 %v543_v4  ;;  %507 = vmatprep.mubr.bf16.mxu1 %v544_v5  ;;  %v546_v11 = vld [vmem:[%s595_s21 + $0x18] sm:$0xff]  }
  0x11   : > { %490 = vmatpush3.bf16.msra.mxu0 %v536_v1  ;;  %520 = vmatpush3.bf16.msra.mxu1 %v536_v1 }
  0x12   : > { %491 = vmatprep.subr.bf16.mxu0 %v537_v2  ;;  %513 = vmatprep.subr.bf16.mxu1 %v537_v2 }
  0x15   : > { %492 = vmatpush3.bf16.msra.mxu0 %v537_v2  ;;  %521 = vmatpush3.bf16.msra.mxu1 %v537_v2 }
  0x16   : > { %493 = vmatprep.subr.bf16.mxu0 %v538_v3  ;;  %514 = vmatprep.subr.bf16.mxu1 %v538_v3 }
  0x19   : > { %494 = vmatpush3.bf16.msra.mxu0 %v538_v3  ;;  %522 = vmatpush3.bf16.msra.mxu1 %v538_v3 }
  0x1a   : > { %495 = vmatprep.subr.bf16.mxu0 %v539_v6  ;;  %515 = vmatprep.subr.bf16.mxu1 %v539_v6 }
  0x1d   : > { %496 = vmatpush3.bf16.msra.mxu0 %v539_v6  ;;  %523 = vmatpush3.bf16.msra.mxu1 %v539_v6 }
  0x1e   : > { %497 = vmatprep.subr.bf16.mxu0 %v540_v7  ;;  %516 = vmatprep.subr.bf16.mxu1 %v540_v7 }
  0x21   : > { %498 = vmatpush3.bf16.msra.mxu0 %v540_v7  ;;  %524 = vmatpush3.bf16.msra.mxu1 %v540_v7 }
  0x22   : > { %499 = vmatprep.subr.bf16.mxu0 %v541_v8  ;;  %517 = vmatprep.subr.bf16.mxu1 %v541_v8 }
  0x25   : > { %500 = vmatpush3.bf16.msra.mxu0 %v541_v8  ;;  %525 = vmatpush3.bf16.msra.mxu1 %v541_v8 }
  0x26   : > { %501 = vmatprep.subr.bf16.mxu0 %v542_v9  ;;  %518 = vmatprep.subr.bf16.mxu1 %v542_v9 }
  0x29   : > { %502 = vmatpush3.bf16.msra.mxu0 %v542_v9  ;;  %526 = vmatpush3.bf16.msra.mxu1 %v542_v9 }
  0x2c   : > { %504 = vmatmul.mubr.bf16.vlgmr.msra.gmra.mxu0 %v545_v10  ;;  %508 = vmatmul.mubr.bf16.vlgmr.msra.gmra.mxu1 %v546_v11 }
  0xec   : > { %v505_v12 = vpop.f32.mrf.mxu0  ;;  %v509_v13 = vpop.f32.mrf.mxu1 }
  0xed   : > { %v311_v18 = vmax.f32 %v505_v12, 0.0  ;;  %v315_v19 = vmax.f32 %v509_v13, 0.0 }
  0xee   : > { %v278_v14 = vpop.f32.mrf.mxu0  ;;  %v294_v15 = vpop.f32.mrf.mxu1 }
  0xef   : > { %v309_v22 = vmax.f32 %v278_v14, 0.0  ;;  %v313_v23 = vmax.f32 %v294_v15, 0.0 }
  0xf0   : > { %v506_v16 = vpop.f32.mrf.mxu0  ;;  %v510_v17 = vpop.f32.mrf.mxu1 }
  0xf1   : > { %v312_v20 = vmax.f32 %v506_v16, 0.0  ;;  %v316_v21 = vmax.f32 %v510_v17, 0.0 }
  0xf2   : > { %v281_v24 = vpop.f32.mrf.mxu0  ;;  %v297_v25 = vpop.f32.mrf.mxu1 }
  0xf3   : > { %v460_v26 = vpack.c.bf16 %v312_v20, %v311_v18  ;;  %v470_v27 = vpack.c.bf16 %v316_v21, %v315_v19  ;;  %v310_v28 = vmax.f32 %v281_v24, 0.0  ;;  %v314_v29 = vmax.f32 %v297_v25, 0.0 }
  0xf5   : > { %472 = vst [vmem:[%s145_s6 + $0x8] sm:$0xff] %v460_v26   ;;  %474 = vst [vmem:[%s145_s6 + $0x18] sm:$0xff] %v470_v27   ;;  %v455_v30 = vpack.c.bf16 %v310_v28, %v309_v22  ;;  %v465_v31 = vpack.c.bf16 %v314_v29, %v313_v23 }
  0xf7   : > { %456 = vst [vmem:[%s145_s6] sm:$0xff] %v455_v30   ;;  %473 = vst [vmem:[%s145_s6 + $0x10] sm:$0xff] %v465_v31  }
  0xf8 PF: > { %s12_s9 = sadd.s32 1, %s553_s9  }
  0xf9   : > { %p9_p4 = scmp.ge.s32.totalorder %s12_s9, 4  }
  0xfb   :  { %11 = sbr.rel (!%p9_p4) target bundleno = 1 (0x1), region = 58 }

// kernel: _lambda_.24
= control target key start
LH: loop header
LB: loop body
LE: loop exit
PB: predicated region body
PF: predicated region fallthrough
CT: control target
= control target key end

     0   :  { %s562_s9 = smov 0   ;;  %s616_s0 = inlined_call_operand.vmem [shape: bf16[128,128], index: 0, kind: input, shape index: {}]   ;;  %s617_s1 = inlined_call_operand.vmem [shape: bf16[128,128], index: 1, kind: input, shape index: {}]   ;;  %s618_s2 = inlined_call_operand.vmem [shape: bf16[128,128], index: 2, kind: output, shape index: {}]  }
   0x1 LB: > { %s405_s10 = sadd.s32 4294967295, %s545_s9   ;;  %p409_p0 = scmp.ge.s32.totalorder %s545_s9, 1  ;;  %s545_s9 = sphi %s562_s9, %s12_s9  }
   0x2   : > { %p113_p1 = scmp.lt.s32.totalorder %s545_s9, 3 }
   0x4   : > { %p114_p2 = pnand %p409_p0, %p113_p1 }
   0x5   : > { %s410_s13 = sshll.u32 (!%p114_p2), %s405_s10, 3 }
   0x6   : > { %117 = sbr.rel (%p114_p2) target bundleno = 246 (0xf6), region = 28  ;;  %p136_p3 = scmp.lt.s32.totalorder (!%p114_p2), %s410_s13, 15 }
   0xb   : > { %v527_v0 = vld [vmem:[%s617_s1 + $0x38] sm:$0xff]   ;;  %v528_v1 = vld [vmem:[%s617_s1 + $0x30] sm:$0xff]   ;;  %s620_s13 = smov (!%p136_p3, %s410_s13), 15  ;;  %v529_v2 = vld [vmem:[%s617_s1 + $0x28] sm:$0xff]  }
   0xc   : > { %479 = vmatprep.subr.bf16.mxu0 %v527_v0  ;;  %503 = vmatprep.subr.bf16.mxu1 %v527_v0  ;;  %s411_s18 = sshll.u32 %s620_s13, 2  ;;  %v530_v3 = vld [vmem:[%s617_s1 + $0x20] sm:$0xff]   ;;  %v531_v6 = vld [vmem:[%s617_s1 + $0x18] sm:$0xff]   ;;  %v532_v7 = vld [vmem:[%s617_s1 + $0x10] sm:$0xff]  }
   0xd   : > { %480 = vmatpush3.bf16.msra.mxu0 %v527_v0  ;;  %511 = vmatpush3.bf16.msra.mxu1 %v527_v0  ;;  %s587_s21 = scalar_lea.vmem %s616_s0, %s411_s18  ;;  %v533_v8 = vld [vmem:[%s617_s1 + $0x8] sm:$0xff]   ;;  %v534_v9 = vld [vmem:[%s617_s1] sm:$0xff]   ;;  %s145_s6 = scalar_lea.vmem %s618_s2, %s411_s18 }
   0xe   : > { %481 = vmatprep.subr.bf16.mxu0 %v528_v1  ;;  %504 = vmatprep.subr.bf16.mxu1 %v528_v1  ;;  %v535_v4 = vld [vmem:[%s587_s21] sm:$0xff]   ;;  %v536_v5 = vld [vmem:[%s587_s21 + $0x10] sm:$0xff]   ;;  %v537_v10 = vld [vmem:[%s587_s21 + $0x8] sm:$0xff]  }
   0xf   : > { %495 = vmatprep.mubr.bf16.mxu0 %v535_v4  ;;  %499 = vmatprep.mubr.bf16.mxu1 %v536_v5  ;;  %v538_v11 = vld [vmem:[%s587_s21 + $0x18] sm:$0xff]  }
  0x11   : > { %482 = vmatpush3.bf16.msra.mxu0 %v528_v1  ;;  %512 = vmatpush3.bf16.msra.mxu1 %v528_v1 }
  0x12   : > { %483 = vmatprep.subr.bf16.mxu0 %v529_v2  ;;  %505 = vmatprep.subr.bf16.mxu1 %v529_v2 }
  0x15   : > { %484 = vmatpush3.bf16.msra.mxu0 %v529_v2  ;;  %513 = vmatpush3.bf16.msra.mxu1 %v529_v2 }
  0x16   : > { %485 = vmatprep.subr.bf16.mxu0 %v530_v3  ;;  %506 = vmatprep.subr.bf16.mxu1 %v530_v3 }
  0x19   : > { %486 = vmatpush3.bf16.msra.mxu0 %v530_v3  ;;  %514 = vmatpush3.bf16.msra.mxu1 %v530_v3 }
  0x1a   : > { %487 = vmatprep.subr.bf16.mxu0 %v531_v6  ;;  %507 = vmatprep.subr.bf16.mxu1 %v531_v6 }
  0x1d   : > { %488 = vmatpush3.bf16.msra.mxu0 %v531_v6  ;;  %515 = vmatpush3.bf16.msra.mxu1 %v531_v6 }
  0x1e   : > { %489 = vmatprep.subr.bf16.mxu0 %v532_v7  ;;  %508 = vmatprep.subr.bf16.mxu1 %v532_v7 }
  0x21   : > { %490 = vmatpush3.bf16.msra.mxu0 %v532_v7  ;;  %516 = vmatpush3.bf16.msra.mxu1 %v532_v7 }
  0x22   : > { %491 = vmatprep.subr.bf16.mxu0 %v533_v8  ;;  %509 = vmatprep.subr.bf16.mxu1 %v533_v8 }
  0x25   : > { %492 = vmatpush3.bf16.msra.mxu0 %v533_v8  ;;  %517 = vmatpush3.bf16.msra.mxu1 %v533_v8 }
  0x26   : > { %493 = vmatprep.subr.bf16.mxu0 %v534_v9  ;;  %510 = vmatprep.subr.bf16.mxu1 %v534_v9 }
  0x29   : > { %494 = vmatpush3.bf16.msra.mxu0 %v534_v9  ;;  %518 = vmatpush3.bf16.msra.mxu1 %v534_v9 }
  0x2c   : > { %496 = vmatmul.mubr.bf16.vlgmr.msra.gmra.mxu0 %v537_v10  ;;  %500 = vmatmul.mubr.bf16.vlgmr.msra.gmra.mxu1 %v538_v11 }
  0xec   : > { %v497_v12 = vpop.f32.mrf.mxu0  ;;  %v501_v13 = vpop.f32.mrf.mxu1 }
  0xee   : > { %v278_v14 = vpop.f32.mrf.mxu0  ;;  %v294_v15 = vpop.f32.mrf.mxu1 }
  0xf0   : > { %v498_v16 = vpop.f32.mrf.mxu0  ;;  %v502_v17 = vpop.f32.mrf.mxu1 }
  0xf1   : > { %v452_v18 = vpack.c.bf16 %v498_v16, %v497_v12  ;;  %v462_v19 = vpack.c.bf16 %v502_v17, %v501_v13 }
  0xf2   : > { %v281_v20 = vpop.f32.mrf.mxu0  ;;  %v297_v21 = vpop.f32.mrf.mxu1 }
  0xf3   : > { %464 = vst [vmem:[%s145_s6 + $0x8] sm:$0xff] %v452_v18   ;;  %466 = vst [vmem:[%s145_s6 + $0x18] sm:$0xff] %v462_v19   ;;  %v447_v22 = vpack.c.bf16 %v281_v20, %v278_v14  ;;  %v457_v23 = vpack.c.bf16 %v297_v21, %v294_v15 }
  0xf5   : > { %448 = vst [vmem:[%s145_s6] sm:$0xff] %v447_v22   ;;  %465 = vst [vmem:[%s145_s6 + $0x10] sm:$0xff] %v457_v23  }
  0xf6 PF: > { %s12_s9 = sadd.s32 1, %s545_s9  }
  0xf7   : > { %p9_p4 = scmp.ge.s32.totalorder %s12_s9, 4  }
  0xf9   :  { %11 = sbr.rel (!%p9_p4) target bundleno = 1 (0x1), region = 58 }

// kernel: _lambda_.26
= control target key start
LH: loop header
LB: loop body
LE: loop exit
PB: predicated region body
PF: predicated region fallthrough
CT: control target
= control target key end

     0   :  { %s1343_s12 = smov 0   ;;  %s1524_s0 = inlined_call_operand.vmem [shape: bf16[128,640], index: 0, kind: input, shape index: {}]   ;;  %s1525_s1 = inlined_call_operand.vmem [shape: bf16[640,128], index: 1, kind: input, shape index: {}]   ;;  %s1526_s2 = inlined_call_operand.vmem [shape: bf16[128,128], index: 2, kind: input, shape index: {}]   ;;  %s1527_s3 = inlined_call_operand.vmem [shape: bf16[128,128], index: 3, kind: output, shape index: {}]  }
   0x1 LB: > { %s975_s13 = sadd.s32 4294967295, %s1321_s12   ;;  %p979_p0 = scmp.ge.s32.totalorder %s1321_s12, 1  ;;  %s1321_s12 = sphi %s1343_s12, %s13_s12  }
   0x2   : > { %p150_p1 = scmp.lt.s32.totalorder %s1321_s12, 3 }
   0x4   : > { %p151_p2 = pnand %p979_p0, %p150_p1 }
   0x5   : > { %s980_s19 = sshll.u32 (!%p151_p2), %s975_s13, 3 }
   0x6   : > { %154 = sbr.rel (%p151_p2) target bundleno = 285 (0x11d), region = 32  ;;  %p181_p3 = scmp.lt.s32.totalorder (!%p151_p2), %s980_s19, 15 }
   0xb   : > { %v1247_v0 = vld [vmem:[%s1525_s1 + $0x78] sm:$0xff]   ;;  %v1251_v4 = vld [vmem:[%s1525_s1 + $0x70] sm:$0xff]   ;;  %v1255_v8 = vld [vmem:[%s1525_s1 + $0x68] sm:$0xff]   ;;  %s1529_s19 = smov (!%p181_p3, %s980_s19), 15 }
   0xc   : > { %v1248_v1 = vld [vmem:[%s1525_s1 + $0xf8] sm:$0xff]   ;;  %1106 = vmatprep.subr.bf16.mxu0 %v1247_v0  ;;  %v1252_v5 = vld [vmem:[%s1525_s1 + $0xf0] sm:$0xff]   ;;  %v1256_v9 = vld [vmem:[%s1525_s1 + $0xe8] sm:$0xff]   ;;  %s1238_s16 = smul.u32 20, %s1529_s19  ;;  %s983_s24 = sshll.u32 %s1529_s19, 2 }
   0xd   : > { %v1249_v2 = vld [vmem:[%s1525_s1 + $0x38] sm:$0xff]   ;;  %1146 = vmatprep.subr.bf16.mxu1 %v1248_v1  ;;  %v1253_v6 = vld [vmem:[%s1525_s1 + $0x30] sm:$0xff]   ;;  %v1257_v10 = vld [vmem:[%s1525_s1 + $0x28] sm:$0xff]   ;;  %s191_s27 = scalar_lea.vmem %s1526_s2, %s983_s24  ;;  %s197_s29 = scalar_lea.vmem %s1527_s3, %s983_s24 }
   0xe   : > { %v1250_v3 = vld [vmem:[%s1525_s1 + $0xb8] sm:$0xff]   ;;  %1107 = vmatpush3.bf16.msra.mxu0 %v1249_v2  ;;  %v1254_v7 = vld [vmem:[%s1525_s1 + $0xb0] sm:$0xff]   ;;  %v1258_v11 = vld [vmem:[%s1525_s1 + $0xa8] sm:$0xff]   ;;  %s1449_s13 = scalar_lea.vmem %s1524_s0, %s1238_s16 }
   0xf   : > { %1147 = vmatpush3.bf16.msra.mxu1 %v1250_v3  ;;  %1108 = vmatprep.subr.bf16.mxu0 %v1251_v4  ;;  %v1259_v12 = vld [vmem:[%s1525_s1 + $0x60] sm:$0xff]   ;;  %v1263_v16 = vld [vmem:[%s1525_s1 + $0x58] sm:$0xff]   ;;  %v1267_v20 = vld [vmem:[%s1525_s1 + $0x50] sm:$0xff]  }
  0x10   : > { %1148 = vmatprep.subr.bf16.mxu1 %v1252_v5  ;;  %v1260_v13 = vld [vmem:[%s1525_s1 + $0xe0] sm:$0xff]   ;;  %v1264_v17 = vld [vmem:[%s1525_s1 + $0xd8] sm:$0xff]   ;;  %v1268_v21 = vld [vmem:[%s1525_s1 + $0xd0] sm:$0xff]  }
  0x11   : > { %v1261_v14 = vld [vmem:[%s1525_s1 + $0x20] sm:$0xff]   ;;  %v1265_v18 = vld [vmem:[%s1525_s1 + $0x18] sm:$0xff]   ;;  %v1269_v22 = vld [vmem:[%s1525_s1 + $0x10] sm:$0xff]  }
  0x12   : > { %1109 = vmatpush3.bf16.msra.mxu0 %v1253_v6  ;;  %v1262_v15 = vld [vmem:[%s1525_s1 + $0xa0] sm:$0xff]   ;;  %v1266_v19 = vld [vmem:[%s1525_s1 + $0x98] sm:$0xff]   ;;  %v1270_v23 = vld [vmem:[%s1525_s1 + $0x90] sm:$0xff]  }
  0x13   : > { %1149 = vmatpush3.bf16.msra.mxu1 %v1254_v7  ;;  %1110 = vmatprep.subr.bf16.mxu0 %v1255_v8  ;;  %v1271_v24 = vld [vmem:[%s1525_s1 + $0x48] sm:$0xff]   ;;  %v1275_v28 = vld [vmem:[%s1525_s1 + $0x40] sm:$0xff]   ;;  %v1285_v36 = vld [vmem:[%s1525_s1 + $0x138] sm:$0xff]  }
  0x14   : > { %1150 = vmatprep.subr.bf16.mxu1 %v1256_v9  ;;  %v1272_v25 = vld [vmem:[%s1525_s1 + $0xc8] sm:$0xff]   ;;  %v1276_v29 = vld [vmem:[%s1525_s1 + $0xc0] sm:$0xff]   ;;  %v1286_v37 = vld [vmem:[%s1525_s1 + $0x130] sm:$0xff]  }
  0x15   : > { %v1273_v26 = vld [vmem:[%s1525_s1 + $0x8] sm:$0xff]   ;;  %v1277_v30 = vld [vmem:[%s1525_s1] sm:$0xff]   ;;  %v1297_v45 = vld [vmem:[%s1449_s13 + $0x5c] ss:$20 sps:$4 sm:$0xff]  }
  0x16   : > { %1111 = vmatpush3.bf16.msra.mxu0 %v1257_v10  ;;  %v1274_v27 = vld [vmem:[%s1525_s1 + $0x88] sm:$0xff]   ;;  %v1278_v31 = vld [vmem:[%s1525_s1 + $0x80] sm:$0xff]   ;;  %v1301_v46 = vld [vmem:[%s1525_s1 + $0x118] sm:$0xff]  }
  0x17   : > { %1151 = vmatpush3.bf16.msra.mxu1 %v1258_v11  ;;  %1112 = vmatprep.subr.bf16.mxu0 %v1259_v12  ;;  %v1279_v32 = vld [vmem:[%s1449_s13] ss:$20 sps:$4 sm:$0xff]   ;;  %v1281_v33 = vld [vmem:[%s1449_s13 + $0x4] ss:$20 sps:$4 sm:$0xff]   ;;  %v1282_v34 = vld [vmem:[%s1449_s13 + $0x8] ss:$20 sps:$4 sm:$0xff]  }
  0x18   : > { %1152 = vmatprep.subr.bf16.mxu1 %v1260_v13  ;;  %v1284_v35 = vld [vmem:[%s1449_s13 + $0xc] ss:$20 sps:$4 sm:$0xff]   ;;  %696 = vmatprep.mubr.bf16.mxu0 %v1281_v33  ;;  %v1289_v39 = vld [vmem:[%s1449_s13 + $0x34] ss:$20 sps:$4 sm:$0xff]   ;;  %v1292_v42 = vld [vmem:[%s1449_s13 + $0x30] ss:$20 sps:$4 sm:$0xff]  }
  0x19   : > { %761 = vmatprep.mubr.bf16.mxu1 %v1284_v35  ;;  %v1287_v38 = vld [vmem:[%s1449_s13 + $0x2c] ss:$20 sps:$4 sm:$0xff]   ;;  %v1291_v40 = vld [vmem:[%s1449_s13 + $0x28] ss:$20 sps:$4 sm:$0xff]   ;;  %v1299_v47 = vld [vmem:[%s1449_s13 + $0x50] ss:$20 sps:$4 sm:$0xff]  }
  0x1a   : > { %1113 = vmatpush3.bf16.msra.mxu0 %v1261_v14  ;;  %v1293_v41 = vld [vmem:[%s1525_s1 + $0x128] sm:$0xff]   ;;  %v1294_v44 = vld [vmem:[%s1525_s1 + $0x120] sm:$0xff]   ;;  %v1303_v49 = vld [vmem:[%s1449_s13 + $0x7c] ss:$20 sps:$4 sm:$0xff]  }
  0x1b   : > { %1153 = vmatpush3.bf16.msra.mxu1 %v1262_v15  ;;  %1114 = vmatprep.subr.bf16.mxu0 %v1263_v16  ;;  %v1295_v43 = vld [vmem:[%s1449_s13 + $0x54] ss:$20 sps:$4 sm:$0xff]   ;;  %v1300_v48 = vld [vmem:[%s1449_s13 + $0x58] ss:$20 sps:$4 sm:$0xff]   ;;  %v1311_v55 = vld [vmem:[%s1449_s13 + $0x10] ss:$20 sps:$4 sm:$0xff]  }
  0x1c   : > { %1154 = vmatprep.subr.bf16.mxu1 %v1264_v17  ;;  %v1305_v50 = vld [vmem:[%s1449_s13 + $0x84] ss:$20 sps:$4 sm:$0xff]   ;;  %v1302_v51 = vld [vmem:[%s1525_s1 + $0x110] sm:$0xff]   ;;  %v1309_v52 = vld [vmem:[%s1525_s1 + $0x108] sm:$0xff]  }
  0x1d   : > { %v1307_v53 = vld [vmem:[%s1449_s13 + $0x78] ss:$20 sps:$4 sm:$0xff]   ;;  %v1308_v54 = vld [vmem:[%s1449_s13 + $0x80] ss:$20 sps:$4 sm:$0xff]   ;;  %v1314_v59 = vld [vmem:[%s1449_s13 + $0x88] ss:$20 sps:$4 sm:$0xff]  }
  0x1e   : > { %1115 = vmatpush3.bf16.msra.mxu0 %v1265_v18  ;;  %v1312_v56 = vld [vmem:[%s1449_s13 + $0x60] ss:$20 sps:$4 sm:$0xff]   ;;  %v1313_v58 = vld [vmem:[%s1449_s13 + $0x38] ss:$20 sps:$4 sm:$0xff]  }
  0x1f   : > { %1155 = vmatpush3.bf16.msra.mxu1 %v1266_v19  ;;  %1116 = vmatprep.subr.bf16.mxu0 %v1267_v20  ;;  %v1310_v57 = vld [vmem:[%s1525_s1 + $0x100] sm:$0xff]   ;;  %v1102_v19 = vld [vmem:[%s191_s27 + $0x18] sm:$0xff]   ;;  %v1100_v20 = vld [vmem:[%s191_s27 + $0x8] sm:$0xff]  }
  0x20   : > { %1156 = vmatprep.subr.bf16.mxu1 %v1268_v21 }
  0x22   : > { %1117 = vmatpush3.bf16.msra.mxu0 %v1269_v22 }
  0x23   : > { %1157 = vmatpush3.bf16.msra.mxu1 %v1270_v23  ;;  %1118 = vmatprep.subr.bf16.mxu0 %v1271_v24  ;;  %v1065_v23 = vld [vmem:[%s191_s27] sm:$0xff]  }
  0x24   : > { %1158 = vmatprep.subr.bf16.mxu1 %v1272_v25  ;;  %v1078_v25 = vunpack.c.l.bf16 %v1102_v19 }
  0x26   : > { %1119 = vmatpush3.bf16.msra.mxu0 %v1273_v26  ;;  %v1070_v26 = vunpack.c.l.bf16 %v1100_v20 }
  0x27   : > { %1159 = vmatpush3.bf16.msra.mxu1 %v1274_v27  ;;  %1120 = vmatprep.subr.bf16.mxu0 %v1275_v28  ;;  %v1101_v28 = vld [vmem:[%s191_s27 + $0x10] sm:$0xff]  }
  0x28   : > { %1160 = vmatprep.subr.bf16.mxu1 %v1276_v29 }
  0x2a   : > { %1121 = vmatpush3.bf16.msra.mxu0 %v1277_v30 }
  0x2b   : > { %1161 = vmatpush3.bf16.msra.mxu1 %v1278_v31  ;;  %1198 = vmatprep.subr.bf16.mxu0 %v1285_v36 }
  0x2c   : > { %1222 = vmatprep.subr.bf16.mxu1 %v1285_v36 }
  0x2d   : > { %697 = vmatmul.mubr.bf16.vlgmr.msra.gmra.mxu0 %v1279_v32  ;;  %v1066_v32 = vunpack.c.l.bf16 %v1065_v23 }
  0x2e   : > { %762 = vmatmul.mubr.bf16.vlgmr.msra.gmra.mxu1 %v1282_v34  ;;  %1199 = vmatpush3.bf16.msra.mxu0 %v1285_v36  ;;  %v1071_v34 = vunpack.c.h.bf16 %v1100_v20 }
  0x2f   : > { %1230 = vmatpush3.bf16.msra.mxu1 %v1285_v36  ;;  %1200 = vmatprep.subr.bf16.mxu0 %v1286_v37 }
  0x30   : > { %1223 = vmatprep.subr.bf16.mxu1 %v1286_v37  ;;  %704 = vmatprep.mubr.bf16.mxu0 %v1287_v38 }
  0x31   : > { %769 = vmatprep.mubr.bf16.mxu1 %v1289_v39 }
  0x32   : > { %1201 = vmatpush3.bf16.msra.mxu0 %v1286_v37 }
  0x33   : > { %1231 = vmatpush3.bf16.msra.mxu1 %v1286_v37  ;;  %1202 = vmatprep.subr.bf16.mxu0 %v1293_v41  ;;  %v1074_v37 = vunpack.c.l.bf16 %v1101_v28 }
  0x34   : > { %1224 = vmatprep.subr.bf16.mxu1 %v1293_v41 }
  0x35   : > { %705 = vmatmul.mubr.bf16.gmra.mxu0 %v1291_v40 }
  0x36   : > { %770 = vmatmul.mubr.bf16.gmra.mxu1 %v1292_v42  ;;  %712 = vmatprep.mubr.bf16.mxu0 %v1295_v43  ;;  %v1067_v42 = vunpack.c.h.bf16 %v1065_v23 }
  0x37   : > { %1203 = vmatpush3.bf16.msra.mxu0 %v1293_v41  ;;  %777 = vmatprep.mubr.bf16.mxu1 %v1297_v45 }
  0x38   : > { %1232 = vmatpush3.bf16.msra.mxu1 %v1293_v41  ;;  %1204 = vmatprep.subr.bf16.mxu0 %v1294_v44  ;;  %v1079_v41 = vunpack.c.h.bf16 %v1102_v19 }
  0x39   : > { %1225 = vmatprep.subr.bf16.mxu1 %v1294_v44 }
  0x3b   : > { %1205 = vmatpush3.bf16.msra.mxu0 %v1294_v44 }
  0x3c   : > { %1233 = vmatpush3.bf16.msra.mxu1 %v1294_v44  ;;  %1206 = vmatprep.subr.bf16.mxu0 %v1301_v46 }
  0x3d   : > { %713 = vmatmul.mubr.bf16.gmra.mxu0 %v1299_v47  ;;  %1226 = vmatprep.subr.bf16.mxu1 %v1301_v46 }
  0x3e   : > { %778 = vmatmul.mubr.bf16.gmra.mxu1 %v1300_v48  ;;  %720 = vmatprep.mubr.bf16.mxu0 %v1303_v49 }
  0x3f   : > { %1207 = vmatpush3.bf16.msra.mxu0 %v1301_v46  ;;  %785 = vmatprep.mubr.bf16.mxu1 %v1305_v50 }
  0x40   : > { %1234 = vmatpush3.bf16.msra.mxu1 %v1301_v46  ;;  %1208 = vmatprep.subr.bf16.mxu0 %v1302_v51  ;;  %v1075_v46 = vunpack.c.h.bf16 %v1101_v28 }
  0x41   : > { %1227 = vmatprep.subr.bf16.mxu1 %v1302_v51 }
  0x43   : > { %1209 = vmatpush3.bf16.msra.mxu0 %v1302_v51 }
  0x44   : > { %1235 = vmatpush3.bf16.msra.mxu1 %v1302_v51  ;;  %1210 = vmatprep.subr.bf16.mxu0 %v1309_v52 }
  0x45   : > { %721 = vmatmul.mubr.bf16.gmra.mxu0 %v1307_v53  ;;  %1228 = vmatprep.subr.bf16.mxu1 %v1309_v52 }
  0x46   : > { %786 = vmatmul.mubr.bf16.gmra.mxu1 %v1308_v54  ;;  %1214 = vmatprep.mubr.bf16.mxu0 %v1311_v55 }
  0x47   : > { %1211 = vmatpush3.bf16.msra.mxu0 %v1309_v52  ;;  %1218 = vmatprep.mubr.bf16.mxu1 %v1312_v56 }
  0x48   : > { %1236 = vmatpush3.bf16.msra.mxu1 %v1309_v52  ;;  %1212 = vmatprep.subr.bf16.mxu0 %v1310_v57 }
  0x49   : > { %1229 = vmatprep.subr.bf16.mxu1 %v1310_v57 }
  0x4b   : > { %1213 = vmatpush3.bf16.msra.mxu0 %v1310_v57 }
  0x4c   : > { %1237 = vmatpush3.bf16.msra.mxu1 %v1310_v57 }
  0x4e   : > { %1215 = vmatmul.mubr.bf16.vlgmr.msra.gmra.mxu0 %v1313_v58 }
  0x4f   : > { %1219 = vmatmul.mubr.bf16.vlgmr.msra.gmra.mxu1 %v1314_v59 }
  0xed   : > { %v1122_v60 = vpop.f32.mrf.mxu0 }
  0xee   : > { %v1501_v61 = vpop.f32.mrf.mxu1 }
  0xef   : > { %v1123_v62 = vpop.f32.mrf.mxu0 }
  0xf0   : > { %v1163_v63 = vpop.f32.mrf.mxu1  ;;  %v1124_v33 = vadd.f32 %v1123_v62, %v1122_v60 }
  0xf1   : > { %v1125_v0 = vpop.f32.mrf.mxu0  ;;  %v1164_v59 = vadd.f32 %v1163_v63, %v1501_v61 }
  0xf2   : > { %v1503_v1 = vpop.f32.mrf.mxu1  ;;  %v699_v51 = vadd.f32 %v1124_v33, %v1066_v32 }
  0xf3   : > { %v1126_v2 = vpop.f32.mrf.mxu0 }
  0xf4   : > { %v1505_v3 = vpop.f32.mrf.mxu1  ;;  %v1127_v43 = vadd.f32 %v1126_v2, %v1125_v0 }
  0xf5   : > { %v1128_v4 = vpop.f32.mrf.mxu0 }
  0xf6   : > { %v1168_v5 = vpop.f32.mrf.mxu1  ;;  %v702_v60 = vadd.f32 %v1127_v43, %v1067_v42 }
  0xf7   : > { %v1129_v6 = vpop.f32.mrf.mxu0 }
  0xf8   : > { %v1169_v7 = vpop.f32.mrf.mxu1  ;;  %v1130_v27 = vadd.f32 %v1129_v6, %v1128_v4 }
  0xf9   : > { %v1131_v8 = vpop.f32.mrf.mxu0  ;;  %v1170_v52 = vadd.f32 %v1169_v7, %v1168_v5  ;;  %v764_v7 = vadd.f32 %v1164_v59, %v699_v51 }
  0xfa   : > { %v1171_v9 = vpop.f32.mrf.mxu1  ;;  %v707_v44 = vadd.f32 %v1130_v27, %v1070_v26 }
  0xfb   : > { %v1132_v10 = vpop.f32.mrf.mxu0 }
  0xfc   : > { %v1172_v11 = vpop.f32.mrf.mxu1  ;;  %v1133_v35 = vadd.f32 %v1132_v10, %v1131_v8  ;;  %v772_v0 = vadd.f32 %v1170_v52, %v707_v44 }
  0xfd   : > { %v1134_v12 = vpop.f32.mrf.mxu0  ;;  %v1173_v62 = vadd.f32 %v1172_v11, %v1171_v9 }
  0xfe   : > { %v1174_v13 = vpop.f32.mrf.mxu1  ;;  %v710_v53 = vadd.f32 %v1133_v35, %v1071_v34 }
  0xff   : > { %v1135_v14 = vpop.f32.mrf.mxu0 }
 0x100   : > { %v1175_v15 = vpop.f32.mrf.mxu1  ;;  %v1136_v38 = vadd.f32 %v1135_v14, %v1134_v12  ;;  %v1167_v12 = vadd.f32 %v1505_v3, %v1503_v1 }
 0x101   : > { %v1137_v16 = vpop.f32.mrf.mxu0  ;;  %v1176_v4 = vadd.f32 %v1175_v15, %v1174_v13 }
 0x102   : > { %v1177_v17 = vpop.f32.mrf.mxu1  ;;  %v715_v54 = vadd.f32 %v1136_v38, %v1074_v37 }
 0x103   : > { %v1138_v18 = vpop.f32.mrf.mxu0 }
 0x104   : > { %v1178_v21 = vpop.f32.mrf.mxu1  ;;  %v1139_v47 = vadd.f32 %v1138_v18, %v1137_v16  ;;  %v775_v16 = vadd.f32 %v1173_v62, %v710_v53  ;;  %v780_v20 = vadd.f32 %v1176_v4, %v715_v54 }
 0x105   : > { %v1140_v22 = vpop.f32.mrf.mxu0  ;;  %v1179_v18 = vadd.f32 %v1178_v21, %v1177_v17 }
 0x106   : > { %v1180_v24 = vpop.f32.mrf.mxu1  ;;  %v718_v6 = vadd.f32 %v1139_v47, %v1075_v46 }
 0x107   : > { %v1141_v29 = vpop.f32.mrf.mxu0 }
 0x108   : > { %v1142_v30 = vadd.f32 %v1141_v29, %v1140_v22  ;;  %v1181_v31 = vpop.f32.mrf.mxu1  ;;  %v767_v22 = vadd.f32 %v1167_v12, %v702_v60 }
 0x109   : > { %v1143_v36 = vpop.f32.mrf.mxu0  ;;  %v1182_v48 = vadd.f32 %v1181_v31, %v1180_v24  ;;  %v783_v24 = vadd.f32 %v1179_v18, %v718_v6 }
 0x10a   : > { %v723_v39 = vadd.f32 %v1142_v30, %v1078_v25  ;;  %v1183_v40 = vpop.f32.mrf.mxu1 }
 0x10b   : > { %v1144_v45 = vpop.f32.mrf.mxu0 }
 0x10c   : > { %v1145_v49 = vadd.f32 %v1144_v45, %v1143_v36  ;;  %v1184_v50 = vpop.f32.mrf.mxu1  ;;  %v788_v58 = vadd.f32 %v1182_v48, %v723_v39 }
 0x10d   : > { %v1185_v56 = vadd.f32 %v1184_v50, %v1183_v40 }
 0x10e   : > { %v726_v55 = vadd.f32 %v1145_v49, %v1079_v41  ;;  %v1216_v57 = vpop.f32.mrf.mxu0 }
 0x10f   : > { %v1220_v2 = vpop.f32.mrf.mxu1  ;;  %v837_v5 = vadd.f32 %v1216_v57, %v772_v0 }
 0x110   : > { %v828_v8 = vpop.f32.mrf.mxu0  ;;  %v791_v10 = vadd.f32 %v1185_v56, %v726_v55  ;;  %v853_v19 = vadd.f32 %v1220_v2, %v788_v58 }
 0x111   : > { %v844_v14 = vpop.f32.mrf.mxu1  ;;  %v829_v63 = vadd.f32 %v828_v8, %v764_v7  ;;  %v861_v25 = vmax.f32 %v837_v5, 0.0 }
 0x112   : > { %v1217_v61 = vpop.f32.mrf.mxu0  ;;  %v845_v13 = vadd.f32 %v844_v14, %v780_v20  ;;  %v865_v27 = vmax.f32 %v853_v19, 0.0 }
 0x113   : > { %v840_v9 = vadd.f32 %v1217_v61, %v775_v16  ;;  %v1221_v11 = vpop.f32.mrf.mxu1  ;;  %v859_v28 = vmax.f32 %v829_v63, 0.0 }
 0x114   : > { %v856_v15 = vadd.f32 %v1221_v11, %v791_v10  ;;  %v831_v23 = vpop.f32.mrf.mxu0  ;;  %v863_v31 = vmax.f32 %v845_v13, 0.0 }
 0x115   : > { %v862_v26 = vmax.f32 %v840_v9, 0.0  ;;  %v832_v1 = vadd.f32 %v831_v23, %v767_v22  ;;  %v847_v3 = vpop.f32.mrf.mxu1 }
 0x116   : > { %v866_v17 = vmax.f32 %v856_v15, 0.0  ;;  %v848_v21 = vadd.f32 %v847_v3, %v783_v24 }
 0x117   : > { %v1088_v29 = vpack.c.bf16 %v862_v26, %v861_v25  ;;  %v860_v30 = vmax.f32 %v832_v1, 0.0 }
 0x118   : > { %v1098_v32 = vpack.c.bf16 %v866_v17, %v865_v27  ;;  %v864_v33 = vmax.f32 %v848_v21, 0.0 }
 0x119   : > { %1103 = vst [vmem:[%s197_s29 + $0x8] sm:$0xff] %v1088_v29   ;;  %v1083_v34 = vpack.c.bf16 %v860_v30, %v859_v28 }
 0x11a   : > { %1105 = vst [vmem:[%s197_s29 + $0x18] sm:$0xff] %v1098_v32   ;;  %v1093_v35 = vpack.c.bf16 %v864_v33, %v863_v31 }
 0x11b   : > { %1084 = vst [vmem:[%s197_s29] sm:$0xff] %v1083_v34  }
 0x11c   : > { %1104 = vst [vmem:[%s197_s29 + $0x10] sm:$0xff] %v1093_v35  }
 0x11d PF: > { %s13_s12 = sadd.s32 1, %s1321_s12  }
 0x11e   : > { %p10_p4 = scmp.ge.s32.totalorder %s13_s12, 4  }
 0x120   :  { %12 = sbr.rel (!%p10_p4) target bundleno = 1 (0x1), region = 65 }

// kernel: _lambda_.28
= control target key start
LH: loop header
LB: loop body
LE: loop exit
PB: predicated region body
PF: predicated region fallthrough
CT: control target
= control target key end

     0   :  { %s915_s9 = smov 0   ;;  %s1065_s0 = inlined_call_operand.vmem [shape: bf16[32,640], index: 0, kind: input, shape index: {}]   ;;  %s1066_s1 = inlined_call_operand.vmem [shape: bf16[640,128], index: 1, kind: input, shape index: {}]   ;;  %s1067_s2 = inlined_call_operand.vmem [shape: bf16[32,128], index: 2, kind: output, shape index: {}]  }
   0x1 LB: > { %s694_s10 = sadd.s32 4294967295, %s896_s9   ;;  %p698_p0 = scmp.ge.s32.totalorder %s896_s9, 1  ;;  %s896_s9 = sphi %s915_s9, %s12_s9  }
   0x2   : > { %p114_p1 = scmp.lt.s32.totalorder %s896_s9, 3 }
   0x4   : > { %p115_p2 = pnand %p698_p0, %p114_p1 }
   0x5   : > { %s699_s15 = sshll.u32 (!%p115_p2), %s694_s10, 1 }
   0x6   : > { %118 = sbr.rel (%p115_p2) target bundleno = 281 (0x119), region = 28  ;;  %p138_p3 = scmp.lt.s32.totalorder (!%p115_p2), %s699_s15, 3 }
   0xb   : > { %v843_v0 = vld [vmem:[%s1066_s1 + $0x78] sm:$0xff]   ;;  %v847_v4 = vld [vmem:[%s1066_s1 + $0x70] sm:$0xff]   ;;  %v851_v8 = vld [vmem:[%s1066_s1 + $0x68] sm:$0xff]   ;;  %s1069_s15 = smov (!%p138_p3, %s699_s15), 3  ;;  %v898_v34 = vmov 0.0   ;;  %vm899_vm0 = vmmov 0  }
   0xc   : > { %v844_v1 = vld [vmem:[%s1066_s1 + $0xf8] sm:$0xff]   ;;  %759 = vmatprep.subr.bf16.mxu0 %v843_v0  ;;  %v848_v5 = vld [vmem:[%s1066_s1 + $0xf0] sm:$0xff]   ;;  %v852_v9 = vld [vmem:[%s1066_s1 + $0xe8] sm:$0xff]   ;;  %s832_s11 = smul.u32 20, %s1069_s15  ;;  %s702_s18 = sshll.u32 %s1069_s15, 2 }
   0xd   : > { %v845_v2 = vld [vmem:[%s1066_s1 + $0x38] sm:$0xff]   ;;  %781 = vmatprep.subr.bf16.mxu1 %v844_v1  ;;  %v849_v6 = vld [vmem:[%s1066_s1 + $0x30] sm:$0xff]   ;;  %v853_v10 = vld [vmem:[%s1066_s1 + $0x28] sm:$0xff]   ;;  %s148_s21 = scalar_lea.vmem %s1067_s2, %s702_s18 }
   0xe   : > { %v846_v3 = vld [vmem:[%s1066_s1 + $0xb8] sm:$0xff]   ;;  %760 = vmatpush3.bf16.msra.mxu0 %v845_v2  ;;  %v850_v7 = vld [vmem:[%s1066_s1 + $0xb0] sm:$0xff]   ;;  %v854_v11 = vld [vmem:[%s1066_s1 + $0xa8] sm:$0xff]   ;;  %s1021_s23 = scalar_lea.vmem %s1065_s0, %s832_s11 }
   0xf   : > { %782 = vmatpush3.bf16.msra.mxu1 %v846_v3  ;;  %761 = vmatprep.subr.bf16.mxu0 %v847_v4  ;;  %v855_v12 = vld [vmem:[%s1066_s1 + $0x60] sm:$0xff]   ;;  %v859_v16 = vld [vmem:[%s1066_s1 + $0x58] sm:$0xff]   ;;  %v863_v20 = vld [vmem:[%s1066_s1 + $0x50] sm:$0xff]  }
  0x10   : > { %783 = vmatprep.subr.bf16.mxu1 %v848_v5  ;;  %v856_v13 = vld [vmem:[%s1066_s1 + $0xe0] sm:$0xff]   ;;  %v860_v17 = vld [vmem:[%s1066_s1 + $0xd8] sm:$0xff]   ;;  %v864_v21 = vld [vmem:[%s1066_s1 + $0xd0] sm:$0xff]  }
  0x11   : > { %v857_v14 = vld [vmem:[%s1066_s1 + $0x20] sm:$0xff]   ;;  %v861_v18 = vld [vmem:[%s1066_s1 + $0x18] sm:$0xff]   ;;  %v865_v22 = vld [vmem:[%s1066_s1 + $0x10] sm:$0xff]  }
  0x12   : > { %762 = vmatpush3.bf16.msra.mxu0 %v849_v6  ;;  %v858_v15 = vld [vmem:[%s1066_s1 + $0xa0] sm:$0xff]   ;;  %v862_v19 = vld [vmem:[%s1066_s1 + $0x98] sm:$0xff]   ;;  %v866_v23 = vld [vmem:[%s1066_s1 + $0x90] sm:$0xff]  }
  0x13   : > { %784 = vmatpush3.bf16.msra.mxu1 %v850_v7  ;;  %763 = vmatprep.subr.bf16.mxu0 %v851_v8  ;;  %v867_v24 = vld [vmem:[%s1066_s1 + $0x48] sm:$0xff]   ;;  %v871_v28 = vld [vmem:[%s1066_s1 + $0x40] sm:$0xff]   ;;  %v881_v37 = vld [vmem:[%s1066_s1 + $0x138] sm:$0xff]  }
  0x14   : > { %785 = vmatprep.subr.bf16.mxu1 %v852_v9  ;;  %v868_v25 = vld [vmem:[%s1066_s1 + $0xc8] sm:$0xff]   ;;  %v872_v29 = vld [vmem:[%s1066_s1 + $0xc0] sm:$0xff]   ;;  %v882_v38 = vld [vmem:[%s1066_s1 + $0x130] sm:$0xff]  }
  0x15   : > { %v869_v26 = vld [vmem:[%s1066_s1 + $0x8] sm:$0xff]   ;;  %v873_v30 = vld [vmem:[%s1066_s1] sm:$0xff]   ;;  %v885_v41 = vld [vmem:[%s1066_s1 + $0x118] sm:$0xff]  }
  0x16   : > { %764 = vmatpush3.bf16.msra.mxu0 %v853_v10  ;;  %v870_v27 = vld [vmem:[%s1066_s1 + $0x88] sm:$0xff]   ;;  %v874_v31 = vld [vmem:[%s1066_s1 + $0x80] sm:$0xff]   ;;  %v886_v42 = vld [vmem:[%s1066_s1 + $0x110] sm:$0xff]  }
  0x17   : > { %786 = vmatpush3.bf16.msra.mxu1 %v854_v11  ;;  %765 = vmatprep.subr.bf16.mxu0 %v855_v12  ;;  %v875_v32 = vld [vmem:[%s1021_s23] ss:$20 sps:$4 sm:$0xff]   ;;  %v877_v33 = vld [vmem:[%s1021_s23 + $0x4] ss:$20 sps:$4 sm:$0xff]   ;;  %v878_v35 = vld [vmem:[%s1021_s23 + $0x8] ss:$20 sps:$4 sm:$0xff]  }
  0x18   : > { %787 = vmatprep.subr.bf16.mxu1 %v856_v13  ;;  %v880_v36 = vld [vmem:[%s1021_s23 + $0xc] ss:$20 sps:$4 sm:$0xff]   ;;  %535 = vmatprep.mubr.bf16.mxu0 %v877_v33  ;;  %v889_v45 = vld [vmem:[%s1021_s23 + $0x10] ss:$20 sps:$4 sm:$0xff]  }
  0x19   : > { %576 = vmatprep.mubr.bf16.mxu1 %v880_v36  ;;  %v883_v39 = vld [vmem:[%s1066_s1 + $0x128] sm:$0xff]   ;;  %v884_v40 = vld [vmem:[%s1066_s1 + $0x120] sm:$0xff]  }
  0x1a   : > { %766 = vmatpush3.bf16.msra.mxu0 %v857_v14  ;;  %v887_v43 = vld [vmem:[%s1066_s1 + $0x108] sm:$0xff]   ;;  %v888_v44 = vld [vmem:[%s1066_s1 + $0x100] sm:$0xff]  }
  0x1b   : > { %788 = vmatpush3.bf16.msra.mxu1 %v858_v15  ;;  %767 = vmatprep.subr.bf16.mxu0 %v859_v16 }
  0x1c   : > { %789 = vmatprep.subr.bf16.mxu1 %v860_v17 }
  0x1e   : > { %768 = vmatpush3.bf16.msra.mxu0 %v861_v18 }
  0x1f   : > { %790 = vmatpush3.bf16.msra.mxu1 %v862_v19  ;;  %769 = vmatprep.subr.bf16.mxu0 %v863_v20 }
  0x20   : > { %791 = vmatprep.subr.bf16.mxu1 %v864_v21 }
  0x22   : > { %770 = vmatpush3.bf16.msra.mxu0 %v865_v22 }
  0x23   : > { %792 = vmatpush3.bf16.msra.mxu1 %v866_v23  ;;  %771 = vmatprep.subr.bf16.mxu0 %v867_v24 }
  0x24   : > { %793 = vmatprep.subr.bf16.mxu1 %v868_v25 }
  0x26   : > { %772 = vmatpush3.bf16.msra.mxu0 %v869_v26 }
  0x27   : > { %794 = vmatpush3.bf16.msra.mxu1 %v870_v27  ;;  %773 = vmatprep.subr.bf16.mxu0 %v871_v28 }
  0x28   : > { %795 = vmatprep.subr.bf16.mxu1 %v872_v29 }
  0x2a   : > { %774 = vmatpush3.bf16.msra.mxu0 %v873_v30 }
  0x2b   : > { %796 = vmatpush3.bf16.msra.mxu1 %v874_v31  ;;  %812 = vmatprep.subr.bf16.mxu0 %v898_v34 }
  0x2d   : > { %536 = vmatmul.mubr.bf16.vlgmr.msra.gmra.mxu0 %v875_v32 }
  0x2e   : > { %577 = vmatmul.mubr.bf16.vlgmr.msra.gmra.mxu1 %v878_v35  ;;  %813 = vmatpush3.bf16.msra.mxu0 %v881_v37 }
  0x2f   : > { %814 = vmatprep.subr.bf16.mxu0 %v898_v34  ;;  %828 = vmatprep.mubr.msk.bf16.mxu0 %vm899_vm0, %v898_v34 }
  0x32   : > { %815 = vmatpush3.bf16.msra.mxu0 %v882_v38 }
  0x33   : > { %816 = vmatprep.subr.bf16.mxu0 %v898_v34 }
  0x36   : > { %817 = vmatpush3.bf16.msra.mxu0 %v883_v39 }
  0x37   : > { %818 = vmatprep.subr.bf16.mxu0 %v898_v34 }
  0x3a   : > { %819 = vmatpush3.bf16.msra.mxu0 %v884_v40 }
  0x3b   : > { %820 = vmatprep.subr.bf16.mxu0 %v898_v34 }
  0x3e   : > { %821 = vmatpush3.bf16.msra.mxu0 %v885_v41 }
  0x3f   : > { %822 = vmatprep.subr.bf16.mxu0 %v898_v34 }
  0x42   : > { %823 = vmatpush3.bf16.msra.mxu0 %v886_v42 }
  0x43   : > { %824 = vmatprep.subr.bf16.mxu0 %v898_v34 }
  0x46   : > { %825 = vmatpush3.bf16.msra.mxu0 %v887_v43 }
  0x47   : > { %826 = vmatprep.subr.bf16.mxu0 %v898_v34 }
  0x4a   : > { %827 = vmatpush3.bf16.msra.mxu0 %v888_v44 }
  0x4d   : > { %829 = vmatmul.mubr.bf16.vlgmr.msra.gmra.mxu0 %v889_v45 }
  0xed   : > { %v775_v46 = vpop.f32.mrf.mxu0 }
  0xee   : > { %v797_v47 = vpop.f32.mrf.mxu1 }
  0xef   : > { %v776_v48 = vpop.f32.mrf.mxu0 }
  0xf0   : > { %v798_v49 = vpop.f32.mrf.mxu1  ;;  %v777_v54 = vadd.f32 %v776_v48, %v775_v46 }
  0xf1   : > { %v778_v50 = vpop.f32.mrf.mxu0  ;;  %v799_v55 = vadd.f32 %v798_v49, %v797_v47 }
  0xf2   : > { %v800_v51 = vpop.f32.mrf.mxu1 }
  0xf3   : > { %v779_v52 = vpop.f32.mrf.mxu0  ;;  %v579_v59 = vadd.f32 %v799_v55, %v777_v54 }
  0xf4   : > { %v801_v53 = vpop.f32.mrf.mxu1  ;;  %v780_v56 = vadd.f32 %v779_v52, %v778_v50 }
  0xf5   : > { %v802_v57 = vadd.f32 %v801_v53, %v800_v51 }
  0xf7   : > { %v582_v62 = vadd.f32 %v802_v57, %v780_v56 }
 0x10d   : > { %v619_v58 = vpop.f32.mrf.mxu0 }
 0x10e   : > { %v620_v61 = vadd.f32 %v619_v58, %v579_v59 }
 0x10f   : > { %v830_v60 = vpop.f32.mrf.mxu0 }
 0x110   : > { %v626_v2 = vmax.f32 %v620_v61, 0.0 }
 0x111   : > { %v622_v63 = vpop.f32.mrf.mxu0 }
 0x112   : > { %v623_v0 = vadd.f32 %v622_v63, %v582_v62 }
 0x113   : > { %v831_v1 = vpop.f32.mrf.mxu0 }
 0x114   : > { %v627_v3 = vmax.f32 %v623_v0, 0.0 }
 0x116   : > { %v757_v4 = vpack.c.bf16 %v627_v3, %v626_v2 }
 0x118   : > { %758 = vst [vmem:[%s148_s21] sm:$0xff] %v757_v4  }
 0x119 PF: > { %s12_s9 = sadd.s32 1, %s896_s9  }
 0x11a   : > { %p9_p4 = scmp.ge.s32.totalorder %s12_s9, 4  }
 0x11c   :  { %11 = sbr.rel (!%p9_p4) target bundleno = 1 (0x1), region = 58 }

// kernel: _lambda_.27
= control target key start
LH: loop header
LB: loop body
LE: loop exit
PB: predicated region body
PF: predicated region fallthrough
CT: control target
= control target key end

     0   :  { %s429_s9 = smov 0   ;;  %s470_s0 = inlined_call_operand.vmem [shape: bf16[32,128], index: 0, kind: input, shape index: {}]   ;;  %s471_s1 = inlined_call_operand.vmem [shape: bf16[128,128], index: 1, kind: input, shape index: {}]   ;;  %s472_s2 = inlined_call_operand.vmem [shape: bf16[32,128], index: 2, kind: output, shape index: {}]  }
   0x1 LB: > { %s327_s10 = sadd.s32 4294967295, %s410_s9   ;;  %p331_p0 = scmp.ge.s32.totalorder %s410_s9, 1  ;;  %s410_s9 = sphi %s429_s9, %s12_s9  }
   0x2   : > { %p113_p1 = scmp.lt.s32.totalorder %s410_s9, 3 }
   0x4   : > { %p114_p2 = pnand %p331_p0, %p113_p1 }
   0x5   : > { %s332_s15 = sshll.u32 (!%p114_p2), %s327_s10, 1 }
   0x6   : > { %117 = sbr.rel (%p114_p2) target bundleno = 244 (0xf4), region = 28  ;;  %p136_p3 = scmp.lt.s32.totalorder (!%p114_p2), %s332_s15, 3 }
   0xb   : > { %v395_v0 = vld [vmem:[%s471_s1 + $0x38] sm:$0xff]   ;;  %v412_v1 = vmov 0.0   ;;  %v396_v2 = vld [vmem:[%s471_s1 + $0x30] sm:$0xff]   ;;  %vm413_vm0 = vmmov 0   ;;  %s474_s15 = smov (!%p136_p3, %s332_s15), 3  ;;  %v397_v3 = vld [vmem:[%s471_s1 + $0x28] sm:$0xff]  }
   0xc   : > { %365 = vmatprep.subr.bf16.mxu0 %v412_v1  ;;  %381 = vmatprep.mubr.msk.bf16.mxu0 %vm413_vm0, %v412_v1  ;;  %s333_s18 = sshll.u32 %s474_s15, 2  ;;  %v398_v4 = vld [vmem:[%s471_s1 + $0x20] sm:$0xff]   ;;  %v399_v5 = vld [vmem:[%s471_s1 + $0x18] sm:$0xff]   ;;  %v400_v6 = vld [vmem:[%s471_s1 + $0x10] sm:$0xff]  }
   0xd   : > { %366 = vmatpush3.bf16.msra.mxu0 %v395_v0  ;;  %s139_s21 = scalar_lea.vmem %s470_s0, %s333_s18  ;;  %v401_v7 = vld [vmem:[%s471_s1 + $0x8] sm:$0xff]   ;;  %v402_v8 = vld [vmem:[%s471_s1] sm:$0xff]   ;;  %s145_s6 = scalar_lea.vmem %s472_s2, %s333_s18 }
   0xe   : > { %367 = vmatprep.subr.bf16.mxu0 %v412_v1  ;;  %v403_v9 = vld [vmem:[%s139_s21] sm:$0xff]  }
  0x11   : > { %368 = vmatpush3.bf16.msra.mxu0 %v396_v2 }
  0x12   : > { %369 = vmatprep.subr.bf16.mxu0 %v412_v1 }
  0x15   : > { %370 = vmatpush3.bf16.msra.mxu0 %v397_v3 }
  0x16   : > { %371 = vmatprep.subr.bf16.mxu0 %v412_v1 }
  0x19   : > { %372 = vmatpush3.bf16.msra.mxu0 %v398_v4 }
  0x1a   : > { %373 = vmatprep.subr.bf16.mxu0 %v412_v1 }
  0x1d   : > { %374 = vmatpush3.bf16.msra.mxu0 %v399_v5 }
  0x1e   : > { %375 = vmatprep.subr.bf16.mxu0 %v412_v1 }
  0x21   : > { %376 = vmatpush3.bf16.msra.mxu0 %v400_v6 }
  0x22   : > { %377 = vmatprep.subr.bf16.mxu0 %v412_v1 }
  0x25   : > { %378 = vmatpush3.bf16.msra.mxu0 %v401_v7 }
  0x26   : > { %379 = vmatprep.subr.bf16.mxu0 %v412_v1 }
  0x29   : > { %380 = vmatpush3.bf16.msra.mxu0 %v402_v8 }
  0x2c   : > { %382 = vmatmul.mubr.bf16.vlgmr.msra.gmra.mxu0 %v403_v9 }
  0xec   : > { %v254_v10 = vpop.f32.mrf.mxu0 }
  0xee   : > { %v383_v11 = vpop.f32.mrf.mxu0 }
  0xf0   : > { %v257_v12 = vpop.f32.mrf.mxu0 }
  0xf1   : > { %v354_v13 = vpack.c.bf16 %v257_v12, %v254_v10 }
  0xf2   : > { %v384_v14 = vpop.f32.mrf.mxu0 }
  0xf3   : > { %355 = vst [vmem:[%s145_s6] sm:$0xff] %v354_v13  }
  0xf4 PF: > { %s12_s9 = sadd.s32 1, %s410_s9  }
  0xf5   : > { %p9_p4 = scmp.ge.s32.totalorder %s12_s9, 4  }
  0xf7   :  { %11 = sbr.rel (!%p9_p4) target bundleno = 1 (0x1), region = 58 }

// kernel: _lambda_.29
= control target key start
LH: loop header
LB: loop body
LE: loop exit
PB: predicated region body
PF: predicated region fallthrough
CT: control target
= control target key end

     0   :  { %s1471_s12 = smov 0   ;;  %s1728_s0 = inlined_call_operand.vmem [shape: bf16[32,1152], index: 0, kind: input, shape index: {}]   ;;  %s1729_s1 = inlined_call_operand.vmem [shape: bf16[1152,128], index: 1, kind: input, shape index: {}]   ;;  %s1730_s2 = inlined_call_operand.vmem [shape: bf16[32,128], index: 2, kind: input, shape index: {}]   ;;  %s1731_s3 = inlined_call_operand.vmem [shape: bf16[32,128], index: 3, kind: output, shape index: {}]  }
   0x1 LB: > { %s1121_s13 = sadd.s32 4294967295, %s1447_s12   ;;  %p1125_p0 = scmp.ge.s32.totalorder %s1447_s12, 1  ;;  %s1447_s12 = sphi %s1471_s12, %s13_s12  }
   0x2   : > { %p150_p1 = scmp.lt.s32.totalorder %s1447_s12, 3 }
   0x4   : > { %p151_p2 = pnand %p1125_p0, %p150_p1 }
   0x5   : > { %s1126_s17 = sshll.u32 (!%p151_p2), %s1121_s13, 1 }
   0x6   : > { %154 = sbr.rel (%p151_p2) target bundleno = 312 (0x138), region = 32  ;;  %p181_p3 = scmp.lt.s32.totalorder (!%p151_p2), %s1126_s17, 3 }
   0xb   : > { %v1356_v0 = vld [vmem:[%s1729_s1 + $0x78] sm:$0xff]   ;;  %v1360_v4 = vld [vmem:[%s1729_s1 + $0x70] sm:$0xff]   ;;  %v1364_v8 = vld [vmem:[%s1729_s1 + $0x68] sm:$0xff]   ;;  %s1733_s17 = smov (!%p181_p3, %s1126_s17), 3  ;;  %vm1450_vm0 = vmmov 0  }
   0xc   : > { %v1357_v1 = vld [vmem:[%s1729_s1 + $0x38] sm:$0xff]   ;;  %1228 = vmatprep.subr.bf16.mxu0 %v1356_v0  ;;  %v1361_v5 = vld [vmem:[%s1729_s1 + $0x30] sm:$0xff]   ;;  %v1365_v9 = vld [vmem:[%s1729_s1 + $0x28] sm:$0xff]   ;;  %s1345_s14 = smul.u32 36, %s1733_s17  ;;  %s1129_s15 = sshll.u32 %s1733_s17, 2 }
   0xd   : > { %v1358_v2 = vld [vmem:[%s1729_s1 + $0xf8] sm:$0xff]   ;;  %1229 = vmatpush3.bf16.msra.mxu0 %v1357_v1  ;;  %v1362_v6 = vld [vmem:[%s1729_s1 + $0xf0] sm:$0xff]   ;;  %v1366_v10 = vld [vmem:[%s1729_s1 + $0xe8] sm:$0xff]   ;;  %s191_s19 = scalar_lea.vmem %s1730_s2, %s1129_s15  ;;  %s197_s21 = scalar_lea.vmem %s1731_s3, %s1129_s15 }
   0xe   : > { %v1359_v3 = vld [vmem:[%s1729_s1 + $0xb8] sm:$0xff]   ;;  %1250 = vmatprep.subr.bf16.mxu1 %v1358_v2  ;;  %1230 = vmatprep.subr.bf16.mxu0 %v1360_v4  ;;  %v1363_v7 = vld [vmem:[%s1729_s1 + $0xb0] sm:$0xff]   ;;  %v1367_v11 = vld [vmem:[%s1729_s1 + $0xa8] sm:$0xff]   ;;  %s1574_s13 = scalar_lea.vmem %s1728_s0, %s1345_s14 }
   0xf   : > { %1251 = vmatpush3.bf16.msra.mxu1 %v1359_v3  ;;  %v1368_v12 = vld [vmem:[%s1729_s1 + $0x60] sm:$0xff]   ;;  %v1372_v16 = vld [vmem:[%s1729_s1 + $0x58] sm:$0xff]   ;;  %v1376_v20 = vld [vmem:[%s1729_s1 + $0x50] sm:$0xff]  }
  0x10   : > { %1252 = vmatprep.subr.bf16.mxu1 %v1362_v6  ;;  %v1369_v13 = vld [vmem:[%s1729_s1 + $0x20] sm:$0xff]   ;;  %v1373_v17 = vld [vmem:[%s1729_s1 + $0x18] sm:$0xff]   ;;  %v1377_v21 = vld [vmem:[%s1729_s1 + $0x10] sm:$0xff]   ;;  %v1449_v6 = vmov 0.0  }
  0x11   : > { %1231 = vmatpush3.bf16.msra.mxu0 %v1361_v5  ;;  %v1370_v14 = vld [vmem:[%s1729_s1 + $0xe0] sm:$0xff]   ;;  %v1374_v18 = vld [vmem:[%s1729_s1 + $0xd8] sm:$0xff]   ;;  %v1378_v22 = vld [vmem:[%s1729_s1 + $0xd0] sm:$0xff]  }
  0x12   : > { %1232 = vmatprep.subr.bf16.mxu0 %v1364_v8  ;;  %v1371_v15 = vld [vmem:[%s1729_s1 + $0xa0] sm:$0xff]   ;;  %v1375_v19 = vld [vmem:[%s1729_s1 + $0x98] sm:$0xff]   ;;  %v1379_v23 = vld [vmem:[%s1729_s1 + $0x90] sm:$0xff]  }
  0x13   : > { %1253 = vmatpush3.bf16.msra.mxu1 %v1363_v7  ;;  %v1380_v24 = vld [vmem:[%s1729_s1 + $0x48] sm:$0xff]   ;;  %v1384_v28 = vld [vmem:[%s1729_s1 + $0x40] sm:$0xff]   ;;  %v1391_v34 = vld [vmem:[%s1729_s1 + $0x178] sm:$0xff]  }
  0x14   : > { %1254 = vmatprep.subr.bf16.mxu1 %v1366_v10  ;;  %v1381_v25 = vld [vmem:[%s1729_s1 + $0x8] sm:$0xff]   ;;  %v1385_v29 = vld [vmem:[%s1729_s1] sm:$0xff]   ;;  %v1395_v37 = vld [vmem:[%s1729_s1 + $0x138] sm:$0xff]  }
  0x15   : > { %1233 = vmatpush3.bf16.msra.mxu0 %v1365_v9  ;;  %v1382_v26 = vld [vmem:[%s1729_s1 + $0xc8] sm:$0xff]   ;;  %v1386_v30 = vld [vmem:[%s1729_s1 + $0xc0] sm:$0xff]   ;;  %v1396_v38 = vld [vmem:[%s1729_s1 + $0x1f8] sm:$0xff]  }
  0x16   : > { %1234 = vmatprep.subr.bf16.mxu0 %v1368_v12  ;;  %v1383_v27 = vld [vmem:[%s1729_s1 + $0x88] sm:$0xff]   ;;  %v1387_v31 = vld [vmem:[%s1574_s13] ss:$36 sps:$4 sm:$0xff]   ;;  %v1397_v39 = vld [vmem:[%s1729_s1 + $0x1b8] sm:$0xff]  }
  0x17   : > { %1255 = vmatpush3.bf16.msra.mxu1 %v1367_v11  ;;  %v1389_v32 = vld [vmem:[%s1574_s13 + $0x4] ss:$36 sps:$4 sm:$0xff]   ;;  %v1394_v36 = vld [vmem:[%s1574_s13 + $0xc] ss:$36 sps:$4 sm:$0xff]   ;;  %v1410_v52 = vld [vmem:[%s1729_s1 + $0x158] sm:$0xff]  }
  0x18   : > { %1256 = vmatprep.subr.bf16.mxu1 %v1370_v14  ;;  %v1390_v33 = vld [vmem:[%s1729_s1 + $0x80] sm:$0xff]   ;;  %868 = vmatprep.mubr.bf16.mxu0 %v1389_v32  ;;  %v1392_v35 = vld [vmem:[%s1574_s13 + $0x8] ss:$36 sps:$4 sm:$0xff]   ;;  %v1398_v40 = vld [vmem:[%s1729_s1 + $0x170] sm:$0xff]  }
  0x19   : > { %1235 = vmatpush3.bf16.msra.mxu0 %v1369_v13  ;;  %909 = vmatprep.mubr.bf16.mxu1 %v1394_v36  ;;  %v1399_v41 = vld [vmem:[%s1729_s1 + $0x130] sm:$0xff]   ;;  %v1402_v44 = vld [vmem:[%s1729_s1 + $0x168] sm:$0xff]   ;;  %v1406_v48 = vld [vmem:[%s1729_s1 + $0x160] sm:$0xff]  }
  0x1a   : > { %1236 = vmatprep.subr.bf16.mxu0 %v1372_v16  ;;  %v1400_v42 = vld [vmem:[%s1729_s1 + $0x1f0] sm:$0xff]   ;;  %v1403_v45 = vld [vmem:[%s1729_s1 + $0x128] sm:$0xff]   ;;  %v1407_v49 = vld [vmem:[%s1729_s1 + $0x120] sm:$0xff]  }
  0x1b   : > { %1257 = vmatpush3.bf16.msra.mxu1 %v1371_v15  ;;  %v1401_v43 = vld [vmem:[%s1729_s1 + $0x1b0] sm:$0xff]   ;;  %v1404_v46 = vld [vmem:[%s1729_s1 + $0x1e8] sm:$0xff]   ;;  %v1408_v50 = vld [vmem:[%s1729_s1 + $0x1e0] sm:$0xff]  }
  0x1c   : > { %1258 = vmatprep.subr.bf16.mxu1 %v1374_v18  ;;  %v1405_v47 = vld [vmem:[%s1729_s1 + $0x1a8] sm:$0xff]   ;;  %v1409_v51 = vld [vmem:[%s1729_s1 + $0x1a0] sm:$0xff]   ;;  %v1411_v53 = vld [vmem:[%s1729_s1 + $0x118] sm:$0xff]  }
  0x1d   : > { %1237 = vmatpush3.bf16.msra.mxu0 %v1373_v17  ;;  %v1412_v54 = vld [vmem:[%s1729_s1 + $0x1d8] sm:$0xff]   ;;  %v1414_v56 = vld [vmem:[%s1729_s1 + $0x150] sm:$0xff]   ;;  %v1418_v60 = vld [vmem:[%s1729_s1 + $0x148] sm:$0xff]  }
  0x1e   : > { %1238 = vmatprep.subr.bf16.mxu0 %v1376_v20  ;;  %v1413_v55 = vld [vmem:[%s1729_s1 + $0x198] sm:$0xff]   ;;  %v1415_v57 = vld [vmem:[%s1729_s1 + $0x110] sm:$0xff]   ;;  %v1419_v61 = vld [vmem:[%s1729_s1 + $0x108] sm:$0xff]  }
  0x1f   : > { %1259 = vmatpush3.bf16.msra.mxu1 %v1375_v19  ;;  %v1416_v58 = vld [vmem:[%s1729_s1 + $0x1d0] sm:$0xff]   ;;  %v1420_v62 = vld [vmem:[%s1729_s1 + $0x1c8] sm:$0xff]   ;;  %v1422_v0 = vld [vmem:[%s1729_s1 + $0x140] sm:$0xff]  }
  0x20   : > { %1260 = vmatprep.subr.bf16.mxu1 %v1378_v22  ;;  %v1417_v59 = vld [vmem:[%s1729_s1 + $0x190] sm:$0xff]   ;;  %v1421_v63 = vld [vmem:[%s1729_s1 + $0x188] sm:$0xff]   ;;  %v1423_v1 = vld [vmem:[%s1729_s1 + $0x100] sm:$0xff]  }
  0x21   : > { %1239 = vmatpush3.bf16.msra.mxu0 %v1377_v21  ;;  %v1424_v2 = vld [vmem:[%s1729_s1 + $0x1c0] sm:$0xff]   ;;  %v1425_v3 = vld [vmem:[%s1574_s13 + $0x10] ss:$36 sps:$4 sm:$0xff]   ;;  %v1429_v7 = vld [vmem:[%s1574_s13 + $0x18] ss:$36 sps:$4 sm:$0xff]  }
  0x22   : > { %1240 = vmatprep.subr.bf16.mxu0 %v1380_v24  ;;  %v1427_v4 = vld [vmem:[%s1574_s13 + $0x14] ss:$36 sps:$4 sm:$0xff]   ;;  %v1428_v5 = vld [vmem:[%s1729_s1 + $0x180] sm:$0xff]   ;;  %v1434_v11 = vld [vmem:[%s1729_s1 + $0x228] sm:$0xff]  }
  0x23   : > { %1261 = vmatpush3.bf16.msra.mxu1 %v1379_v23  ;;  %v1431_v8 = vld [vmem:[%s1574_s13 + $0x1c] ss:$36 sps:$4 sm:$0xff]   ;;  %v1433_v10 = vld [vmem:[%s1729_s1 + $0x230] sm:$0xff]   ;;  %v1438_v15 = vld [vmem:[%s1729_s1 + $0x208] sm:$0xff]  }
  0x24   : > { %1262 = vmatprep.subr.bf16.mxu1 %v1382_v26  ;;  %v1432_v9 = vld [vmem:[%s1729_s1 + $0x238] sm:$0xff]   ;;  %v1435_v12 = vld [vmem:[%s1729_s1 + $0x220] sm:$0xff]   ;;  %v1437_v14 = vld [vmem:[%s1729_s1 + $0x210] sm:$0xff]  }
  0x25   : > { %1241 = vmatpush3.bf16.msra.mxu0 %v1381_v25  ;;  %v1436_v13 = vld [vmem:[%s1729_s1 + $0x218] sm:$0xff]   ;;  %v1439_v16 = vld [vmem:[%s1729_s1 + $0x200] sm:$0xff]  }
  0x26   : > { %1242 = vmatprep.subr.bf16.mxu0 %v1384_v28  ;;  %v1440_v17 = vld [vmem:[%s1574_s13 + $0x20] ss:$36 sps:$4 sm:$0xff]  }
  0x27   : > { %1263 = vmatpush3.bf16.msra.mxu1 %v1383_v27  ;;  %v1220_v27 = vld [vmem:[%s191_s19] sm:$0xff]  }
  0x28   : > { %1264 = vmatprep.subr.bf16.mxu1 %v1386_v30  ;;  %v1221_v30 = vunpack.c.l.bf16 %v1220_v27 }
  0x29   : > { %1243 = vmatpush3.bf16.msra.mxu0 %v1385_v29 }
  0x2a   : > { %1272 = vmatprep.subr.bf16.mxu0 %v1391_v34  ;;  %v1222_v34 = vunpack.c.h.bf16 %v1220_v27 }
  0x2b   : > { %1265 = vmatpush3.bf16.msra.mxu1 %v1390_v33 }
  0x2c   : > { %869 = vmatmul.mubr.bf16.vlgmr.msra.gmra.mxu0 %v1387_v31  ;;  %1294 = vmatprep.subr.bf16.mxu1 %v1396_v38 }
  0x2d   : > { %1273 = vmatpush3.bf16.msra.mxu0 %v1395_v37  ;;  %950 = vmatprep.mubr.bf16.mxu0 %v1427_v4 }
  0x2e   : > { %910 = vmatmul.mubr.bf16.vlgmr.msra.gmra.mxu1 %v1392_v35  ;;  %1274 = vmatprep.subr.bf16.mxu0 %v1398_v40 }
  0x2f   : > { %1295 = vmatpush3.bf16.msra.mxu1 %v1397_v39  ;;  %991 = vmatprep.mubr.bf16.mxu1 %v1431_v8 }
  0x30   : > { %1296 = vmatprep.subr.bf16.mxu1 %v1400_v42 }
  0x31   : > { %1275 = vmatpush3.bf16.msra.mxu0 %v1399_v41 }
  0x32   : > { %1276 = vmatprep.subr.bf16.mxu0 %v1402_v44 }
  0x33   : > { %1297 = vmatpush3.bf16.msra.mxu1 %v1401_v43 }
  0x34   : > { %1298 = vmatprep.subr.bf16.mxu1 %v1404_v46 }
  0x35   : > { %1277 = vmatpush3.bf16.msra.mxu0 %v1403_v45 }
  0x36   : > { %1278 = vmatprep.subr.bf16.mxu0 %v1406_v48 }
  0x37   : > { %1299 = vmatpush3.bf16.msra.mxu1 %v1405_v47 }
  0x38   : > { %1300 = vmatprep.subr.bf16.mxu1 %v1408_v50 }
  0x39   : > { %1279 = vmatpush3.bf16.msra.mxu0 %v1407_v49 }
  0x3a   : > { %1280 = vmatprep.subr.bf16.mxu0 %v1410_v52 }
  0x3b   : > { %1301 = vmatpush3.bf16.msra.mxu1 %v1409_v51 }
  0x3c   : > { %1302 = vmatprep.subr.bf16.mxu1 %v1412_v54 }
  0x3d   : > { %1281 = vmatpush3.bf16.msra.mxu0 %v1411_v53 }
  0x3e   : > { %1282 = vmatprep.subr.bf16.mxu0 %v1414_v56 }
  0x3f   : > { %1303 = vmatpush3.bf16.msra.mxu1 %v1413_v55 }
  0x40   : > { %1304 = vmatprep.subr.bf16.mxu1 %v1416_v58 }
  0x41   : > { %1283 = vmatpush3.bf16.msra.mxu0 %v1415_v57 }
  0x42   : > { %1284 = vmatprep.subr.bf16.mxu0 %v1418_v60 }
  0x43   : > { %1305 = vmatpush3.bf16.msra.mxu1 %v1417_v59 }
  0x44   : > { %1306 = vmatprep.subr.bf16.mxu1 %v1420_v62 }
  0x45   : > { %1285 = vmatpush3.bf16.msra.mxu0 %v1419_v61 }
  0x46   : > { %1286 = vmatprep.subr.bf16.mxu0 %v1422_v0 }
  0x47   : > { %1307 = vmatpush3.bf16.msra.mxu1 %v1421_v63 }
  0x48   : > { %1308 = vmatprep.subr.bf16.mxu1 %v1424_v2 }
  0x49   : > { %1287 = vmatpush3.bf16.msra.mxu0 %v1423_v1 }
  0x4a   : > { %1325 = vmatprep.subr.bf16.mxu0 %v1449_v6 }
  0x4b   : > { %1309 = vmatpush3.bf16.msra.mxu1 %v1428_v5 }
  0x4c   : > { %951 = vmatmul.mubr.bf16.vlgmr.msra.gmra.mxu0 %v1425_v3 }
  0x4d   : > { %1341 = vmatprep.mubr.msk.bf16.mxu0 %vm1450_vm0, %v1449_v6  ;;  %1326 = vmatpush3.bf16.msra.mxu0 %v1432_v9 }
  0x4e   : > { %992 = vmatmul.mubr.bf16.vlgmr.msra.gmra.mxu1 %v1429_v7  ;;  %1327 = vmatprep.subr.bf16.mxu0 %v1449_v6 }
  0x51   : > { %1328 = vmatpush3.bf16.msra.mxu0 %v1433_v10 }
  0x52   : > { %1329 = vmatprep.subr.bf16.mxu0 %v1449_v6 }
  0x55   : > { %1330 = vmatpush3.bf16.msra.mxu0 %v1434_v11 }
  0x56   : > { %1331 = vmatprep.subr.bf16.mxu0 %v1449_v6 }
  0x59   : > { %1332 = vmatpush3.bf16.msra.mxu0 %v1435_v12 }
  0x5a   : > { %1333 = vmatprep.subr.bf16.mxu0 %v1449_v6 }
  0x5d   : > { %1334 = vmatpush3.bf16.msra.mxu0 %v1436_v13 }
  0x5e   : > { %1335 = vmatprep.subr.bf16.mxu0 %v1449_v6 }
  0x61   : > { %1336 = vmatpush3.bf16.msra.mxu0 %v1437_v14 }
  0x62   : > { %1337 = vmatprep.subr.bf16.mxu0 %v1449_v6 }
  0x65   : > { %1338 = vmatpush3.bf16.msra.mxu0 %v1438_v15 }
  0x66   : > { %1339 = vmatprep.subr.bf16.mxu0 %v1449_v6 }
  0x69   : > { %1340 = vmatpush3.bf16.msra.mxu0 %v1439_v16 }
  0x6c   : > { %1342 = vmatmul.mubr.bf16.vlgmr.msra.gmra.mxu0 %v1440_v17 }
  0xec   : > { %v1244_v18 = vpop.f32.mrf.mxu0 }
  0xee   : > { %v1245_v19 = vpop.f32.mrf.mxu0  ;;  %v1266_v20 = vpop.f32.mrf.mxu1 }
  0xef   : > { %v1246_v31 = vadd.f32 %v1245_v19, %v1244_v18 }
  0xf0   : > { %v1247_v21 = vpop.f32.mrf.mxu0  ;;  %v1267_v22 = vpop.f32.mrf.mxu1 }
  0xf1   : > { %v871_v36 = vadd.f32 %v1246_v31, %v1221_v30  ;;  %v1268_v37 = vadd.f32 %v1267_v22, %v1266_v20 }
  0xf2   : > { %v1248_v23 = vpop.f32.mrf.mxu0  ;;  %v1269_v24 = vpop.f32.mrf.mxu1 }
  0xf3   : > { %v1249_v35 = vadd.f32 %v1248_v23, %v1247_v21  ;;  %v912_v43 = vadd.f32 %v1268_v37, %v871_v36 }
  0xf4   : > { %v1270_v26 = vpop.f32.mrf.mxu1 }
  0xf5   : > { %v874_v40 = vadd.f32 %v1249_v35, %v1222_v34  ;;  %v1271_v41 = vadd.f32 %v1270_v26, %v1269_v24 }
  0xf7   : > { %v915_v46 = vadd.f32 %v1271_v41, %v874_v40 }
 0x10c   : > { %v1288_v25 = vpop.f32.mrf.mxu0 }
 0x10e   : > { %v1289_v28 = vpop.f32.mrf.mxu0  ;;  %v1310_v29 = vpop.f32.mrf.mxu1 }
 0x10f   : > { %v1290_v42 = vadd.f32 %v1289_v28, %v1288_v25 }
 0x110   : > { %v1291_v32 = vpop.f32.mrf.mxu0  ;;  %v1311_v33 = vpop.f32.mrf.mxu1 }
 0x111   : > { %v953_v47 = vadd.f32 %v1290_v42, %v912_v43  ;;  %v1312_v48 = vadd.f32 %v1311_v33, %v1310_v29 }
 0x112   : > { %v1292_v38 = vpop.f32.mrf.mxu0  ;;  %v1313_v39 = vpop.f32.mrf.mxu1 }
 0x113   : > { %v1293_v44 = vadd.f32 %v1292_v38, %v1291_v32  ;;  %v994_v52 = vadd.f32 %v1312_v48, %v953_v47 }
 0x114   : > { %v1314_v45 = vpop.f32.mrf.mxu1 }
 0x115   : > { %v956_v49 = vadd.f32 %v1293_v44, %v915_v46  ;;  %v1315_v50 = vadd.f32 %v1314_v45, %v1313_v39 }
 0x117   : > { %v997_v55 = vadd.f32 %v1315_v50, %v956_v49 }
 0x12c   : > { %v1034_v51 = vpop.f32.mrf.mxu0 }
 0x12d   : > { %v1035_v54 = vadd.f32 %v1034_v51, %v994_v52 }
 0x12e   : > { %v1343_v53 = vpop.f32.mrf.mxu0 }
 0x12f   : > { %v1041_v59 = vmax.f32 %v1035_v54, 0.0 }
 0x130   : > { %v1037_v56 = vpop.f32.mrf.mxu0 }
 0x131   : > { %v1038_v57 = vadd.f32 %v1037_v56, %v997_v55 }
 0x132   : > { %v1344_v58 = vpop.f32.mrf.mxu0 }
 0x133   : > { %v1042_v60 = vmax.f32 %v1038_v57, 0.0 }
 0x135   : > { %v1226_v61 = vpack.c.bf16 %v1042_v60, %v1041_v59 }
 0x137   : > { %1227 = vst [vmem:[%s197_s21] sm:$0xff] %v1226_v61  }
 0x138 PF: > { %s13_s12 = sadd.s32 1, %s1447_s12  }
 0x139   : > { %p10_p4 = scmp.ge.s32.totalorder %s13_s12, 4  }
 0x13b   :  { %12 = sbr.rel (!%p10_p4) target bundleno = 1 (0x1), region = 65 }

// kernel: _lambda_.30
= control target key start
LH: loop header
LB: loop body
LE: loop exit
PB: predicated region body
PF: predicated region fallthrough
CT: control target
= control target key end

     0   :  { %v197_v0 = vmov 0.0   ;;  %vm198_vm0 = vmmov 0   ;;  %s244_s1 = inlined_call_operand.vmem [shape: bf16[128,128], index: 1, kind: input, shape index: {}]   ;;  %s245_s0 = inlined_call_operand.vmem [shape: bf16[16,128], index: 0, kind: input, shape index: {}]   ;;  %s246_s2 = inlined_call_operand.vmem [shape: bf16[16,128], index: 2, kind: output, shape index: {}]  }
   0x1   :  { %166 = vmatprep.subr.bf16.mxu0 %v197_v0  ;;  %v188_v1 = vld [vmem:[%s244_s1 + $0x38] sm:$0xff]   ;;  %182 = vmatprep.mubr.msk.bf16.mxu0 %vm198_vm0, %v197_v0  ;;  %v189_v2 = vld [vmem:[%s244_s1 + $0x30] sm:$0xff]   ;;  %v190_v3 = vld [vmem:[%s244_s1 + $0x28] sm:$0xff]  }
   0x2   :  { %167 = vmatpush3.bf16.msra.mxu0 %v188_v1  ;;  %v191_v4 = vld [vmem:[%s244_s1 + $0x20] sm:$0xff]   ;;  %v192_v5 = vld [vmem:[%s244_s1 + $0x18] sm:$0xff]   ;;  %v193_v6 = vld [vmem:[%s244_s1 + $0x10] sm:$0xff]  }
   0x3   :  { %168 = vmatprep.subr.bf16.mxu0 %v197_v0  ;;  %v194_v7 = vld [vmem:[%s244_s1 + $0x8] sm:$0xff]   ;;  %v195_v8 = vld [vmem:[%s244_s1] sm:$0xff]  }
   0x4   :  { %v196_v9 = vld [vmem:[%s245_s0] sm:$0xff]  }
   0x6   :  { %169 = vmatpush3.bf16.msra.mxu0 %v189_v2 }
   0x7   :  { %170 = vmatprep.subr.bf16.mxu0 %v197_v0 }
   0xa   :  { %171 = vmatpush3.bf16.msra.mxu0 %v190_v3 }
   0xb   :  { %172 = vmatprep.subr.bf16.mxu0 %v197_v0 }
   0xe   :  { %173 = vmatpush3.bf16.msra.mxu0 %v191_v4 }
   0xf   :  { %174 = vmatprep.subr.bf16.mxu0 %v197_v0 }
  0x12   :  { %175 = vmatpush3.bf16.msra.mxu0 %v192_v5 }
  0x13   :  { %176 = vmatprep.subr.bf16.mxu0 %v197_v0 }
  0x16   :  { %177 = vmatpush3.bf16.msra.mxu0 %v193_v6 }
  0x17   :  { %178 = vmatprep.subr.bf16.mxu0 %v197_v0 }
  0x1a   :  { %179 = vmatpush3.bf16.msra.mxu0 %v194_v7 }
  0x1b   :  { %180 = vmatprep.subr.bf16.mxu0 %v197_v0 }
  0x1e   :  { %181 = vmatpush3.bf16.msra.mxu0 %v195_v8 }
  0x21   :  { %183 = vmatmul.mubr.bf16.vlgmr.msra.gmra.mxu0 %v196_v9 }
  0xe1   :  { %v118_v10 = vpop.f32.mrf.mxu0 }
  0xe3   :  { %v184_v11 = vpop.f32.mrf.mxu0 }
  0xe5   :  { %v121_v12 = vpop.f32.mrf.mxu0 }
  0xe6   :  { %v155_v13 = vpack.c.bf16 %v121_v12, %v118_v10 }
  0xe7   :  { %v185_v14 = vpop.f32.mrf.mxu0 }
  0xe8   :  { %156 = vst [vmem:[%s246_s2] sm:$0xff] %v155_v13  }

// kernel: _lambda_.31
= control target key start
LH: loop header
LB: loop body
LE: loop exit
PB: predicated region body
PF: predicated region fallthrough
CT: control target
= control target key end

     0   :  { %vm1160_vm0 = vmmov 0   ;;  %s1422_s1 = inlined_call_operand.vmem [shape: bf16[1152,128], index: 1, kind: input, shape index: {}]   ;;  %s1423_s0 = inlined_call_operand.vmem [shape: bf16[16,1152], index: 0, kind: input, shape index: {}]   ;;  %s1424_s2 = inlined_call_operand.vmem [shape: bf16[16,128], index: 2, kind: output, shape index: {}]  }
   0x1   :  { %v1074_v0 = vld [vmem:[%s1422_s1 + $0x78] sm:$0xff]   ;;  %v1078_v4 = vld [vmem:[%s1422_s1 + $0x70] sm:$0xff]   ;;  %v1082_v8 = vld [vmem:[%s1422_s1 + $0x68] sm:$0xff]  }
   0x2   :  { %v1075_v1 = vld [vmem:[%s1422_s1 + $0xf8] sm:$0xff]   ;;  %955 = vmatprep.subr.bf16.mxu0 %v1074_v0  ;;  %v1079_v5 = vld [vmem:[%s1422_s1 + $0xf0] sm:$0xff]   ;;  %v1083_v9 = vld [vmem:[%s1422_s1 + $0xe8] sm:$0xff]  }
   0x3   :  { %v1076_v2 = vld [vmem:[%s1422_s1 + $0x38] sm:$0xff]   ;;  %977 = vmatprep.subr.bf16.mxu1 %v1075_v1  ;;  %v1080_v6 = vld [vmem:[%s1422_s1 + $0x30] sm:$0xff]   ;;  %v1084_v10 = vld [vmem:[%s1422_s1 + $0x28] sm:$0xff]  }
   0x4   :  { %v1077_v3 = vld [vmem:[%s1422_s1 + $0xb8] sm:$0xff]   ;;  %956 = vmatpush3.bf16.msra.mxu0 %v1076_v2  ;;  %v1081_v7 = vld [vmem:[%s1422_s1 + $0xb0] sm:$0xff]   ;;  %v1085_v11 = vld [vmem:[%s1422_s1 + $0xa8] sm:$0xff]  }
   0x5   :  { %978 = vmatpush3.bf16.msra.mxu1 %v1077_v3  ;;  %957 = vmatprep.subr.bf16.mxu0 %v1078_v4  ;;  %v1086_v12 = vld [vmem:[%s1422_s1 + $0x60] sm:$0xff]   ;;  %v1090_v16 = vld [vmem:[%s1422_s1 + $0x58] sm:$0xff]   ;;  %v1094_v20 = vld [vmem:[%s1422_s1 + $0x50] sm:$0xff]  }
   0x6   :  { %979 = vmatprep.subr.bf16.mxu1 %v1079_v5  ;;  %v1087_v13 = vld [vmem:[%s1422_s1 + $0xe0] sm:$0xff]   ;;  %v1091_v17 = vld [vmem:[%s1422_s1 + $0xd8] sm:$0xff]   ;;  %v1095_v21 = vld [vmem:[%s1422_s1 + $0xd0] sm:$0xff]  }
   0x7   :  { %v1088_v14 = vld [vmem:[%s1422_s1 + $0x20] sm:$0xff]   ;;  %v1092_v18 = vld [vmem:[%s1422_s1 + $0x18] sm:$0xff]   ;;  %v1096_v22 = vld [vmem:[%s1422_s1 + $0x10] sm:$0xff]  }
   0x8   :  { %958 = vmatpush3.bf16.msra.mxu0 %v1080_v6  ;;  %v1089_v15 = vld [vmem:[%s1422_s1 + $0xa0] sm:$0xff]   ;;  %v1093_v19 = vld [vmem:[%s1422_s1 + $0x98] sm:$0xff]   ;;  %v1097_v23 = vld [vmem:[%s1422_s1 + $0x90] sm:$0xff]   ;;  %v1159_v6 = vmov 0.0  }
   0x9   :  { %980 = vmatpush3.bf16.msra.mxu1 %v1081_v7  ;;  %959 = vmatprep.subr.bf16.mxu0 %v1082_v8  ;;  %v1098_v24 = vld [vmem:[%s1422_s1 + $0x48] sm:$0xff]   ;;  %v1102_v28 = vld [vmem:[%s1422_s1 + $0x40] sm:$0xff]   ;;  %v1112_v36 = vld [vmem:[%s1422_s1 + $0x178] sm:$0xff]  }
   0xa   :  { %981 = vmatprep.subr.bf16.mxu1 %v1083_v9  ;;  %v1099_v25 = vld [vmem:[%s1422_s1 + $0xc8] sm:$0xff]   ;;  %v1103_v29 = vld [vmem:[%s1422_s1 + $0xc0] sm:$0xff]   ;;  %v1113_v37 = vld [vmem:[%s1422_s1 + $0x138] sm:$0xff]  }
   0xb   :  { %v1100_v26 = vld [vmem:[%s1422_s1 + $0x8] sm:$0xff]   ;;  %v1104_v30 = vld [vmem:[%s1422_s1] sm:$0xff]   ;;  %v1114_v38 = vld [vmem:[%s1422_s1 + $0x1f8] sm:$0xff]  }
   0xc   :  { %960 = vmatpush3.bf16.msra.mxu0 %v1084_v10  ;;  %v1101_v27 = vld [vmem:[%s1422_s1 + $0x88] sm:$0xff]   ;;  %v1105_v31 = vld [vmem:[%s1422_s1 + $0x80] sm:$0xff]   ;;  %v1115_v39 = vld [vmem:[%s1422_s1 + $0x1b8] sm:$0xff]  }
   0xd   :  { %982 = vmatpush3.bf16.msra.mxu1 %v1085_v11  ;;  %961 = vmatprep.subr.bf16.mxu0 %v1086_v12  ;;  %v1106_v32 = vld [vmem:[%s1423_s0] ss:$36 sps:$4 sm:$0xff]   ;;  %v1109_v34 = vld [vmem:[%s1423_s0 + $0x8] ss:$36 sps:$4 sm:$0xff]   ;;  %v1116_v40 = vld [vmem:[%s1422_s1 + $0x170] sm:$0xff]  }
   0xe   :  { %983 = vmatprep.subr.bf16.mxu1 %v1087_v13  ;;  %v1108_v33 = vld [vmem:[%s1423_s0 + $0x4] ss:$36 sps:$4 sm:$0xff]   ;;  %v1111_v35 = vld [vmem:[%s1423_s0 + $0xc] ss:$36 sps:$4 sm:$0xff]   ;;  %v1128_v52 = vld [vmem:[%s1422_s1 + $0x158] sm:$0xff]  }
   0xf   :  { %676 = vmatprep.mubr.bf16.mxu0 %v1108_v33  ;;  %717 = vmatprep.mubr.bf16.mxu1 %v1111_v35  ;;  %v1117_v41 = vld [vmem:[%s1422_s1 + $0x130] sm:$0xff]   ;;  %v1120_v44 = vld [vmem:[%s1422_s1 + $0x168] sm:$0xff]   ;;  %v1124_v48 = vld [vmem:[%s1422_s1 + $0x160] sm:$0xff]  }
  0x10   :  { %962 = vmatpush3.bf16.msra.mxu0 %v1088_v14  ;;  %v1118_v42 = vld [vmem:[%s1422_s1 + $0x1f0] sm:$0xff]   ;;  %v1121_v45 = vld [vmem:[%s1422_s1 + $0x128] sm:$0xff]   ;;  %v1125_v49 = vld [vmem:[%s1422_s1 + $0x120] sm:$0xff]  }
  0x11   :  { %984 = vmatpush3.bf16.msra.mxu1 %v1089_v15  ;;  %963 = vmatprep.subr.bf16.mxu0 %v1090_v16  ;;  %v1119_v43 = vld [vmem:[%s1422_s1 + $0x1b0] sm:$0xff]   ;;  %v1122_v46 = vld [vmem:[%s1422_s1 + $0x1e8] sm:$0xff]   ;;  %v1126_v50 = vld [vmem:[%s1422_s1 + $0x1e0] sm:$0xff]  }
  0x12   :  { %985 = vmatprep.subr.bf16.mxu1 %v1091_v17  ;;  %v1123_v47 = vld [vmem:[%s1422_s1 + $0x1a8] sm:$0xff]   ;;  %v1127_v51 = vld [vmem:[%s1422_s1 + $0x1a0] sm:$0xff]   ;;  %v1129_v53 = vld [vmem:[%s1422_s1 + $0x118] sm:$0xff]  }
  0x13   :  { %v1130_v54 = vld [vmem:[%s1422_s1 + $0x1d8] sm:$0xff]   ;;  %v1132_v56 = vld [vmem:[%s1422_s1 + $0x150] sm:$0xff]   ;;  %v1136_v60 = vld [vmem:[%s1422_s1 + $0x148] sm:$0xff]  }
  0x14   :  { %964 = vmatpush3.bf16.msra.mxu0 %v1092_v18  ;;  %v1131_v55 = vld [vmem:[%s1422_s1 + $0x198] sm:$0xff]   ;;  %v1133_v57 = vld [vmem:[%s1422_s1 + $0x110] sm:$0xff]   ;;  %v1137_v61 = vld [vmem:[%s1422_s1 + $0x108] sm:$0xff]  }
  0x15   :  { %986 = vmatpush3.bf16.msra.mxu1 %v1093_v19  ;;  %965 = vmatprep.subr.bf16.mxu0 %v1094_v20  ;;  %v1134_v58 = vld [vmem:[%s1422_s1 + $0x1d0] sm:$0xff]   ;;  %v1138_v62 = vld [vmem:[%s1422_s1 + $0x1c8] sm:$0xff]   ;;  %v1140_v0 = vld [vmem:[%s1422_s1 + $0x140] sm:$0xff]  }
  0x16   :  { %987 = vmatprep.subr.bf16.mxu1 %v1095_v21  ;;  %v1135_v59 = vld [vmem:[%s1422_s1 + $0x190] sm:$0xff]   ;;  %v1139_v63 = vld [vmem:[%s1422_s1 + $0x188] sm:$0xff]   ;;  %v1141_v1 = vld [vmem:[%s1422_s1 + $0x100] sm:$0xff]  }
  0x17   :  { %v1142_v2 = vld [vmem:[%s1422_s1 + $0x1c0] sm:$0xff]   ;;  %v1143_v3 = vld [vmem:[%s1423_s0 + $0x10] ss:$36 sps:$4 sm:$0xff]   ;;  %v1147_v7 = vld [vmem:[%s1423_s0 + $0x18] ss:$36 sps:$4 sm:$0xff]  }
  0x18   :  { %966 = vmatpush3.bf16.msra.mxu0 %v1096_v22  ;;  %v1145_v4 = vld [vmem:[%s1423_s0 + $0x14] ss:$36 sps:$4 sm:$0xff]   ;;  %v1146_v5 = vld [vmem:[%s1422_s1 + $0x180] sm:$0xff]   ;;  %v1152_v11 = vld [vmem:[%s1422_s1 + $0x228] sm:$0xff]  }
  0x19   :  { %988 = vmatpush3.bf16.msra.mxu1 %v1097_v23  ;;  %967 = vmatprep.subr.bf16.mxu0 %v1098_v24  ;;  %v1149_v8 = vld [vmem:[%s1423_s0 + $0x1c] ss:$36 sps:$4 sm:$0xff]   ;;  %v1151_v10 = vld [vmem:[%s1422_s1 + $0x230] sm:$0xff]   ;;  %v1156_v15 = vld [vmem:[%s1422_s1 + $0x208] sm:$0xff]  }
  0x1a   :  { %989 = vmatprep.subr.bf16.mxu1 %v1099_v25  ;;  %v1150_v9 = vld [vmem:[%s1422_s1 + $0x238] sm:$0xff]   ;;  %v1153_v12 = vld [vmem:[%s1422_s1 + $0x220] sm:$0xff]   ;;  %v1155_v14 = vld [vmem:[%s1422_s1 + $0x210] sm:$0xff]  }
  0x1b   :  { %v1154_v13 = vld [vmem:[%s1422_s1 + $0x218] sm:$0xff]   ;;  %v1157_v16 = vld [vmem:[%s1422_s1 + $0x200] sm:$0xff]  }
  0x1c   :  { %968 = vmatpush3.bf16.msra.mxu0 %v1100_v26  ;;  %v1158_v17 = vld [vmem:[%s1423_s0 + $0x20] ss:$36 sps:$4 sm:$0xff]  }
  0x1d   :  { %990 = vmatpush3.bf16.msra.mxu1 %v1101_v27  ;;  %969 = vmatprep.subr.bf16.mxu0 %v1102_v28 }
  0x1e   :  { %991 = vmatprep.subr.bf16.mxu1 %v1103_v29 }
  0x20   :  { %970 = vmatpush3.bf16.msra.mxu0 %v1104_v30 }
  0x21   :  { %992 = vmatpush3.bf16.msra.mxu1 %v1105_v31  ;;  %999 = vmatprep.subr.bf16.mxu0 %v1112_v36 }
  0x22   :  { %1021 = vmatprep.subr.bf16.mxu1 %v1114_v38 }
  0x23   :  { %677 = vmatmul.mubr.bf16.vlgmr.msra.gmra.mxu0 %v1106_v32 }
  0x24   :  { %718 = vmatmul.mubr.bf16.vlgmr.msra.gmra.mxu1 %v1109_v34  ;;  %1000 = vmatpush3.bf16.msra.mxu0 %v1113_v37 }
  0x25   :  { %1022 = vmatpush3.bf16.msra.mxu1 %v1115_v39  ;;  %1001 = vmatprep.subr.bf16.mxu0 %v1116_v40 }
  0x26   :  { %1023 = vmatprep.subr.bf16.mxu1 %v1118_v42  ;;  %758 = vmatprep.mubr.bf16.mxu0 %v1145_v4 }
  0x27   :  { %799 = vmatprep.mubr.bf16.mxu1 %v1149_v8 }
  0x28   :  { %1002 = vmatpush3.bf16.msra.mxu0 %v1117_v41 }
  0x29   :  { %1024 = vmatpush3.bf16.msra.mxu1 %v1119_v43  ;;  %1003 = vmatprep.subr.bf16.mxu0 %v1120_v44 }
  0x2a   :  { %1025 = vmatprep.subr.bf16.mxu1 %v1122_v46 }
  0x2c   :  { %1004 = vmatpush3.bf16.msra.mxu0 %v1121_v45 }
  0x2d   :  { %1026 = vmatpush3.bf16.msra.mxu1 %v1123_v47  ;;  %1005 = vmatprep.subr.bf16.mxu0 %v1124_v48 }
  0x2e   :  { %1027 = vmatprep.subr.bf16.mxu1 %v1126_v50 }
  0x30   :  { %1006 = vmatpush3.bf16.msra.mxu0 %v1125_v49 }
  0x31   :  { %1028 = vmatpush3.bf16.msra.mxu1 %v1127_v51  ;;  %1007 = vmatprep.subr.bf16.mxu0 %v1128_v52 }
  0x32   :  { %1029 = vmatprep.subr.bf16.mxu1 %v1130_v54 }
  0x34   :  { %1008 = vmatpush3.bf16.msra.mxu0 %v1129_v53 }
  0x35   :  { %1030 = vmatpush3.bf16.msra.mxu1 %v1131_v55  ;;  %1009 = vmatprep.subr.bf16.mxu0 %v1132_v56 }
  0x36   :  { %1031 = vmatprep.subr.bf16.mxu1 %v1134_v58 }
  0x38   :  { %1010 = vmatpush3.bf16.msra.mxu0 %v1133_v57 }
  0x39   :  { %1032 = vmatpush3.bf16.msra.mxu1 %v1135_v59  ;;  %1011 = vmatprep.subr.bf16.mxu0 %v1136_v60 }
  0x3a   :  { %1033 = vmatprep.subr.bf16.mxu1 %v1138_v62 }
  0x3c   :  { %1012 = vmatpush3.bf16.msra.mxu0 %v1137_v61 }
  0x3d   :  { %1034 = vmatpush3.bf16.msra.mxu1 %v1139_v63  ;;  %1013 = vmatprep.subr.bf16.mxu0 %v1140_v0 }
  0x3e   :  { %1035 = vmatprep.subr.bf16.mxu1 %v1142_v2 }
  0x40   :  { %1014 = vmatpush3.bf16.msra.mxu0 %v1141_v1 }
  0x41   :  { %1052 = vmatprep.subr.bf16.mxu0 %v1159_v6  ;;  %1036 = vmatpush3.bf16.msra.mxu1 %v1146_v5 }
  0x43   :  { %759 = vmatmul.mubr.bf16.vlgmr.msra.gmra.mxu0 %v1143_v3 }
  0x44   :  { %1068 = vmatprep.mubr.msk.bf16.mxu0 %vm1160_vm0, %v1159_v6  ;;  %1053 = vmatpush3.bf16.msra.mxu0 %v1150_v9 }
  0x45   :  { %800 = vmatmul.mubr.bf16.vlgmr.msra.gmra.mxu1 %v1147_v7  ;;  %1054 = vmatprep.subr.bf16.mxu0 %v1159_v6 }
  0x48   :  { %1055 = vmatpush3.bf16.msra.mxu0 %v1151_v10 }
  0x49   :  { %1056 = vmatprep.subr.bf16.mxu0 %v1159_v6 }
  0x4c   :  { %1057 = vmatpush3.bf16.msra.mxu0 %v1152_v11 }
  0x4d   :  { %1058 = vmatprep.subr.bf16.mxu0 %v1159_v6 }
  0x50   :  { %1059 = vmatpush3.bf16.msra.mxu0 %v1153_v12 }
  0x51   :  { %1060 = vmatprep.subr.bf16.mxu0 %v1159_v6 }
  0x54   :  { %1061 = vmatpush3.bf16.msra.mxu0 %v1154_v13 }
  0x55   :  { %1062 = vmatprep.subr.bf16.mxu0 %v1159_v6 }
  0x58   :  { %1063 = vmatpush3.bf16.msra.mxu0 %v1155_v14 }
  0x59   :  { %1064 = vmatprep.subr.bf16.mxu0 %v1159_v6 }
  0x5c   :  { %1065 = vmatpush3.bf16.msra.mxu0 %v1156_v15 }
  0x5d   :  { %1066 = vmatprep.subr.bf16.mxu0 %v1159_v6 }
  0x60   :  { %1067 = vmatpush3.bf16.msra.mxu0 %v1157_v16 }
  0x63   :  { %1069 = vmatmul.mubr.bf16.vlgmr.msra.gmra.mxu0 %v1158_v17 }
  0xe3   :  { %v971_v18 = vpop.f32.mrf.mxu0 }
  0xe4   :  { %v993_v19 = vpop.f32.mrf.mxu1 }
  0xe5   :  { %v972_v20 = vpop.f32.mrf.mxu0 }
  0xe6   :  { %v994_v21 = vpop.f32.mrf.mxu1  ;;  %v973_v31 = vadd.f32 %v972_v20, %v971_v18 }
  0xe7   :  { %v974_v22 = vpop.f32.mrf.mxu0  ;;  %v995_v32 = vadd.f32 %v994_v21, %v993_v19 }
  0xe8   :  { %v996_v23 = vpop.f32.mrf.mxu1 }
  0xe9   :  { %v975_v24 = vpop.f32.mrf.mxu0  ;;  %v720_v38 = vadd.f32 %v995_v32, %v973_v31 }
  0xea   :  { %v997_v26 = vpop.f32.mrf.mxu1  ;;  %v976_v35 = vadd.f32 %v975_v24, %v974_v22 }
  0xeb   :  { %v998_v36 = vadd.f32 %v997_v26, %v996_v23 }
  0xed   :  { %v723_v41 = vadd.f32 %v998_v36, %v976_v35 }
 0x103   :  { %v1015_v25 = vpop.f32.mrf.mxu0 }
 0x105   :  { %v1016_v27 = vpop.f32.mrf.mxu0  ;;  %v1037_v28 = vpop.f32.mrf.mxu1 }
 0x106   :  { %v1017_v37 = vadd.f32 %v1016_v27, %v1015_v25 }
 0x107   :  { %v1018_v29 = vpop.f32.mrf.mxu0  ;;  %v1038_v30 = vpop.f32.mrf.mxu1 }
 0x108   :  { %v761_v42 = vadd.f32 %v1017_v37, %v720_v38  ;;  %v1039_v43 = vadd.f32 %v1038_v30, %v1037_v28 }
 0x109   :  { %v1019_v33 = vpop.f32.mrf.mxu0  ;;  %v1040_v34 = vpop.f32.mrf.mxu1 }
 0x10a   :  { %v1020_v39 = vadd.f32 %v1019_v33, %v1018_v29  ;;  %v802_v47 = vadd.f32 %v1039_v43, %v761_v42 }
 0x10b   :  { %v1041_v40 = vpop.f32.mrf.mxu1 }
 0x10c   :  { %v764_v44 = vadd.f32 %v1020_v39, %v723_v41  ;;  %v1042_v45 = vadd.f32 %v1041_v40, %v1040_v34 }
 0x10e   :  { %v805_v50 = vadd.f32 %v1042_v45, %v764_v44 }
 0x123   :  { %v842_v46 = vpop.f32.mrf.mxu0 }
 0x124   :  { %v843_v49 = vadd.f32 %v842_v46, %v802_v47 }
 0x125   :  { %v1070_v48 = vpop.f32.mrf.mxu0 }
 0x126   :  { %v849_v54 = vmax.f32 %v843_v49, 0.0 }
 0x127   :  { %v845_v51 = vpop.f32.mrf.mxu0 }
 0x128   :  { %v846_v52 = vadd.f32 %v845_v51, %v805_v50 }
 0x129   :  { %v1071_v53 = vpop.f32.mrf.mxu0 }
 0x12a   :  { %v850_v55 = vmax.f32 %v846_v52, 0.0 }
 0x12c   :  { %v953_v56 = vpack.c.bf16 %v850_v55, %v849_v54 }
 0x12e   :  { %954 = vst [vmem:[%s1424_s2] sm:$0xff] %v953_v56  }

// kernel: _lambda_.32
= control target key start
LH: loop header
LB: loop body
LE: loop exit
PB: predicated region body
PF: predicated region fallthrough
CT: control target
= control target key end

     0   :  { %v690_v33 = vmov 0.0   ;;  %vm691_vm0 = vmmov 0   ;;  %s853_s1 = inlined_call_operand.vmem [shape: bf16[640,128], index: 1, kind: input, shape index: {}]   ;;  %s854_s0 = inlined_call_operand.vmem [shape: bf16[16,640], index: 0, kind: input, shape index: {}]   ;;  %s855_s2 = inlined_call_operand.vmem [shape: bf16[16,128], index: 2, kind: input, shape index: {}]   ;;  %s856_s3 = inlined_call_operand.vmem [shape: bf16[16,128], index: 3, kind: output, shape index: {}]  }
   0x1   :  { %v643_v0 = vld [vmem:[%s853_s1 + $0x78] sm:$0xff]   ;;  %v647_v4 = vld [vmem:[%s853_s1 + $0x70] sm:$0xff]   ;;  %v651_v8 = vld [vmem:[%s853_s1 + $0x68] sm:$0xff]  }
   0x2   :  { %v644_v1 = vld [vmem:[%s853_s1 + $0x38] sm:$0xff]   ;;  %568 = vmatprep.subr.bf16.mxu0 %v643_v0  ;;  %v648_v5 = vld [vmem:[%s853_s1 + $0x30] sm:$0xff]   ;;  %v652_v9 = vld [vmem:[%s853_s1 + $0x28] sm:$0xff]  }
   0x3   :  { %v645_v2 = vld [vmem:[%s853_s1 + $0xf8] sm:$0xff]   ;;  %569 = vmatpush3.bf16.msra.mxu0 %v644_v1  ;;  %v649_v6 = vld [vmem:[%s853_s1 + $0xf0] sm:$0xff]   ;;  %v653_v10 = vld [vmem:[%s853_s1 + $0xe8] sm:$0xff]  }
   0x4   :  { %v646_v3 = vld [vmem:[%s853_s1 + $0xb8] sm:$0xff]   ;;  %590 = vmatprep.subr.bf16.mxu1 %v645_v2  ;;  %570 = vmatprep.subr.bf16.mxu0 %v647_v4  ;;  %v650_v7 = vld [vmem:[%s853_s1 + $0xb0] sm:$0xff]   ;;  %v654_v11 = vld [vmem:[%s853_s1 + $0xa8] sm:$0xff]  }
   0x5   :  { %591 = vmatpush3.bf16.msra.mxu1 %v646_v3  ;;  %v655_v12 = vld [vmem:[%s853_s1 + $0x60] sm:$0xff]   ;;  %v659_v16 = vld [vmem:[%s853_s1 + $0x58] sm:$0xff]   ;;  %v663_v20 = vld [vmem:[%s853_s1 + $0x50] sm:$0xff]  }
   0x6   :  { %592 = vmatprep.subr.bf16.mxu1 %v649_v6  ;;  %v656_v13 = vld [vmem:[%s853_s1 + $0x20] sm:$0xff]   ;;  %v660_v17 = vld [vmem:[%s853_s1 + $0x18] sm:$0xff]   ;;  %v664_v21 = vld [vmem:[%s853_s1 + $0x10] sm:$0xff]  }
   0x7   :  { %571 = vmatpush3.bf16.msra.mxu0 %v648_v5  ;;  %v657_v14 = vld [vmem:[%s853_s1 + $0xe0] sm:$0xff]   ;;  %v661_v18 = vld [vmem:[%s853_s1 + $0xd8] sm:$0xff]   ;;  %v665_v22 = vld [vmem:[%s853_s1 + $0xd0] sm:$0xff]  }
   0x8   :  { %572 = vmatprep.subr.bf16.mxu0 %v651_v8  ;;  %v658_v15 = vld [vmem:[%s853_s1 + $0xa0] sm:$0xff]   ;;  %v662_v19 = vld [vmem:[%s853_s1 + $0x98] sm:$0xff]   ;;  %v666_v23 = vld [vmem:[%s853_s1 + $0x90] sm:$0xff]  }
   0x9   :  { %593 = vmatpush3.bf16.msra.mxu1 %v650_v7  ;;  %v667_v24 = vld [vmem:[%s853_s1 + $0x48] sm:$0xff]   ;;  %v671_v28 = vld [vmem:[%s853_s1 + $0x40] sm:$0xff]   ;;  %v681_v37 = vld [vmem:[%s853_s1 + $0x138] sm:$0xff]  }
   0xa   :  { %594 = vmatprep.subr.bf16.mxu1 %v653_v10  ;;  %v668_v25 = vld [vmem:[%s853_s1 + $0x8] sm:$0xff]   ;;  %v672_v29 = vld [vmem:[%s853_s1] sm:$0xff]   ;;  %v682_v38 = vld [vmem:[%s853_s1 + $0x130] sm:$0xff]  }
   0xb   :  { %573 = vmatpush3.bf16.msra.mxu0 %v652_v9  ;;  %v669_v26 = vld [vmem:[%s853_s1 + $0xc8] sm:$0xff]   ;;  %v673_v30 = vld [vmem:[%s853_s1 + $0xc0] sm:$0xff]   ;;  %v685_v41 = vld [vmem:[%s853_s1 + $0x118] sm:$0xff]  }
   0xc   :  { %574 = vmatprep.subr.bf16.mxu0 %v655_v12  ;;  %v670_v27 = vld [vmem:[%s853_s1 + $0x88] sm:$0xff]   ;;  %v674_v31 = vld [vmem:[%s854_s0] ss:$20 sps:$4 sm:$0xff]   ;;  %v676_v32 = vld [vmem:[%s854_s0 + $0x4] ss:$20 sps:$4 sm:$0xff]  }
   0xd   :  { %595 = vmatpush3.bf16.msra.mxu1 %v654_v11  ;;  %v677_v34 = vld [vmem:[%s853_s1 + $0x80] sm:$0xff]   ;;  %403 = vmatprep.mubr.bf16.mxu0 %v676_v32  ;;  %v678_v35 = vld [vmem:[%s854_s0 + $0x8] ss:$20 sps:$4 sm:$0xff]   ;;  %v686_v42 = vld [vmem:[%s853_s1 + $0x110] sm:$0xff]  }
   0xe   :  { %596 = vmatprep.subr.bf16.mxu1 %v657_v14  ;;  %v680_v36 = vld [vmem:[%s854_s0 + $0xc] ss:$20 sps:$4 sm:$0xff]   ;;  %v689_v45 = vld [vmem:[%s854_s0 + $0x10] ss:$20 sps:$4 sm:$0xff]  }
   0xf   :  { %575 = vmatpush3.bf16.msra.mxu0 %v656_v13  ;;  %444 = vmatprep.mubr.bf16.mxu1 %v680_v36  ;;  %v683_v39 = vld [vmem:[%s853_s1 + $0x128] sm:$0xff]   ;;  %v684_v40 = vld [vmem:[%s853_s1 + $0x120] sm:$0xff]  }
  0x10   :  { %576 = vmatprep.subr.bf16.mxu0 %v659_v16  ;;  %v687_v43 = vld [vmem:[%s853_s1 + $0x108] sm:$0xff]   ;;  %v688_v44 = vld [vmem:[%s853_s1 + $0x100] sm:$0xff]  }
  0x11   :  { %597 = vmatpush3.bf16.msra.mxu1 %v658_v15  ;;  %v560_v51 = vld [vmem:[%s855_s2] sm:$0xff]  }
  0x12   :  { %598 = vmatprep.subr.bf16.mxu1 %v661_v18  ;;  %v561_v54 = vunpack.c.l.bf16 %v560_v51  ;;  %v562_v56 = vunpack.c.h.bf16 %v560_v51 }
  0x13   :  { %577 = vmatpush3.bf16.msra.mxu0 %v660_v17 }
  0x14   :  { %578 = vmatprep.subr.bf16.mxu0 %v663_v20 }
  0x15   :  { %599 = vmatpush3.bf16.msra.mxu1 %v662_v19 }
  0x16   :  { %600 = vmatprep.subr.bf16.mxu1 %v665_v22 }
  0x17   :  { %579 = vmatpush3.bf16.msra.mxu0 %v664_v21 }
  0x18   :  { %580 = vmatprep.subr.bf16.mxu0 %v667_v24 }
  0x19   :  { %601 = vmatpush3.bf16.msra.mxu1 %v666_v23 }
  0x1a   :  { %602 = vmatprep.subr.bf16.mxu1 %v669_v26 }
  0x1b   :  { %581 = vmatpush3.bf16.msra.mxu0 %v668_v25 }
  0x1c   :  { %582 = vmatprep.subr.bf16.mxu0 %v671_v28 }
  0x1d   :  { %603 = vmatpush3.bf16.msra.mxu1 %v670_v27 }
  0x1e   :  { %604 = vmatprep.subr.bf16.mxu1 %v673_v30 }
  0x1f   :  { %583 = vmatpush3.bf16.msra.mxu0 %v672_v29 }
  0x20   :  { %621 = vmatprep.subr.bf16.mxu0 %v690_v33 }
  0x21   :  { %605 = vmatpush3.bf16.msra.mxu1 %v677_v34 }
  0x22   :  { %404 = vmatmul.mubr.bf16.vlgmr.msra.gmra.mxu0 %v674_v31 }
  0x23   :  { %637 = vmatprep.mubr.msk.bf16.mxu0 %vm691_vm0, %v690_v33  ;;  %622 = vmatpush3.bf16.msra.mxu0 %v681_v37 }
  0x24   :  { %445 = vmatmul.mubr.bf16.vlgmr.msra.gmra.mxu1 %v678_v35  ;;  %623 = vmatprep.subr.bf16.mxu0 %v690_v33 }
  0x27   :  { %624 = vmatpush3.bf16.msra.mxu0 %v682_v38 }
  0x28   :  { %625 = vmatprep.subr.bf16.mxu0 %v690_v33 }
  0x2b   :  { %626 = vmatpush3.bf16.msra.mxu0 %v683_v39 }
  0x2c   :  { %627 = vmatprep.subr.bf16.mxu0 %v690_v33 }
  0x2f   :  { %628 = vmatpush3.bf16.msra.mxu0 %v684_v40 }
  0x30   :  { %629 = vmatprep.subr.bf16.mxu0 %v690_v33 }
  0x33   :  { %630 = vmatpush3.bf16.msra.mxu0 %v685_v41 }
  0x34   :  { %631 = vmatprep.subr.bf16.mxu0 %v690_v33 }
  0x37   :  { %632 = vmatpush3.bf16.msra.mxu0 %v686_v42 }
  0x38   :  { %633 = vmatprep.subr.bf16.mxu0 %v690_v33 }
  0x3b   :  { %634 = vmatpush3.bf16.msra.mxu0 %v687_v43 }
  0x3c   :  { %635 = vmatprep.subr.bf16.mxu0 %v690_v33 }
  0x3f   :  { %636 = vmatpush3.bf16.msra.mxu0 %v688_v44 }
  0x42   :  { %638 = vmatmul.mubr.bf16.vlgmr.msra.gmra.mxu0 %v689_v45 }
  0xe2   :  { %v584_v46 = vpop.f32.mrf.mxu0 }
  0xe4   :  { %v585_v47 = vpop.f32.mrf.mxu0  ;;  %v606_v48 = vpop.f32.mrf.mxu1 }
  0xe5   :  { %v586_v55 = vadd.f32 %v585_v47, %v584_v46 }
  0xe6   :  { %v587_v49 = vpop.f32.mrf.mxu0  ;;  %v607_v50 = vpop.f32.mrf.mxu1 }
  0xe7   :  { %v406_v59 = vadd.f32 %v586_v55, %v561_v54  ;;  %v608_v60 = vadd.f32 %v607_v50, %v606_v48 }
  0xe8   :  { %v588_v52 = vpop.f32.mrf.mxu0  ;;  %v609_v53 = vpop.f32.mrf.mxu1 }
  0xe9   :  { %v589_v57 = vadd.f32 %v588_v52, %v587_v49  ;;  %v447_v0 = vadd.f32 %v608_v60, %v406_v59 }
  0xea   :  { %v610_v58 = vpop.f32.mrf.mxu1 }
  0xeb   :  { %v409_v61 = vadd.f32 %v589_v57, %v562_v56  ;;  %v611_v62 = vadd.f32 %v610_v58, %v609_v53 }
  0xed   :  { %v450_v3 = vadd.f32 %v611_v62, %v409_v61 }
 0x102   :  { %v487_v63 = vpop.f32.mrf.mxu0 }
 0x103   :  { %v488_v2 = vadd.f32 %v487_v63, %v447_v0 }
 0x104   :  { %v639_v1 = vpop.f32.mrf.mxu0 }
 0x105   :  { %v494_v7 = vmax.f32 %v488_v2, 0.0 }
 0x106   :  { %v490_v4 = vpop.f32.mrf.mxu0 }
 0x107   :  { %v491_v5 = vadd.f32 %v490_v4, %v450_v3 }
 0x108   :  { %v640_v6 = vpop.f32.mrf.mxu0 }
 0x109   :  { %v495_v8 = vmax.f32 %v491_v5, 0.0 }
 0x10b   :  { %v566_v9 = vpack.c.bf16 %v495_v8, %v494_v7 }
 0x10d   :  { %567 = vst [vmem:[%s856_s3] sm:$0xff] %v566_v9  }

// kernel: _lambda_.35
= control target key start
LH: loop header
LB: loop body
LE: loop exit
PB: predicated region body
PF: predicated region fallthrough
CT: control target
= control target key end

     0   :  { %v216_v0 = vmov 0.0   ;;  %vm217_vm0 = vmmov 0   ;;  %s271_s1 = inlined_call_operand.vmem [shape: bf16[128,128], index: 1, kind: input, shape index: {}]   ;;  %s272_s0 = inlined_call_operand.vmem [shape: bf16[16,128], index: 0, kind: input, shape index: {}]   ;;  %s273_s2 = inlined_call_operand.vmem [shape: bf16[16,128], index: 2, kind: input, shape index: {}]   ;;  %s274_s3 = inlined_call_operand.vmem [shape: bf16[16,128], index: 3, kind: output, shape index: {}]  }
   0x1   :  { %181 = vmatprep.subr.bf16.mxu0 %v216_v0  ;;  %v203_v1 = vld [vmem:[%s271_s1 + $0x38] sm:$0xff]   ;;  %197 = vmatprep.mubr.msk.bf16.mxu0 %vm217_vm0, %v216_v0  ;;  %v204_v2 = vld [vmem:[%s271_s1 + $0x30] sm:$0xff]   ;;  %v205_v3 = vld [vmem:[%s271_s1 + $0x28] sm:$0xff]  }
   0x2   :  { %182 = vmatpush3.bf16.msra.mxu0 %v203_v1  ;;  %v206_v4 = vld [vmem:[%s271_s1 + $0x20] sm:$0xff]   ;;  %v207_v5 = vld [vmem:[%s271_s1 + $0x18] sm:$0xff]   ;;  %v208_v6 = vld [vmem:[%s271_s1 + $0x10] sm:$0xff]  }
   0x3   :  { %183 = vmatprep.subr.bf16.mxu0 %v216_v0  ;;  %v209_v7 = vld [vmem:[%s271_s1 + $0x8] sm:$0xff]   ;;  %v210_v8 = vld [vmem:[%s271_s1] sm:$0xff]  }
   0x4   :  { %v211_v9 = vld [vmem:[%s272_s0] sm:$0xff]  }
   0x5   :  { %v164_v10 = vld [vmem:[%s273_s2] sm:$0xff]  }
   0x6   :  { %184 = vmatpush3.bf16.msra.mxu0 %v204_v2  ;;  %v165_v11 = vunpack.c.l.bf16 %v164_v10  ;;  %v166_v14 = vunpack.c.h.bf16 %v164_v10 }
   0x7   :  { %185 = vmatprep.subr.bf16.mxu0 %v216_v0 }
   0xa   :  { %186 = vmatpush3.bf16.msra.mxu0 %v205_v3 }
   0xb   :  { %187 = vmatprep.subr.bf16.mxu0 %v216_v0 }
   0xe   :  { %188 = vmatpush3.bf16.msra.mxu0 %v206_v4 }
   0xf   :  { %189 = vmatprep.subr.bf16.mxu0 %v216_v0 }
  0x12   :  { %190 = vmatpush3.bf16.msra.mxu0 %v207_v5 }
  0x13   :  { %191 = vmatprep.subr.bf16.mxu0 %v216_v0 }
  0x16   :  { %192 = vmatpush3.bf16.msra.mxu0 %v208_v6 }
  0x17   :  { %193 = vmatprep.subr.bf16.mxu0 %v216_v0 }
  0x1a   :  { %194 = vmatpush3.bf16.msra.mxu0 %v209_v7 }
  0x1b   :  { %195 = vmatprep.subr.bf16.mxu0 %v216_v0 }
  0x1e   :  { %196 = vmatpush3.bf16.msra.mxu0 %v210_v8 }
  0x21   :  { %198 = vmatmul.mubr.bf16.vlgmr.msra.gmra.mxu0 %v211_v9 }
  0xe1   :  { %v125_v12 = vpop.f32.mrf.mxu0 }
  0xe2   :  { %v126_v13 = vadd.f32 %v165_v11, %v125_v12 }
  0xe3   :  { %v199_v15 = vpop.f32.mrf.mxu0 }
  0xe4   :  { %v132_v16 = vmax.f32 %v126_v13, 0.0 }
  0xe5   :  { %v128_v17 = vpop.f32.mrf.mxu0 }
  0xe6   :  { %v129_v18 = vadd.f32 %v166_v14, %v128_v17  ;;  %212 = vtanh.f32 %v132_v16 }
  0xe7   :  { %v200_v19 = vpop.f32.mrf.mxu0 }
  0xe8   :  { %v133_v20 = vmax.f32 %v129_v18, 0.0 }
  0xea   :  { %214 = vtanh.f32 %v133_v20 }
  0xf3   :  { %v213_v21 = vpop.eup %212 }
  0xf7   :  { %v215_v22 = vpop.eup %214 }
  0xf8   :  { %v170_v23 = vpack.c.bf16 %v215_v22, %v213_v21 }
  0xfa   :  { %171 = vst [vmem:[%s274_s3] sm:$0xff] %v170_v23  }

// kernel: _lambda_.37
= control target key start
LH: loop header
LB: loop body
LE: loop exit
PB: predicated region body
PF: predicated region fallthrough
CT: control target
= control target key end

     0   :  { %v199_v0 = vmov 0.0   ;;  %vm200_vm0 = vmmov 0   ;;  %s246_s1 = inlined_call_operand.vmem [shape: bf16[128,128], index: 1, kind: input, shape index: {}]   ;;  %s247_s0 = inlined_call_operand.vmem [shape: bf16[16,128], index: 0, kind: input, shape index: {}]   ;;  %s248_s2 = inlined_call_operand.vmem [shape: bf16[16,128], index: 2, kind: output, shape index: {}]  }
   0x1   :  { %168 = vmatprep.subr.bf16.mxu0 %v199_v0  ;;  %v190_v1 = vld [vmem:[%s246_s1 + $0x38] sm:$0xff]   ;;  %184 = vmatprep.mubr.msk.bf16.mxu0 %vm200_vm0, %v199_v0  ;;  %v191_v2 = vld [vmem:[%s246_s1 + $0x30] sm:$0xff]   ;;  %v192_v3 = vld [vmem:[%s246_s1 + $0x28] sm:$0xff]  }
   0x2   :  { %169 = vmatpush3.bf16.msra.mxu0 %v190_v1  ;;  %v193_v4 = vld [vmem:[%s246_s1 + $0x20] sm:$0xff]   ;;  %v194_v5 = vld [vmem:[%s246_s1 + $0x18] sm:$0xff]   ;;  %v195_v6 = vld [vmem:[%s246_s1 + $0x10] sm:$0xff]  }
   0x3   :  { %170 = vmatprep.subr.bf16.mxu0 %v199_v0  ;;  %v196_v7 = vld [vmem:[%s246_s1 + $0x8] sm:$0xff]   ;;  %v197_v8 = vld [vmem:[%s246_s1] sm:$0xff]  }
   0x4   :  { %v198_v9 = vld [vmem:[%s247_s0] sm:$0xff]  }
   0x6   :  { %171 = vmatpush3.bf16.msra.mxu0 %v191_v2 }
   0x7   :  { %172 = vmatprep.subr.bf16.mxu0 %v199_v0 }
   0xa   :  { %173 = vmatpush3.bf16.msra.mxu0 %v192_v3 }
   0xb   :  { %174 = vmatprep.subr.bf16.mxu0 %v199_v0 }
   0xe   :  { %175 = vmatpush3.bf16.msra.mxu0 %v193_v4 }
   0xf   :  { %176 = vmatprep.subr.bf16.mxu0 %v199_v0 }
  0x12   :  { %177 = vmatpush3.bf16.msra.mxu0 %v194_v5 }
  0x13   :  { %178 = vmatprep.subr.bf16.mxu0 %v199_v0 }
  0x16   :  { %179 = vmatpush3.bf16.msra.mxu0 %v195_v6 }
  0x17   :  { %180 = vmatprep.subr.bf16.mxu0 %v199_v0 }
  0x1a   :  { %181 = vmatpush3.bf16.msra.mxu0 %v196_v7 }
  0x1b   :  { %182 = vmatprep.subr.bf16.mxu0 %v199_v0 }
  0x1e   :  { %183 = vmatpush3.bf16.msra.mxu0 %v197_v8 }
  0x21   :  { %185 = vmatmul.mubr.bf16.vlgmr.msra.gmra.mxu0 %v198_v9 }
  0xe1   :  { %v118_v10 = vpop.f32.mrf.mxu0 }
  0xe2   :  { %v125_v13 = vmax.f32 %v118_v10, 0.0 }
  0xe3   :  { %v186_v11 = vpop.f32.mrf.mxu0 }
  0xe5   :  { %v121_v12 = vpop.f32.mrf.mxu0 }
  0xe6   :  { %v126_v14 = vmax.f32 %v121_v12, 0.0 }
  0xe7   :  { %v187_v15 = vpop.f32.mrf.mxu0 }
  0xe8   :  { %v157_v16 = vpack.c.bf16 %v126_v14, %v125_v13 }
  0xea   :  { %158 = vst [vmem:[%s248_s2] sm:$0xff] %v157_v16  }

// kernel: _lambda_.34
= control target key start
LH: loop header
LB: loop body
LE: loop exit
PB: predicated region body
PF: predicated region fallthrough
CT: control target
= control target key end

     0   :  { %v679_v34 = vmov 0.0   ;;  %vm680_vm0 = vmmov 0   ;;  %s834_s1 = inlined_call_operand.vmem [shape: bf16[640,128], index: 1, kind: input, shape index: {}]   ;;  %s835_s0 = inlined_call_operand.vmem [shape: bf16[16,640], index: 0, kind: input, shape index: {}]   ;;  %s836_s2 = inlined_call_operand.vmem [shape: bf16[16,128], index: 2, kind: output, shape index: {}]  }
   0x1   :  { %v632_v0 = vld [vmem:[%s834_s1 + $0x78] sm:$0xff]   ;;  %v636_v4 = vld [vmem:[%s834_s1 + $0x70] sm:$0xff]   ;;  %v640_v8 = vld [vmem:[%s834_s1 + $0x68] sm:$0xff]  }
   0x2   :  { %v633_v1 = vld [vmem:[%s834_s1 + $0xf8] sm:$0xff]   ;;  %557 = vmatprep.subr.bf16.mxu0 %v632_v0  ;;  %v637_v5 = vld [vmem:[%s834_s1 + $0xf0] sm:$0xff]   ;;  %v641_v9 = vld [vmem:[%s834_s1 + $0xe8] sm:$0xff]  }
   0x3   :  { %v634_v2 = vld [vmem:[%s834_s1 + $0x38] sm:$0xff]   ;;  %579 = vmatprep.subr.bf16.mxu1 %v633_v1  ;;  %v638_v6 = vld [vmem:[%s834_s1 + $0x30] sm:$0xff]   ;;  %v642_v10 = vld [vmem:[%s834_s1 + $0x28] sm:$0xff]  }
   0x4   :  { %v635_v3 = vld [vmem:[%s834_s1 + $0xb8] sm:$0xff]   ;;  %558 = vmatpush3.bf16.msra.mxu0 %v634_v2  ;;  %v639_v7 = vld [vmem:[%s834_s1 + $0xb0] sm:$0xff]   ;;  %v643_v11 = vld [vmem:[%s834_s1 + $0xa8] sm:$0xff]  }
   0x5   :  { %580 = vmatpush3.bf16.msra.mxu1 %v635_v3  ;;  %559 = vmatprep.subr.bf16.mxu0 %v636_v4  ;;  %v644_v12 = vld [vmem:[%s834_s1 + $0x60] sm:$0xff]   ;;  %v648_v16 = vld [vmem:[%s834_s1 + $0x58] sm:$0xff]   ;;  %v652_v20 = vld [vmem:[%s834_s1 + $0x50] sm:$0xff]  }
   0x6   :  { %581 = vmatprep.subr.bf16.mxu1 %v637_v5  ;;  %v645_v13 = vld [vmem:[%s834_s1 + $0xe0] sm:$0xff]   ;;  %v649_v17 = vld [vmem:[%s834_s1 + $0xd8] sm:$0xff]   ;;  %v653_v21 = vld [vmem:[%s834_s1 + $0xd0] sm:$0xff]  }
   0x7   :  { %v646_v14 = vld [vmem:[%s834_s1 + $0x20] sm:$0xff]   ;;  %v650_v18 = vld [vmem:[%s834_s1 + $0x18] sm:$0xff]   ;;  %v654_v22 = vld [vmem:[%s834_s1 + $0x10] sm:$0xff]  }
   0x8   :  { %560 = vmatpush3.bf16.msra.mxu0 %v638_v6  ;;  %v647_v15 = vld [vmem:[%s834_s1 + $0xa0] sm:$0xff]   ;;  %v651_v19 = vld [vmem:[%s834_s1 + $0x98] sm:$0xff]   ;;  %v655_v23 = vld [vmem:[%s834_s1 + $0x90] sm:$0xff]  }
   0x9   :  { %582 = vmatpush3.bf16.msra.mxu1 %v639_v7  ;;  %561 = vmatprep.subr.bf16.mxu0 %v640_v8  ;;  %v656_v24 = vld [vmem:[%s834_s1 + $0x48] sm:$0xff]   ;;  %v660_v28 = vld [vmem:[%s834_s1 + $0x40] sm:$0xff]   ;;  %v670_v37 = vld [vmem:[%s834_s1 + $0x138] sm:$0xff]  }
   0xa   :  { %583 = vmatprep.subr.bf16.mxu1 %v641_v9  ;;  %v657_v25 = vld [vmem:[%s834_s1 + $0xc8] sm:$0xff]   ;;  %v661_v29 = vld [vmem:[%s834_s1 + $0xc0] sm:$0xff]   ;;  %v671_v38 = vld [vmem:[%s834_s1 + $0x130] sm:$0xff]  }
   0xb   :  { %v658_v26 = vld [vmem:[%s834_s1 + $0x8] sm:$0xff]   ;;  %v662_v30 = vld [vmem:[%s834_s1] sm:$0xff]   ;;  %v674_v41 = vld [vmem:[%s834_s1 + $0x118] sm:$0xff]  }
   0xc   :  { %562 = vmatpush3.bf16.msra.mxu0 %v642_v10  ;;  %v659_v27 = vld [vmem:[%s834_s1 + $0x88] sm:$0xff]   ;;  %v663_v31 = vld [vmem:[%s834_s1 + $0x80] sm:$0xff]   ;;  %v675_v42 = vld [vmem:[%s834_s1 + $0x110] sm:$0xff]  }
   0xd   :  { %584 = vmatpush3.bf16.msra.mxu1 %v643_v11  ;;  %563 = vmatprep.subr.bf16.mxu0 %v644_v12  ;;  %v664_v32 = vld [vmem:[%s835_s0] ss:$20 sps:$4 sm:$0xff]   ;;  %v666_v33 = vld [vmem:[%s835_s0 + $0x4] ss:$20 sps:$4 sm:$0xff]   ;;  %v667_v35 = vld [vmem:[%s835_s0 + $0x8] ss:$20 sps:$4 sm:$0xff]  }
   0xe   :  { %585 = vmatprep.subr.bf16.mxu1 %v645_v13  ;;  %v669_v36 = vld [vmem:[%s835_s0 + $0xc] ss:$20 sps:$4 sm:$0xff]   ;;  %396 = vmatprep.mubr.bf16.mxu0 %v666_v33  ;;  %v678_v45 = vld [vmem:[%s835_s0 + $0x10] ss:$20 sps:$4 sm:$0xff]  }
   0xf   :  { %437 = vmatprep.mubr.bf16.mxu1 %v669_v36  ;;  %v672_v39 = vld [vmem:[%s834_s1 + $0x128] sm:$0xff]   ;;  %v673_v40 = vld [vmem:[%s834_s1 + $0x120] sm:$0xff]  }
  0x10   :  { %564 = vmatpush3.bf16.msra.mxu0 %v646_v14  ;;  %v676_v43 = vld [vmem:[%s834_s1 + $0x108] sm:$0xff]   ;;  %v677_v44 = vld [vmem:[%s834_s1 + $0x100] sm:$0xff]  }
  0x11   :  { %586 = vmatpush3.bf16.msra.mxu1 %v647_v15  ;;  %565 = vmatprep.subr.bf16.mxu0 %v648_v16 }
  0x12   :  { %587 = vmatprep.subr.bf16.mxu1 %v649_v17 }
  0x14   :  { %566 = vmatpush3.bf16.msra.mxu0 %v650_v18 }
  0x15   :  { %588 = vmatpush3.bf16.msra.mxu1 %v651_v19  ;;  %567 = vmatprep.subr.bf16.mxu0 %v652_v20 }
  0x16   :  { %589 = vmatprep.subr.bf16.mxu1 %v653_v21 }
  0x18   :  { %568 = vmatpush3.bf16.msra.mxu0 %v654_v22 }
  0x19   :  { %590 = vmatpush3.bf16.msra.mxu1 %v655_v23  ;;  %569 = vmatprep.subr.bf16.mxu0 %v656_v24 }
  0x1a   :  { %591 = vmatprep.subr.bf16.mxu1 %v657_v25 }
  0x1c   :  { %570 = vmatpush3.bf16.msra.mxu0 %v658_v26 }
  0x1d   :  { %592 = vmatpush3.bf16.msra.mxu1 %v659_v27  ;;  %571 = vmatprep.subr.bf16.mxu0 %v660_v28 }
  0x1e   :  { %593 = vmatprep.subr.bf16.mxu1 %v661_v29 }
  0x20   :  { %572 = vmatpush3.bf16.msra.mxu0 %v662_v30 }
  0x21   :  { %594 = vmatpush3.bf16.msra.mxu1 %v663_v31  ;;  %610 = vmatprep.subr.bf16.mxu0 %v679_v34 }
  0x23   :  { %397 = vmatmul.mubr.bf16.vlgmr.msra.gmra.mxu0 %v664_v32 }
  0x24   :  { %438 = vmatmul.mubr.bf16.vlgmr.msra.gmra.mxu1 %v667_v35  ;;  %611 = vmatpush3.bf16.msra.mxu0 %v670_v37 }
  0x25   :  { %612 = vmatprep.subr.bf16.mxu0 %v679_v34  ;;  %626 = vmatprep.mubr.msk.bf16.mxu0 %vm680_vm0, %v679_v34 }
  0x28   :  { %613 = vmatpush3.bf16.msra.mxu0 %v671_v38 }
  0x29   :  { %614 = vmatprep.subr.bf16.mxu0 %v679_v34 }
  0x2c   :  { %615 = vmatpush3.bf16.msra.mxu0 %v672_v39 }
  0x2d   :  { %616 = vmatprep.subr.bf16.mxu0 %v679_v34 }
  0x30   :  { %617 = vmatpush3.bf16.msra.mxu0 %v673_v40 }
  0x31   :  { %618 = vmatprep.subr.bf16.mxu0 %v679_v34 }
  0x34   :  { %619 = vmatpush3.bf16.msra.mxu0 %v674_v41 }
  0x35   :  { %620 = vmatprep.subr.bf16.mxu0 %v679_v34 }
  0x38   :  { %621 = vmatpush3.bf16.msra.mxu0 %v675_v42 }
  0x39   :  { %622 = vmatprep.subr.bf16.mxu0 %v679_v34 }
  0x3c   :  { %623 = vmatpush3.bf16.msra.mxu0 %v676_v43 }
  0x3d   :  { %624 = vmatprep.subr.bf16.mxu0 %v679_v34 }
  0x40   :  { %625 = vmatpush3.bf16.msra.mxu0 %v677_v44 }
  0x43   :  { %627 = vmatmul.mubr.bf16.vlgmr.msra.gmra.mxu0 %v678_v45 }
  0xe3   :  { %v573_v46 = vpop.f32.mrf.mxu0 }
  0xe4   :  { %v595_v47 = vpop.f32.mrf.mxu1 }
  0xe5   :  { %v574_v48 = vpop.f32.mrf.mxu0 }
  0xe6   :  { %v596_v49 = vpop.f32.mrf.mxu1  ;;  %v575_v54 = vadd.f32 %v574_v48, %v573_v46 }
  0xe7   :  { %v576_v50 = vpop.f32.mrf.mxu0  ;;  %v597_v55 = vadd.f32 %v596_v49, %v595_v47 }
  0xe8   :  { %v598_v51 = vpop.f32.mrf.mxu1 }
  0xe9   :  { %v577_v52 = vpop.f32.mrf.mxu0  ;;  %v440_v59 = vadd.f32 %v597_v55, %v575_v54 }
  0xea   :  { %v599_v53 = vpop.f32.mrf.mxu1  ;;  %v578_v56 = vadd.f32 %v577_v52, %v576_v50 }
  0xeb   :  { %v600_v57 = vadd.f32 %v599_v53, %v598_v51 }
  0xed   :  { %v443_v62 = vadd.f32 %v600_v57, %v578_v56 }
 0x103   :  { %v480_v58 = vpop.f32.mrf.mxu0 }
 0x104   :  { %v481_v61 = vadd.f32 %v480_v58, %v440_v59 }
 0x105   :  { %v628_v60 = vpop.f32.mrf.mxu0 }
 0x106   :  { %v487_v2 = vmax.f32 %v481_v61, 0.0 }
 0x107   :  { %v483_v63 = vpop.f32.mrf.mxu0 }
 0x108   :  { %v484_v0 = vadd.f32 %v483_v63, %v443_v62 }
 0x109   :  { %v629_v1 = vpop.f32.mrf.mxu0 }
 0x10a   :  { %v488_v3 = vmax.f32 %v484_v0, 0.0 }
 0x10c   :  { %v555_v4 = vpack.c.bf16 %v488_v3, %v487_v2 }
 0x10e   :  { %556 = vst [vmem:[%s836_s2] sm:$0xff] %v555_v4  }

// kernel: _lambda_.38
= control target key start
LH: loop header
LB: loop body
LE: loop exit
PB: predicated region body
PF: predicated region fallthrough
CT: control target
= control target key end

     0   :  { %v450_v1 = vmov 0.0   ;;  %vm451_vm0 = vmmov 0   ;;  %s559_s1 = inlined_call_operand.vmem [shape: bf16[384,128], index: 1, kind: input, shape index: {}]   ;;  %s560_s0 = inlined_call_operand.vmem [shape: bf16[16,384], index: 0, kind: input, shape index: {}]   ;;  %s561_s2 = inlined_call_operand.vmem [shape: bf16[16,128], index: 2, kind: input, shape index: {}]   ;;  %s562_s3 = inlined_call_operand.vmem [shape: bf16[16,128], index: 3, kind: output, shape index: {}]  }
   0x1   :  { %v422_v0 = vld [vmem:[%s559_s1 + $0x78] sm:$0xff]   ;;  %400 = vmatprep.subr.bf16.mxu1 %v450_v1  ;;  %416 = vmatprep.mubr.msk.bf16.mxu1 %vm451_vm0, %v450_v1  ;;  %v425_v4 = vld [vmem:[%s559_s1 + $0x70] sm:$0xff]   ;;  %v428_v7 = vld [vmem:[%s559_s1 + $0x68] sm:$0xff]  }
   0x2   :  { %v423_v2 = vld [vmem:[%s559_s1 + $0x38] sm:$0xff]   ;;  %369 = vmatprep.subr.bf16.mxu0 %v422_v0  ;;  %v426_v5 = vld [vmem:[%s559_s1 + $0x30] sm:$0xff]   ;;  %v429_v8 = vld [vmem:[%s559_s1 + $0x28] sm:$0xff]  }
   0x3   :  { %v424_v3 = vld [vmem:[%s559_s1 + $0xb8] sm:$0xff]   ;;  %370 = vmatpush3.bf16.msra.mxu0 %v423_v2  ;;  %v427_v6 = vld [vmem:[%s559_s1 + $0xb0] sm:$0xff]   ;;  %v430_v9 = vld [vmem:[%s559_s1 + $0xa8] sm:$0xff]  }
   0x4   :  { %401 = vmatpush3.bf16.msra.mxu1 %v424_v3  ;;  %371 = vmatprep.subr.bf16.mxu0 %v425_v4  ;;  %v431_v10 = vld [vmem:[%s559_s1 + $0x60] sm:$0xff]   ;;  %v434_v13 = vld [vmem:[%s559_s1 + $0x58] sm:$0xff]   ;;  %v437_v16 = vld [vmem:[%s559_s1 + $0x50] sm:$0xff]  }
   0x5   :  { %402 = vmatprep.subr.bf16.mxu1 %v450_v1  ;;  %v432_v11 = vld [vmem:[%s559_s1 + $0x20] sm:$0xff]   ;;  %v435_v14 = vld [vmem:[%s559_s1 + $0x18] sm:$0xff]   ;;  %v438_v17 = vld [vmem:[%s559_s1 + $0x10] sm:$0xff]  }
   0x6   :  { %v433_v12 = vld [vmem:[%s559_s1 + $0xa0] sm:$0xff]   ;;  %v436_v15 = vld [vmem:[%s559_s1 + $0x98] sm:$0xff]   ;;  %v439_v18 = vld [vmem:[%s559_s1 + $0x90] sm:$0xff]  }
   0x7   :  { %372 = vmatpush3.bf16.msra.mxu0 %v426_v5  ;;  %v440_v19 = vld [vmem:[%s559_s1 + $0x48] sm:$0xff]   ;;  %v443_v22 = vld [vmem:[%s559_s1 + $0x40] sm:$0xff]  }
   0x8   :  { %403 = vmatpush3.bf16.msra.mxu1 %v427_v6  ;;  %373 = vmatprep.subr.bf16.mxu0 %v428_v7  ;;  %v441_v20 = vld [vmem:[%s559_s1 + $0x8] sm:$0xff]   ;;  %v448_v23 = vld [vmem:[%s560_s0 + $0x4] ss:$12 sps:$4 sm:$0xff]  }
   0x9   :  { %404 = vmatprep.subr.bf16.mxu1 %v450_v1  ;;  %v442_v21 = vld [vmem:[%s559_s1 + $0x88] sm:$0xff]   ;;  %v444_v24 = vld [vmem:[%s559_s1] sm:$0xff]   ;;  %263 = vmatprep.mubr.bf16.mxu0 %v448_v23 }
   0xa   :  { %v445_v25 = vld [vmem:[%s559_s1 + $0x80] sm:$0xff]   ;;  %v449_v27 = vld [vmem:[%s560_s0 + $0x8] ss:$12 sps:$4 sm:$0xff]  }
   0xb   :  { %374 = vmatpush3.bf16.msra.mxu0 %v429_v8  ;;  %v446_v26 = vld [vmem:[%s560_s0] ss:$12 sps:$4 sm:$0xff]  }
   0xc   :  { %405 = vmatpush3.bf16.msra.mxu1 %v430_v9  ;;  %375 = vmatprep.subr.bf16.mxu0 %v431_v10  ;;  %v361_v28 = vld [vmem:[%s561_s2] sm:$0xff]  }
   0xd   :  { %406 = vmatprep.subr.bf16.mxu1 %v450_v1  ;;  %v362_v31 = vunpack.c.l.bf16 %v361_v28  ;;  %v363_v38 = vunpack.c.h.bf16 %v361_v28 }
   0xf   :  { %376 = vmatpush3.bf16.msra.mxu0 %v432_v11 }
  0x10   :  { %407 = vmatpush3.bf16.msra.mxu1 %v433_v12  ;;  %377 = vmatprep.subr.bf16.mxu0 %v434_v13 }
  0x11   :  { %408 = vmatprep.subr.bf16.mxu1 %v450_v1 }
  0x13   :  { %378 = vmatpush3.bf16.msra.mxu0 %v435_v14 }
  0x14   :  { %409 = vmatpush3.bf16.msra.mxu1 %v436_v15  ;;  %379 = vmatprep.subr.bf16.mxu0 %v437_v16 }
  0x15   :  { %410 = vmatprep.subr.bf16.mxu1 %v450_v1 }
  0x17   :  { %380 = vmatpush3.bf16.msra.mxu0 %v438_v17 }
  0x18   :  { %411 = vmatpush3.bf16.msra.mxu1 %v439_v18  ;;  %381 = vmatprep.subr.bf16.mxu0 %v440_v19 }
  0x19   :  { %412 = vmatprep.subr.bf16.mxu1 %v450_v1 }
  0x1b   :  { %382 = vmatpush3.bf16.msra.mxu0 %v441_v20 }
  0x1c   :  { %413 = vmatpush3.bf16.msra.mxu1 %v442_v21  ;;  %383 = vmatprep.subr.bf16.mxu0 %v443_v22 }
  0x1d   :  { %414 = vmatprep.subr.bf16.mxu1 %v450_v1 }
  0x1f   :  { %384 = vmatpush3.bf16.msra.mxu0 %v444_v24 }
  0x20   :  { %415 = vmatpush3.bf16.msra.mxu1 %v445_v25 }
  0x22   :  { %264 = vmatmul.mubr.bf16.vlgmr.msra.gmra.mxu0 %v446_v26 }
  0x23   :  { %417 = vmatmul.mubr.bf16.vlgmr.msra.gmra.mxu1 %v449_v27 }
  0xe2   :  { %v385_v29 = vpop.f32.mrf.mxu0 }
  0xe3   :  { %v306_v30 = vpop.f32.mrf.mxu1 }
  0xe4   :  { %v386_v32 = vpop.f32.mrf.mxu0 }
  0xe5   :  { %v387_v33 = vadd.f32 %v386_v32, %v385_v29  ;;  %v418_v34 = vpop.f32.mrf.mxu1 }
  0xe6   :  { %v388_v35 = vpop.f32.mrf.mxu0 }
  0xe7   :  { %v266_v36 = vadd.f32 %v387_v33, %v362_v31  ;;  %v309_v37 = vpop.f32.mrf.mxu1 }
  0xe8   :  { %v389_v39 = vpop.f32.mrf.mxu0 }
  0xe9   :  { %v390_v40 = vadd.f32 %v389_v39, %v388_v35  ;;  %v419_v41 = vpop.f32.mrf.mxu1  ;;  %v307_v42 = vadd.f32 %v306_v30, %v266_v36 }
  0xeb   :  { %v269_v43 = vadd.f32 %v390_v40, %v363_v38  ;;  %v313_v45 = vmax.f32 %v307_v42, 0.0 }
  0xed   :  { %v310_v44 = vadd.f32 %v309_v37, %v269_v43 }
  0xef   :  { %v314_v46 = vmax.f32 %v310_v44, 0.0 }
  0xf1   :  { %v367_v47 = vpack.c.bf16 %v314_v46, %v313_v45 }
  0xf3   :  { %368 = vst [vmem:[%s562_s3] sm:$0xff] %v367_v47  }

// kernel: _lambda_.39
= control target key start
LH: loop header
LB: loop body
LE: loop exit
PB: predicated region body
PF: predicated region fallthrough
CT: control target
= control target key end

     0   :  { %v439_v0 = vmov 0.0   ;;  %vm440_vm0 = vmmov 0   ;;  %s540_s1 = inlined_call_operand.vmem [shape: bf16[384,128], index: 1, kind: input, shape index: {}]   ;;  %s541_s0 = inlined_call_operand.vmem [shape: bf16[16,384], index: 0, kind: input, shape index: {}]   ;;  %s542_s2 = inlined_call_operand.vmem [shape: bf16[16,128], index: 2, kind: output, shape index: {}]  }
   0x1   :  { %389 = vmatprep.subr.bf16.mxu1 %v439_v0  ;;  %v411_v1 = vld [vmem:[%s540_s1 + $0x78] sm:$0xff]   ;;  %405 = vmatprep.mubr.msk.bf16.mxu1 %vm440_vm0, %v439_v0  ;;  %v414_v4 = vld [vmem:[%s540_s1 + $0x70] sm:$0xff]   ;;  %v417_v7 = vld [vmem:[%s540_s1 + $0x68] sm:$0xff]  }
   0x2   :  { %v412_v2 = vld [vmem:[%s540_s1 + $0xb8] sm:$0xff]   ;;  %358 = vmatprep.subr.bf16.mxu0 %v411_v1  ;;  %v415_v5 = vld [vmem:[%s540_s1 + $0xb0] sm:$0xff]   ;;  %v418_v8 = vld [vmem:[%s540_s1 + $0xa8] sm:$0xff]  }
   0x3   :  { %v413_v3 = vld [vmem:[%s540_s1 + $0x38] sm:$0xff]   ;;  %390 = vmatpush3.bf16.msra.mxu1 %v412_v2  ;;  %v416_v6 = vld [vmem:[%s540_s1 + $0x30] sm:$0xff]   ;;  %v419_v9 = vld [vmem:[%s540_s1 + $0x28] sm:$0xff]  }
   0x4   :  { %359 = vmatpush3.bf16.msra.mxu0 %v413_v3  ;;  %391 = vmatprep.subr.bf16.mxu1 %v439_v0  ;;  %v420_v10 = vld [vmem:[%s540_s1 + $0x60] sm:$0xff]   ;;  %v423_v13 = vld [vmem:[%s540_s1 + $0x58] sm:$0xff]   ;;  %v426_v16 = vld [vmem:[%s540_s1 + $0x50] sm:$0xff]  }
   0x5   :  { %360 = vmatprep.subr.bf16.mxu0 %v414_v4  ;;  %v421_v11 = vld [vmem:[%s540_s1 + $0xa0] sm:$0xff]   ;;  %v424_v14 = vld [vmem:[%s540_s1 + $0x98] sm:$0xff]   ;;  %v427_v17 = vld [vmem:[%s540_s1 + $0x90] sm:$0xff]  }
   0x6   :  { %v422_v12 = vld [vmem:[%s540_s1 + $0x20] sm:$0xff]   ;;  %v425_v15 = vld [vmem:[%s540_s1 + $0x18] sm:$0xff]   ;;  %v428_v18 = vld [vmem:[%s540_s1 + $0x10] sm:$0xff]  }
   0x7   :  { %392 = vmatpush3.bf16.msra.mxu1 %v415_v5  ;;  %v429_v19 = vld [vmem:[%s540_s1 + $0x48] sm:$0xff]   ;;  %v432_v22 = vld [vmem:[%s540_s1 + $0x40] sm:$0xff]  }
   0x8   :  { %361 = vmatpush3.bf16.msra.mxu0 %v416_v6  ;;  %393 = vmatprep.subr.bf16.mxu1 %v439_v0  ;;  %v430_v20 = vld [vmem:[%s540_s1 + $0x88] sm:$0xff]   ;;  %v437_v23 = vld [vmem:[%s541_s0 + $0x4] ss:$12 sps:$4 sm:$0xff]  }
   0x9   :  { %362 = vmatprep.subr.bf16.mxu0 %v417_v7  ;;  %v431_v21 = vld [vmem:[%s540_s1 + $0x8] sm:$0xff]   ;;  %v433_v24 = vld [vmem:[%s540_s1 + $0x80] sm:$0xff]   ;;  %256 = vmatprep.mubr.bf16.mxu0 %v437_v23 }
   0xa   :  { %v434_v25 = vld [vmem:[%s540_s1] sm:$0xff]   ;;  %v438_v26 = vld [vmem:[%s541_s0 + $0x8] ss:$12 sps:$4 sm:$0xff]  }
   0xb   :  { %394 = vmatpush3.bf16.msra.mxu1 %v418_v8  ;;  %v435_v27 = vld [vmem:[%s541_s0] ss:$12 sps:$4 sm:$0xff]  }
   0xc   :  { %363 = vmatpush3.bf16.msra.mxu0 %v419_v9  ;;  %395 = vmatprep.subr.bf16.mxu1 %v439_v0 }
   0xd   :  { %364 = vmatprep.subr.bf16.mxu0 %v420_v10 }
   0xf   :  { %396 = vmatpush3.bf16.msra.mxu1 %v421_v11 }
  0x10   :  { %365 = vmatpush3.bf16.msra.mxu0 %v422_v12  ;;  %397 = vmatprep.subr.bf16.mxu1 %v439_v0 }
  0x11   :  { %366 = vmatprep.subr.bf16.mxu0 %v423_v13 }
  0x13   :  { %398 = vmatpush3.bf16.msra.mxu1 %v424_v14 }
  0x14   :  { %367 = vmatpush3.bf16.msra.mxu0 %v425_v15  ;;  %399 = vmatprep.subr.bf16.mxu1 %v439_v0 }
  0x15   :  { %368 = vmatprep.subr.bf16.mxu0 %v426_v16 }
  0x17   :  { %400 = vmatpush3.bf16.msra.mxu1 %v427_v17 }
  0x18   :  { %369 = vmatpush3.bf16.msra.mxu0 %v428_v18  ;;  %401 = vmatprep.subr.bf16.mxu1 %v439_v0 }
  0x19   :  { %370 = vmatprep.subr.bf16.mxu0 %v429_v19 }
  0x1b   :  { %402 = vmatpush3.bf16.msra.mxu1 %v430_v20 }
  0x1c   :  { %371 = vmatpush3.bf16.msra.mxu0 %v431_v21  ;;  %403 = vmatprep.subr.bf16.mxu1 %v439_v0 }
  0x1d   :  { %372 = vmatprep.subr.bf16.mxu0 %v432_v22 }
  0x1f   :  { %404 = vmatpush3.bf16.msra.mxu1 %v433_v24 }
  0x20   :  { %373 = vmatpush3.bf16.msra.mxu0 %v434_v25 }
  0x22   :  { %406 = vmatmul.mubr.bf16.vlgmr.msra.gmra.mxu1 %v438_v26 }
  0x23   :  { %257 = vmatmul.mubr.bf16.vlgmr.msra.gmra.mxu0 %v435_v27 }
  0xe2   :  { %v299_v28 = vpop.f32.mrf.mxu1 }
  0xe3   :  { %v374_v29 = vpop.f32.mrf.mxu0 }
  0xe4   :  { %v407_v30 = vpop.f32.mrf.mxu1 }
  0xe5   :  { %v375_v31 = vpop.f32.mrf.mxu0 }
  0xe6   :  { %v376_v32 = vadd.f32 %v375_v31, %v374_v29  ;;  %v302_v33 = vpop.f32.mrf.mxu1 }
  0xe7   :  { %v377_v34 = vpop.f32.mrf.mxu0 }
  0xe8   :  { %v408_v35 = vpop.f32.mrf.mxu1  ;;  %v300_v37 = vadd.f32 %v376_v32, %v299_v28 }
  0xe9   :  { %v378_v36 = vpop.f32.mrf.mxu0 }
  0xea   :  { %v379_v38 = vadd.f32 %v378_v36, %v377_v34  ;;  %v306_v40 = vmax.f32 %v300_v37, 0.0 }
  0xec   :  { %v303_v39 = vadd.f32 %v379_v38, %v302_v33 }
  0xee   :  { %v307_v41 = vmax.f32 %v303_v39, 0.0 }
  0xf0   :  { %v356_v42 = vpack.c.bf16 %v307_v41, %v306_v40 }
  0xf2   :  { %357 = vst [vmem:[%s542_s2] sm:$0xff] %v356_v42  }

// kernel: _lambda_.43
= control target key start
LH: loop header
LB: loop body
LE: loop exit
PB: predicated region body
PF: predicated region fallthrough
CT: control target
= control target key end

     0   :  { %v272_v0 = vmov 0.0   ;;  %vm273_vm0 = vmmov 0   ;;  %vm87_vm1 = vcmask 1041409   ;;  %vm90_vm2 = vcmask 1042434   ;;  %s358_s1 = inlined_call_operand.vmem [shape: bf16[128,128], index: 1, kind: input, shape index: {}]   ;;  %s359_s0 = inlined_call_operand.vmem [shape: bf16[8,1,128], index: 0, kind: input, shape index: {}]   ;;  %s360_s2 = inlined_call_operand.vmem [shape: f32[1,128], index: 2, kind: input, shape index: {}]   ;;  %s361_s3 = inlined_call_operand.vmem [shape: f32[8,128], index: 3, kind: output, shape index: {}]  }
   0x1   :  { %232 = vmatprep.subr.bf16.mxu0 %v272_v0  ;;  %v254_v1 = vld [vmem:[%s358_s1 + $0x38] sm:$0xff]   ;;  %248 = vmatprep.mubr.msk.bf16.mxu0 %vm273_vm0, %v272_v0  ;;  %v255_v2 = vld [vmem:[%s358_s1 + $0x30] sm:$0xff]   ;;  %v256_v3 = vld [vmem:[%s358_s1 + $0x28] sm:$0xff]   ;;  %vm93_vm3 = vcmask 1043459   ;;  %vm96_vm4 = vcmask 1044484   ;;  %vm99_vm5 = vcmask 1045509  }
   0x2   :  { %233 = vmatpush3.bf16.msra.mxu0 %v254_v1  ;;  %v257_v4 = vld [vmem:[%s358_s1 + $0x20] sm:$0xff]   ;;  %v258_v7 = vld [vmem:[%s358_s1 + $0x18] sm:$0xff]   ;;  %v259_v27 = vld [vmem:[%s358_s1 + $0x10] sm:$0xff]   ;;  %vm102_vm6 = vcmask 1046534   ;;  %vm105_vm7 = vcmask 1047559  }
   0x3   :  { %234 = vmatprep.subr.bf16.mxu0 %v272_v0  ;;  %v262_v5 = vld [vmem:[%s359_s0] ss:$0 sps:$4 sm:$0x11]   ;;  %v263_v6 = vld [vmem:[%s359_s0 + $0x1] ss:$0 sps:$4 sm:$0x11]  }
   0x4   :  { %v264_v8 = vld [vmem:[%s359_s0 + $0x2] ss:$0 sps:$4 sm:$0x11]   ;;  %v265_v9 = vld [vmem:[%s359_s0 + $0x3] ss:$0 sps:$4 sm:$0x11]   ;;  %v78_v12 = vunpack.c.l.b16 %v262_v5  ;;  %v79_v13 = vunpack.c.l.b16 %v263_v6 }
   0x5   :  { %v266_v10 = vld [vmem:[%s359_s0 + $0x4] ss:$0 sps:$4 sm:$0x11]   ;;  %v267_v11 = vld [vmem:[%s359_s0 + $0x5] ss:$0 sps:$4 sm:$0x11]   ;;  %v80_v16 = vunpack.c.l.b16 %v264_v8  ;;  %v81_v17 = vunpack.c.l.b16 %v265_v9 }
   0x6   :  { %235 = vmatpush3.bf16.msra.mxu0 %v255_v2  ;;  %v268_v14 = vld [vmem:[%s359_s0 + $0x6] ss:$0 sps:$4 sm:$0x11]   ;;  %v269_v15 = vld [vmem:[%s359_s0 + $0x7] ss:$0 sps:$4 sm:$0x11]   ;;  %v82_v18 = vunpack.c.l.b16 %v266_v10  ;;  %v83_v19 = vunpack.c.l.b16 %v267_v11 }
   0x7   :  { %236 = vmatprep.subr.bf16.mxu0 %v272_v0  ;;  %v86_v20 = vrot.slane %v79_v13, 7  ;;  %v84_v21 = vunpack.c.l.b16 %v268_v14  ;;  %v89_v22 = vrot.slane %v80_v16, 6  ;;  %v92_v23 = vrot.slane %v81_v17, 5  ;;  %v260_v34 = vld [vmem:[%s358_s1 + $0x8] sm:$0xff]   ;;  %v261_v37 = vld [vmem:[%s358_s1] sm:$0xff]  }
   0x8   :  { %v95_v25 = vrot.slane %v82_v18, 4  ;;  %v98_v26 = vrot.slane %v83_v19, 3  ;;  %v85_v28 = vunpack.c.l.b16 %v269_v15  ;;  %v214_v40 = vld [vmem:[%s360_s2] ss:$0 sm:$0xff] }
   0x9   :  { %v88_v24 = vsel %vm87_vm1, %v86_v20, %v78_v12  ;;  %v101_v31 = vrot.slane %v84_v21, 2 }
   0xa   :  { %237 = vmatpush3.bf16.msra.mxu0 %v256_v3  ;;  %v91_v29 = vsel %vm90_vm2, %v89_v22, %v88_v24  ;;  %v104_v35 = vrot.slane %v85_v28, 1 }
   0xb   :  { %238 = vmatprep.subr.bf16.mxu0 %v272_v0  ;;  %v94_v30 = vsel %vm93_vm3, %v92_v23, %v91_v29 }
   0xc   :  { %v97_v32 = vsel %vm96_vm4, %v95_v25, %v94_v30 }
   0xd   :  { %v100_v33 = vsel %vm99_vm5, %v98_v26, %v97_v32 }
   0xe   :  { %239 = vmatpush3.bf16.msra.mxu0 %v257_v4  ;;  %v103_v36 = vsel %vm102_vm6, %v101_v31, %v100_v33 }
   0xf   :  { %240 = vmatprep.subr.bf16.mxu0 %v272_v0  ;;  %v106_v38 = vsel %vm105_vm7, %v104_v35, %v103_v36 }
  0x10   :  { %v107_v39 = vpack.c.b16 %v106_v38, %v106_v38 }
  0x12   :  { %241 = vmatpush3.bf16.msra.mxu0 %v258_v7 }
  0x13   :  { %242 = vmatprep.subr.bf16.mxu0 %v272_v0 }
  0x16   :  { %243 = vmatpush3.bf16.msra.mxu0 %v259_v27 }
  0x17   :  { %244 = vmatprep.subr.bf16.mxu0 %v272_v0 }
  0x1a   :  { %245 = vmatpush3.bf16.msra.mxu0 %v260_v34 }
  0x1b   :  { %246 = vmatprep.subr.bf16.mxu0 %v272_v0 }
  0x1e   :  { %247 = vmatpush3.bf16.msra.mxu0 %v261_v37 }
  0x21   :  { %249 = vmatmul.mubr.bf16.vlgmr.msra.gmra.mxu0 %v107_v39 }
  0xe1   :  { %v191_v41 = vpop.f32.mrf.mxu0 }
  0xe2   :  { %v192_v42 = vadd.f32 %v214_v40, %v191_v41 }
  0xe3   :  { %v250_v43 = vpop.f32.mrf.mxu0 }
  0xe4   :  { %v197_v44 = vmul.f32 0.5, %v192_v42 }
  0xe5   :  { %v194_v45 = vpop.f32.mrf.mxu0 }
  0xe6   :  { %270 = vtanh.f32 %v197_v44 }
  0xe7   :  { %v251_v46 = vpop.f32.mrf.mxu0 }
  0xf3   :  { %v271_v47 = vpop.eup %270 }
  0xf4   :  { %v199_v48 = vadd.f32 1.0, %v271_v47 }
  0xf6   :  { %v200_v49 = vmul.f32 0.5, %v199_v48 }
  0xf8   :  { %201 = vst [vmem:[%s361_s3] sm:$0xff] %v200_v49 }

</bundles_post_ra>
